<compile_context>
chip_gen: v7x
topology: tpu7x:2x2x1
jax: 0.10.0
libtpu: 0.0.40
codegen_flags: <defaults>
</compile_context>

<pallas_src>
import numpy as np

import jax
import jax.numpy as jnp
from jax.experimental import pallas as pl
from jax.experimental.pallas import tpu as pltpu


_VMEM = pl.BlockSpec(memory_space=pltpu.MemorySpace.VMEM)
_K = 4          # conv kernel size (all layers)
_EPS = 1e-5     # BatchNorm2d eps (PyTorch default)
_SLOPE = 0.2    # LeakyReLU negative slope


# --------------------- host-side operand precomputation ---------------------

def _sel_matrices(N, H, OH, stride, pad):
    """[K, N*OH, N*H] bf16 row-selection matrices (one per kernel row kh).

    Sel[kh, n*OH+oh, n*H+h] = 1  iff  h == stride*oh + kh - pad.
    Out-of-range h simply leaves a zero row => implicit zero padding.
    """
    sel = np.zeros((_K, N * OH, N * H), np.float32)
    for kh in range(_K):
        for n in range(N):
            for oh in range(OH):
                h = stride * oh + kh - pad
                if 0 <= h < H:
                    sel[kh, n * OH + oh, n * H + h] = 1.0
    return jnp.asarray(sel, jnp.bfloat16)


def _weight_matrices(w_oihw, W, OW, stride, pad):
    """[K, W*Cin, OW*Cout] bf16: W-stride/pad selection + conv weights, per kh.

    M[kh, w*Cin+ci, ow*Cout+co] = w[co, ci, kh, kw]  with kw = w - stride*ow + pad.
    """
    w = np.asarray(jax.device_get(w_oihw), np.float32)      # [Cout, Cin, K, K]
    Cout, Cin, _, _ = w.shape
    m = np.zeros((_K, W * Cin, OW * Cout), np.float32)
    for kh in range(_K):
        for ow in range(OW):
            for kw in range(_K):
                iw = stride * ow + kw - pad
                if 0 <= iw < W:
                    m[kh, iw * Cin:(iw + 1) * Cin, ow * Cout:(ow + 1) * Cout] = \
                        w[:, :, kh, kw].T
    return jnp.asarray(m, jnp.bfloat16)


def _bn_operands(gamma, beta, N, OH, OW, C):
    """Lane-broadcast gamma/beta [1, OW*C] and per-channel mean operator P.

    P[(ow,c), (ow',c')] = (c == c') / (N*OH*OW): `acc @ P` summed over rows
    yields the per-channel batch mean, already broadcast back to the
    (ow, c)-interleaved lane layout.  Single f32 MXU op, no lane reshapes.
    """
    g = np.tile(np.asarray(jax.device_get(gamma), np.float32), OW)[None, :]
    b = np.tile(np.asarray(jax.device_get(beta), np.float32), OW)[None, :]
    idx = np.arange(OW * C)
    P = (idx[:, None] % C == idx[None, :] % C).astype(np.float32) / float(N * OH * OW)
    return jnp.asarray(P), jnp.asarray(g), jnp.asarray(b)


def _build_plan(params, N, Cin, H, W):
    """Precompute all fused-kernel operands + static per-layer metadata."""
    layer_defs = [("w1", 2, 1, None), ("w2", 2, 1, "bn2"), ("w3", 2, 1, "bn3"),
                  ("w4", 2, 1, "bn4"), ("w5", 1, 0, None)]
    operands, plan = [], []
    flops = 0
    h, w_sp, cin = H, W, Cin
    for li, (wname, s, p, bn) in enumerate(layer_defs):
        wt = params[wname]
        cout = int(wt.shape[0])
        OH = (h + 2 * p - _K) // s + 1
        OW = (w_sp + 2 * p - _K) // s + 1
        operands += [_sel_matrices(N, h, OH, s, p),
                     _weight_matrices(wt, w_sp, OW, s, p)]
        r_prev, r_out, wc_prev, owc = N * h, N * OH, w_sp * cin, OW * cout
        flops += 2 * _K * (r_out * r_prev * wc_prev + r_out * wc_prev * owc)
        if bn is not None:
            operands += list(_bn_operands(params[bn + "_g"], params[bn + "_b"],
                                          N, OH, OW, cout))
            flops += 2 * 2 * r_out * owc * owc
        plan.append(dict(r_out=r_out, owc=owc, bn=bn is not None,
                         act="sigmoid" if li == len(layer_defs) - 1 else "lrelu"))
        h, w_sp, cin = OH, OW, cout
    return plan, operands, flops


# ------------------------------ fused kernel --------------------------------

def _make_kernel(plan):
    def kernel(*refs):
        x_ref, mid, o_ref = refs[0], refs[1:-1], refs[-1]
        a = x_ref[...]                                    # [N*H, W*Cin] bf16
        it = iter(mid)
        for l in plan:
            sel_ref, m_ref = next(it), next(it)
            # Conv as 8 small matmuls: row-select (H stride + pad) then
            # combined W-select + weights, accumulated in f32.
            acc = jnp.zeros((l["r_out"], l["owc"]), jnp.float32)
            for kh in range(_K):
                rows = jnp.dot(sel_ref[kh], a, preferred_element_type=jnp.float32)
                acc = acc + jnp.dot(rows.astype(jnp.bfloat16), m_ref[kh],
                                    preferred_element_type=jnp.float32)
            if l["bn"]:
                # Training-mode BatchNorm2d (biased batch stats), f32 math.
                p_ref, g_ref, b_ref = next(it), next(it), next(it)
                P = p_ref[...]
                mean_b = jnp.sum(jnp.dot(acc, P, preferred_element_type=jnp.float32),
                                 axis=0, keepdims=True)
                xc = acc - mean_b
                var_b = jnp.sum(jnp.dot(xc * xc, P, preferred_element_type=jnp.float32),
                                axis=0, keepdims=True)
                acc = xc * jax.lax.rsqrt(var_b + _EPS) * g_ref[...] + b_ref[...]
            if l["act"] == "lrelu":
                acc = jnp.where(acc >= 0, acc, _SLOPE * acc)
                a = acc.astype(jnp.bfloat16)              # next layer's input (VMEM only)
            else:
                o_ref[...] = jax.nn.sigmoid(acc).astype(o_ref.dtype)
    return kernel


def make_discriminator(params, N, Cin, H, W):
    """Returns a jitted forward(x_nchw) -> [N,1,1,1] using one pallas_call."""
    plan, operands, flops = _build_plan(params, N, Cin, H, W)
    bytes_accessed = (N * H * W * Cin * 2 + N * 4
                      + sum(int(o.size) * o.dtype.itemsize for o in operands))
    call = pl.pallas_call(
        _make_kernel(plan),
        out_shape=jax.ShapeDtypeStruct((N, 1), jnp.float32),
        in_specs=[_VMEM] * (1 + len(operands)),
        out_specs=_VMEM,
        cost_estimate=pl.CostEstimate(flops=flops,
                                      transcendentals=N + 3 * 128,
                                      bytes_accessed=bytes_accessed),
    )

    @jax.jit
    def forward(x_nchw):
        x = jnp.transpose(x_nchw, (0, 2, 3, 1))            # NCHW -> NHWC, once
        x2d = x.reshape(N * H, W * Cin).astype(jnp.bfloat16)
        return call(x2d, *operands).reshape(N, 1, 1, 1)

    return forward


# ----------------------------- pure-JAX reference ---------------------------

def reference_forward(x, params):
    def conv(x, w, stride, pad):
        return jax.lax.conv_general_dilated(
            x, w, (stride, stride), [(pad, pad), (pad, pad)],
            dimension_numbers=("NCHW", "OIHW", "NCHW"))

    def lrelu(x):
        return jnp.where(x >= 0, x, 0.2 * x)

    def bn(x, g, b):
        mean = jnp.mean(x, axis=(0, 2, 3), keepdims=True)
        var = jnp.mean(jnp.square(x - mean), axis=(0, 2, 3), keepdims=True)
        return ((x - mean) * jax.lax.rsqrt(var + 1e-5)
                * g.reshape(1, -1, 1, 1) + b.reshape(1, -1, 1, 1))

    x = lrelu(conv(x, params["w1"], 2, 1))
    for i in (2, 3, 4):
        x = lrelu(bn(conv(x, params[f"w{i}"], 2, 1),
                     params[f"bn{i}_g"], params[f"bn{i}_b"]))
    return jax.nn.sigmoid(conv(x, params["w5"], 1, 0))


# --------------------------------- main --------------------------------------

if __name__ == "__main__":
    key = jax.random.PRNGKey(0)
    N, Cin, H, W = 2, 3, 64, 64          # 64x64 input -> 1x1 score (DCGAN)
    C = 8                                # out_channel

    ks = jax.random.split(key, 6)
    params = {
        # conv weights ~ N(0, 0.02), bias=False (as in the module)
        "w1": 0.02 * jax.random.normal(ks[0], (C, Cin, 4, 4), jnp.float32),
        "w2": 0.02 * jax.random.normal(ks[1], (C, C, 4, 4), jnp.float32),
        "w3": 0.02 * jax.random.normal(ks[2], (C, C, 4, 4), jnp.float32),
        "w4": 0.02 * jax.random.normal(ks[3], (C, C, 4, 4), jnp.float32),
        "w5": 0.02 * jax.random.normal(ks[4], (1, C, 4, 4), jnp.float32),
        # BatchNorm2d default affine init: weight=1, bias=0
        "bn2_g": jnp.ones((C,), jnp.float32), "bn2_b": jnp.zeros((C,), jnp.float32),
        "bn3_g": jnp.ones((C,), jnp.float32), "bn3_b": jnp.zeros((C,), jnp.float32),
        "bn4_g": jnp.ones((C,), jnp.float32), "bn4_b": jnp.zeros((C,), jnp.float32),
    }

    x = jax.random.normal(ks[5], (N, Cin, H, W), jnp.float32)

    forward = make_discriminator(params, N, Cin, H, W)     # operands built once
    out = jax.block_until_ready(forward(x))
    assert out.shape == (N, 1, 1, 1), out.shape

    ref = jax.block_until_ready(jax.jit(reference_forward)(x, params))
    # bf16 MXU operands with f32 accumulation/epilogue (same effective
    # precision as the previous per-layer version) vs f32 reference.
    assert jnp.allclose(out, ref, rtol=5e-3, atol=5e-3), (out, ref)

    print("KERNEL_OK")
</pallas_src>

<mosaic_0001>
module attributes {stable_mosaic.version = 11 : i64} {
  func.func @kernel(%arg0: memref<128x192xbf16, #tpu.memory_space<vmem>>, %arg1: memref<4x64x128xbf16, #tpu.memory_space<vmem>>, %arg2: memref<4x192x256xbf16, #tpu.memory_space<vmem>>, %arg3: memref<4x32x64xbf16, #tpu.memory_space<vmem>>, %arg4: memref<4x256x128xbf16, #tpu.memory_space<vmem>>, %arg5: memref<128x128xf32, #tpu.memory_space<vmem>>, %arg6: memref<1x128xf32, #tpu.memory_space<vmem>>, %arg7: memref<1x128xf32, #tpu.memory_space<vmem>>, %arg8: memref<4x16x32xbf16, #tpu.memory_space<vmem>>, %arg9: memref<4x128x64xbf16, #tpu.memory_space<vmem>>, %arg10: memref<64x64xf32, #tpu.memory_space<vmem>>, %arg11: memref<1x64xf32, #tpu.memory_space<vmem>>, %arg12: memref<1x64xf32, #tpu.memory_space<vmem>>, %arg13: memref<4x8x16xbf16, #tpu.memory_space<vmem>>, %arg14: memref<4x64x32xbf16, #tpu.memory_space<vmem>>, %arg15: memref<32x32xf32, #tpu.memory_space<vmem>>, %arg16: memref<1x32xf32, #tpu.memory_space<vmem>>, %arg17: memref<1x32xf32, #tpu.memory_space<vmem>>, %arg18: memref<4x2x8xbf16, #tpu.memory_space<vmem>>, %arg19: memref<4x32x1xbf16, #tpu.memory_space<vmem>>, %arg20: memref<2x1xf32, #tpu.memory_space<vmem>>) attributes {dimension_semantics = [], scalar_prefetch = 0 : i64, scratch_operands = 0 : i64, tpu.core_type = #tpu.core_type<tc>} {
    %c0 = arith.constant 0 : index
    %c0_0 = arith.constant 0 : index
    %0 = vector.load %arg0[%c0, %c0_0] : memref<128x192xbf16, #tpu.memory_space<vmem>>, vector<128x192xbf16>
    %cst = arith.constant 0.000000e+00 : f32
    %1 = vector.broadcast %cst : f32 to vector<64x256xf32>
    %c0_1 = arith.constant 0 : index
    %c0_2 = arith.constant 0 : index
    %c0_3 = arith.constant 0 : index
    %2 = vector.load %arg1[%c0_1, %c0_2, %c0_3] : memref<4x64x128xbf16, #tpu.memory_space<vmem>>, vector<1x64x128xbf16>
    %3 = vector.shape_cast %2 : vector<1x64x128xbf16> to vector<64x128xbf16>
    %cst_4 = arith.constant dense<0.000000e+00> : vector<64x192xf32>
    %4 = tpu.matmul %3, %0, %cst_4 {dimension_numbers = #tpu.dot_dimension_numbers<[1], [0], [0], [1], [0, 0, 1, 1], [], []>} : vector<64x128xbf16>, vector<128x192xbf16>, vector<64x192xf32> -> vector<64x192xf32>
    %5 = arith.truncf %4 : vector<64x192xf32> to vector<64x192xbf16>
    %c0_5 = arith.constant 0 : index
    %c0_6 = arith.constant 0 : index
    %c0_7 = arith.constant 0 : index
    %6 = vector.load %arg2[%c0_5, %c0_6, %c0_7] : memref<4x192x256xbf16, #tpu.memory_space<vmem>>, vector<1x192x256xbf16>
    %7 = vector.shape_cast %6 : vector<1x192x256xbf16> to vector<192x256xbf16>
    %cst_8 = arith.constant dense<0.000000e+00> : vector<64x256xf32>
    %8 = tpu.matmul %5, %7, %cst_8 {dimension_numbers = #tpu.dot_dimension_numbers<[1], [0], [0], [1], [0, 0, 1, 1], [], []>} : vector<64x192xbf16>, vector<192x256xbf16>, vector<64x256xf32> -> vector<64x256xf32>
    %9 = arith.addf %1, %8 : vector<64x256xf32>
    %c1 = arith.constant 1 : index
    %c0_9 = arith.constant 0 : index
    %c0_10 = arith.constant 0 : index
    %10 = vector.load %arg1[%c1, %c0_9, %c0_10] : memref<4x64x128xbf16, #tpu.memory_space<vmem>>, vector<1x64x128xbf16>
    %11 = vector.shape_cast %10 : vector<1x64x128xbf16> to vector<64x128xbf16>
    %cst_11 = arith.constant dense<0.000000e+00> : vector<64x192xf32>
    %12 = tpu.matmul %11, %0, %cst_11 {dimension_numbers = #tpu.dot_dimension_numbers<[1], [0], [0], [1], [0, 0, 1, 1], [], []>} : vector<64x128xbf16>, vector<128x192xbf16>, vector<64x192xf32> -> vector<64x192xf32>
    %13 = arith.truncf %12 : vector<64x192xf32> to vector<64x192xbf16>
    %c1_12 = arith.constant 1 : index
    %c0_13 = arith.constant 0 : index
    %c0_14 = arith.constant 0 : index
    %14 = vector.load %arg2[%c1_12, %c0_13, %c0_14] : memref<4x192x256xbf16, #tpu.memory_space<vmem>>, vector<1x192x256xbf16>
    %15 = vector.shape_cast %14 : vector<1x192x256xbf16> to vector<192x256xbf16>
    %cst_15 = arith.constant dense<0.000000e+00> : vector<64x256xf32>
    %16 = tpu.matmul %13, %15, %cst_15 {dimension_numbers = #tpu.dot_dimension_numbers<[1], [0], [0], [1], [0, 0, 1, 1], [], []>} : vector<64x192xbf16>, vector<192x256xbf16>, vector<64x256xf32> -> vector<64x256xf32>
    %17 = arith.addf %9, %16 : vector<64x256xf32>
    %c2 = arith.constant 2 : index
    %c0_16 = arith.constant 0 : index
    %c0_17 = arith.constant 0 : index
    %18 = vector.load %arg1[%c2, %c0_16, %c0_17] : memref<4x64x128xbf16, #tpu.memory_space<vmem>>, vector<1x64x128xbf16>
    %19 = vector.shape_cast %18 : vector<1x64x128xbf16> to vector<64x128xbf16>
    %cst_18 = arith.constant dense<0.000000e+00> : vector<64x192xf32>
    %20 = tpu.matmul %19, %0, %cst_18 {dimension_numbers = #tpu.dot_dimension_numbers<[1], [0], [0], [1], [0, 0, 1, 1], [], []>} : vector<64x128xbf16>, vector<128x192xbf16>, vector<64x192xf32> -> vector<64x192xf32>
    %21 = arith.truncf %20 : vector<64x192xf32> to vector<64x192xbf16>
    %c2_19 = arith.constant 2 : index
    %c0_20 = arith.constant 0 : index
    %c0_21 = arith.constant 0 : index
    %22 = vector.load %arg2[%c2_19, %c0_20, %c0_21] : memref<4x192x256xbf16, #tpu.memory_space<vmem>>, vector<1x192x256xbf16>
    %23 = vector.shape_cast %22 : vector<1x192x256xbf16> to vector<192x256xbf16>
    %cst_22 = arith.constant dense<0.000000e+00> : vector<64x256xf32>
    %24 = tpu.matmul %21, %23, %cst_22 {dimension_numbers = #tpu.dot_dimension_numbers<[1], [0], [0], [1], [0, 0, 1, 1], [], []>} : vector<64x192xbf16>, vector<192x256xbf16>, vector<64x256xf32> -> vector<64x256xf32>
    %25 = arith.addf %17, %24 : vector<64x256xf32>
    %c3 = arith.constant 3 : index
    %c0_23 = arith.constant 0 : index
    %c0_24 = arith.constant 0 : index
    %26 = vector.load %arg1[%c3, %c0_23, %c0_24] : memref<4x64x128xbf16, #tpu.memory_space<vmem>>, vector<1x64x128xbf16>
    %27 = vector.shape_cast %26 : vector<1x64x128xbf16> to vector<64x128xbf16>
    %cst_25 = arith.constant dense<0.000000e+00> : vector<64x192xf32>
    %28 = tpu.matmul %27, %0, %cst_25 {dimension_numbers = #tpu.dot_dimension_numbers<[1], [0], [0], [1], [0, 0, 1, 1], [], []>} : vector<64x128xbf16>, vector<128x192xbf16>, vector<64x192xf32> -> vector<64x192xf32>
    %29 = arith.truncf %28 : vector<64x192xf32> to vector<64x192xbf16>
    %c3_26 = arith.constant 3 : index
    %c0_27 = arith.constant 0 : index
    %c0_28 = arith.constant 0 : index
    %30 = vector.load %arg2[%c3_26, %c0_27, %c0_28] : memref<4x192x256xbf16, #tpu.memory_space<vmem>>, vector<1x192x256xbf16>
    %31 = vector.shape_cast %30 : vector<1x192x256xbf16> to vector<192x256xbf16>
    %cst_29 = arith.constant dense<0.000000e+00> : vector<64x256xf32>
    %32 = tpu.matmul %29, %31, %cst_29 {dimension_numbers = #tpu.dot_dimension_numbers<[1], [0], [0], [1], [0, 0, 1, 1], [], []>} : vector<64x192xbf16>, vector<192x256xbf16>, vector<64x256xf32> -> vector<64x256xf32>
    %33 = arith.addf %25, %32 : vector<64x256xf32>
    %cst_30 = arith.constant 0.000000e+00 : f32
    %34 = vector.broadcast %cst_30 : f32 to vector<64x256xf32>
    %35 = arith.cmpf oge, %33, %34 : vector<64x256xf32>
    %cst_31 = arith.constant 2.000000e-01 : f32
    %36 = vector.broadcast %cst_31 : f32 to vector<64x256xf32>
    %37 = arith.mulf %36, %33 : vector<64x256xf32>
    %38 = arith.select %35, %33, %37 : vector<64x256xi1>, vector<64x256xf32>
    %39 = arith.truncf %38 : vector<64x256xf32> to vector<64x256xbf16>
    %cst_32 = arith.constant 0.000000e+00 : f32
    %40 = vector.broadcast %cst_32 : f32 to vector<32x128xf32>
    %c0_33 = arith.constant 0 : index
    %c0_34 = arith.constant 0 : index
    %c0_35 = arith.constant 0 : index
    %41 = vector.load %arg3[%c0_33, %c0_34, %c0_35] : memref<4x32x64xbf16, #tpu.memory_space<vmem>>, vector<1x32x64xbf16>
    %42 = vector.shape_cast %41 : vector<1x32x64xbf16> to vector<32x64xbf16>
    %cst_36 = arith.constant dense<0.000000e+00> : vector<32x256xf32>
    %43 = tpu.matmul %42, %39, %cst_36 {dimension_numbers = #tpu.dot_dimension_numbers<[1], [0], [0], [1], [0, 0, 1, 1], [], []>} : vector<32x64xbf16>, vector<64x256xbf16>, vector<32x256xf32> -> vector<32x256xf32>
    %44 = arith.truncf %43 : vector<32x256xf32> to vector<32x256xbf16>
    %c0_37 = arith.constant 0 : index
    %c0_38 = arith.constant 0 : index
    %c0_39 = arith.constant 0 : index
    %45 = vector.load %arg4[%c0_37, %c0_38, %c0_39] : memref<4x256x128xbf16, #tpu.memory_space<vmem>>, vector<1x256x128xbf16>
    %46 = vector.shape_cast %45 : vector<1x256x128xbf16> to vector<256x128xbf16>
    %cst_40 = arith.constant dense<0.000000e+00> : vector<32x128xf32>
    %47 = tpu.matmul %44, %46, %cst_40 {dimension_numbers = #tpu.dot_dimension_numbers<[1], [0], [0], [1], [0, 0, 1, 1], [], []>} : vector<32x256xbf16>, vector<256x128xbf16>, vector<32x128xf32> -> vector<32x128xf32>
    %48 = arith.addf %40, %47 : vector<32x128xf32>
    %c1_41 = arith.constant 1 : index
    %c0_42 = arith.constant 0 : index
    %c0_43 = arith.constant 0 : index
    %49 = vector.load %arg3[%c1_41, %c0_42, %c0_43] : memref<4x32x64xbf16, #tpu.memory_space<vmem>>, vector<1x32x64xbf16>
    %50 = vector.shape_cast %49 : vector<1x32x64xbf16> to vector<32x64xbf16>
    %cst_44 = arith.constant dense<0.000000e+00> : vector<32x256xf32>
    %51 = tpu.matmul %50, %39, %cst_44 {dimension_numbers = #tpu.dot_dimension_numbers<[1], [0], [0], [1], [0, 0, 1, 1], [], []>} : vector<32x64xbf16>, vector<64x256xbf16>, vector<32x256xf32> -> vector<32x256xf32>
    %52 = arith.truncf %51 : vector<32x256xf32> to vector<32x256xbf16>
    %c1_45 = arith.constant 1 : index
    %c0_46 = arith.constant 0 : index
    %c0_47 = arith.constant 0 : index
    %53 = vector.load %arg4[%c1_45, %c0_46, %c0_47] : memref<4x256x128xbf16, #tpu.memory_space<vmem>>, vector<1x256x128xbf16>
    %54 = vector.shape_cast %53 : vector<1x256x128xbf16> to vector<256x128xbf16>
    %cst_48 = arith.constant dense<0.000000e+00> : vector<32x128xf32>
    %55 = tpu.matmul %52, %54, %cst_48 {dimension_numbers = #tpu.dot_dimension_numbers<[1], [0], [0], [1], [0, 0, 1, 1], [], []>} : vector<32x256xbf16>, vector<256x128xbf16>, vector<32x128xf32> -> vector<32x128xf32>
    %56 = arith.addf %48, %55 : vector<32x128xf32>
    %c2_49 = arith.constant 2 : index
    %c0_50 = arith.constant 0 : index
    %c0_51 = arith.constant 0 : index
    %57 = vector.load %arg3[%c2_49, %c0_50, %c0_51] : memref<4x32x64xbf16, #tpu.memory_space<vmem>>, vector<1x32x64xbf16>
    %58 = vector.shape_cast %57 : vector<1x32x64xbf16> to vector<32x64xbf16>
    %cst_52 = arith.constant dense<0.000000e+00> : vector<32x256xf32>
    %59 = tpu.matmul %58, %39, %cst_52 {dimension_numbers = #tpu.dot_dimension_numbers<[1], [0], [0], [1], [0, 0, 1, 1], [], []>} : vector<32x64xbf16>, vector<64x256xbf16>, vector<32x256xf32> -> vector<32x256xf32>
    %60 = arith.truncf %59 : vector<32x256xf32> to vector<32x256xbf16>
    %c2_53 = arith.constant 2 : index
    %c0_54 = arith.constant 0 : index
    %c0_55 = arith.constant 0 : index
    %61 = vector.load %arg4[%c2_53, %c0_54, %c0_55] : memref<4x256x128xbf16, #tpu.memory_space<vmem>>, vector<1x256x128xbf16>
    %62 = vector.shape_cast %61 : vector<1x256x128xbf16> to vector<256x128xbf16>
    %cst_56 = arith.constant dense<0.000000e+00> : vector<32x128xf32>
    %63 = tpu.matmul %60, %62, %cst_56 {dimension_numbers = #tpu.dot_dimension_numbers<[1], [0], [0], [1], [0, 0, 1, 1], [], []>} : vector<32x256xbf16>, vector<256x128xbf16>, vector<32x128xf32> -> vector<32x128xf32>
    %64 = arith.addf %56, %63 : vector<32x128xf32>
    %c3_57 = arith.constant 3 : index
    %c0_58 = arith.constant 0 : index
    %c0_59 = arith.constant 0 : index
    %65 = vector.load %arg3[%c3_57, %c0_58, %c0_59] : memref<4x32x64xbf16, #tpu.memory_space<vmem>>, vector<1x32x64xbf16>
    %66 = vector.shape_cast %65 : vector<1x32x64xbf16> to vector<32x64xbf16>
    %cst_60 = arith.constant dense<0.000000e+00> : vector<32x256xf32>
    %67 = tpu.matmul %66, %39, %cst_60 {dimension_numbers = #tpu.dot_dimension_numbers<[1], [0], [0], [1], [0, 0, 1, 1], [], []>} : vector<32x64xbf16>, vector<64x256xbf16>, vector<32x256xf32> -> vector<32x256xf32>
    %68 = arith.truncf %67 : vector<32x256xf32> to vector<32x256xbf16>
    %c3_61 = arith.constant 3 : index
    %c0_62 = arith.constant 0 : index
    %c0_63 = arith.constant 0 : index
    %69 = vector.load %arg4[%c3_61, %c0_62, %c0_63] : memref<4x256x128xbf16, #tpu.memory_space<vmem>>, vector<1x256x128xbf16>
    %70 = vector.shape_cast %69 : vector<1x256x128xbf16> to vector<256x128xbf16>
    %cst_64 = arith.constant dense<0.000000e+00> : vector<32x128xf32>
    %71 = tpu.matmul %68, %70, %cst_64 {dimension_numbers = #tpu.dot_dimension_numbers<[1], [0], [0], [1], [0, 0, 1, 1], [], []>} : vector<32x256xbf16>, vector<256x128xbf16>, vector<32x128xf32> -> vector<32x128xf32>
    %72 = arith.addf %64, %71 : vector<32x128xf32>
    %c0_65 = arith.constant 0 : index
    %c0_66 = arith.constant 0 : index
    %73 = vector.load %arg5[%c0_65, %c0_66] : memref<128x128xf32, #tpu.memory_space<vmem>>, vector<128x128xf32>
    %cst_67 = arith.constant dense<0.000000e+00> : vector<32x128xf32>
    %74 = tpu.matmul %72, %73, %cst_67 {dimension_numbers = #tpu.dot_dimension_numbers<[1], [0], [0], [1], [0, 0, 1, 1], [], []>} : vector<32x128xf32>, vector<128x128xf32>, vector<32x128xf32> -> vector<32x128xf32>
    %cst_68 = arith.constant dense<0.000000e+00> : vector<128xf32>
    %75 = vector.multi_reduction <add>, %74, %cst_68 [0] : vector<32x128xf32> to vector<128xf32>
    %76 = vector.shape_cast %75 : vector<128xf32> to vector<1x128xf32>
    %77 = vector.broadcast %76 : vector<1x128xf32> to vector<32x128xf32>
    %78 = arith.subf %72, %77 : vector<32x128xf32>
    %79 = arith.mulf %78, %78 : vector<32x128xf32>
    %cst_69 = arith.constant dense<0.000000e+00> : vector<32x128xf32>
    %80 = tpu.matmul %79, %73, %cst_69 {dimension_numbers = #tpu.dot_dimension_numbers<[1], [0], [0], [1], [0, 0, 1, 1], [], []>} : vector<32x128xf32>, vector<128x128xf32>, vector<32x128xf32> -> vector<32x128xf32>
    %cst_70 = arith.constant dense<0.000000e+00> : vector<128xf32>
    %81 = vector.multi_reduction <add>, %80, %cst_70 [0] : vector<32x128xf32> to vector<128xf32>
    %82 = vector.shape_cast %81 : vector<128xf32> to vector<1x128xf32>
    %cst_71 = arith.constant 9.99999974E-6 : f32
    %83 = vector.broadcast %cst_71 : f32 to vector<1x128xf32>
    %84 = arith.addf %82, %83 : vector<1x128xf32>
    %85 = math.rsqrt %84 : vector<1x128xf32>
    %86 = vector.broadcast %85 : vector<1x128xf32> to vector<32x128xf32>
    %87 = arith.mulf %78, %86 : vector<32x128xf32>
    %c0_72 = arith.constant 0 : index
    %c0_73 = arith.constant 0 : index
    %88 = vector.load %arg6[%c0_72, %c0_73] : memref<1x128xf32, #tpu.memory_space<vmem>>, vector<1x128xf32>
    %89 = vector.broadcast %88 : vector<1x128xf32> to vector<32x128xf32>
    %90 = arith.mulf %87, %89 : vector<32x128xf32>
    %c0_74 = arith.constant 0 : index
    %c0_75 = arith.constant 0 : index
    %91 = vector.load %arg7[%c0_74, %c0_75] : memref<1x128xf32, #tpu.memory_space<vmem>>, vector<1x128xf32>
    %92 = vector.broadcast %91 : vector<1x128xf32> to vector<32x128xf32>
    %93 = arith.addf %90, %92 : vector<32x128xf32>
    %cst_76 = arith.constant 0.000000e+00 : f32
    %94 = vector.broadcast %cst_76 : f32 to vector<32x128xf32>
    %95 = arith.cmpf oge, %93, %94 : vector<32x128xf32>
    %cst_77 = arith.constant 2.000000e-01 : f32
    %96 = vector.broadcast %cst_77 : f32 to vector<32x128xf32>
    %97 = arith.mulf %96, %93 : vector<32x128xf32>
    %98 = arith.select %95, %93, %97 : vector<32x128xi1>, vector<32x128xf32>
    %99 = arith.truncf %98 : vector<32x128xf32> to vector<32x128xbf16>
    %cst_78 = arith.constant 0.000000e+00 : f32
    %100 = vector.broadcast %cst_78 : f32 to vector<16x64xf32>
    %c0_79 = arith.constant 0 : index
    %c0_80 = arith.constant 0 : index
    %c0_81 = arith.constant 0 : index
    %101 = vector.load %arg8[%c0_79, %c0_80, %c0_81] : memref<4x16x32xbf16, #tpu.memory_space<vmem>>, vector<1x16x32xbf16>
    %102 = vector.shape_cast %101 : vector<1x16x32xbf16> to vector<16x32xbf16>
    %cst_82 = arith.constant dense<0.000000e+00> : vector<16x128xf32>
    %103 = tpu.matmul %102, %99, %cst_82 {dimension_numbers = #tpu.dot_dimension_numbers<[1], [0], [0], [1], [0, 0, 1, 1], [], []>} : vector<16x32xbf16>, vector<32x128xbf16>, vector<16x128xf32> -> vector<16x128xf32>
    %104 = arith.truncf %103 : vector<16x128xf32> to vector<16x128xbf16>
    %c0_83 = arith.constant 0 : index
    %c0_84 = arith.constant 0 : index
    %c0_85 = arith.constant 0 : index
    %105 = vector.load %arg9[%c0_83, %c0_84, %c0_85] : memref<4x128x64xbf16, #tpu.memory_space<vmem>>, vector<1x128x64xbf16>
    %106 = vector.shape_cast %105 : vector<1x128x64xbf16> to vector<128x64xbf16>
    %cst_86 = arith.constant dense<0.000000e+00> : vector<16x64xf32>
    %107 = tpu.matmul %104, %106, %cst_86 {dimension_numbers = #tpu.dot_dimension_numbers<[1], [0], [0], [1], [0, 0, 1, 1], [], []>} : vector<16x128xbf16>, vector<128x64xbf16>, vector<16x64xf32> -> vector<16x64xf32>
    %108 = arith.addf %100, %107 : vector<16x64xf32>
    %c1_87 = arith.constant 1 : index
    %c0_88 = arith.constant 0 : index
    %c0_89 = arith.constant 0 : index
    %109 = vector.load %arg8[%c1_87, %c0_88, %c0_89] : memref<4x16x32xbf16, #tpu.memory_space<vmem>>, vector<1x16x32xbf16>
    %110 = vector.shape_cast %109 : vector<1x16x32xbf16> to vector<16x32xbf16>
    %cst_90 = arith.constant dense<0.000000e+00> : vector<16x128xf32>
    %111 = tpu.matmul %110, %99, %cst_90 {dimension_numbers = #tpu.dot_dimension_numbers<[1], [0], [0], [1], [0, 0, 1, 1], [], []>} : vector<16x32xbf16>, vector<32x128xbf16>, vector<16x128xf32> -> vector<16x128xf32>
    %112 = arith.truncf %111 : vector<16x128xf32> to vector<16x128xbf16>
    %c1_91 = arith.constant 1 : index
    %c0_92 = arith.constant 0 : index
    %c0_93 = arith.constant 0 : index
    %113 = vector.load %arg9[%c1_91, %c0_92, %c0_93] : memref<4x128x64xbf16, #tpu.memory_space<vmem>>, vector<1x128x64xbf16>
    %114 = vector.shape_cast %113 : vector<1x128x64xbf16> to vector<128x64xbf16>
    %cst_94 = arith.constant dense<0.000000e+00> : vector<16x64xf32>
    %115 = tpu.matmul %112, %114, %cst_94 {dimension_numbers = #tpu.dot_dimension_numbers<[1], [0], [0], [1], [0, 0, 1, 1], [], []>} : vector<16x128xbf16>, vector<128x64xbf16>, vector<16x64xf32> -> vector<16x64xf32>
    %116 = arith.addf %108, %115 : vector<16x64xf32>
    %c2_95 = arith.constant 2 : index
    %c0_96 = arith.constant 0 : index
    %c0_97 = arith.constant 0 : index
    %117 = vector.load %arg8[%c2_95, %c0_96, %c0_97] : memref<4x16x32xbf16, #tpu.memory_space<vmem>>, vector<1x16x32xbf16>
    %118 = vector.shape_cast %117 : vector<1x16x32xbf16> to vector<16x32xbf16>
    %cst_98 = arith.constant dense<0.000000e+00> : vector<16x128xf32>
    %119 = tpu.matmul %118, %99, %cst_98 {dimension_numbers = #tpu.dot_dimension_numbers<[1], [0], [0], [1], [0, 0, 1, 1], [], []>} : vector<16x32xbf16>, vector<32x128xbf16>, vector<16x128xf32> -> vector<16x128xf32>
    %120 = arith.truncf %119 : vector<16x128xf32> to vector<16x128xbf16>
    %c2_99 = arith.constant 2 : index
    %c0_100 = arith.constant 0 : index
    %c0_101 = arith.constant 0 : index
    %121 = vector.load %arg9[%c2_99, %c0_100, %c0_101] : memref<4x128x64xbf16, #tpu.memory_space<vmem>>, vector<1x128x64xbf16>
    %122 = vector.shape_cast %121 : vector<1x128x64xbf16> to vector<128x64xbf16>
    %cst_102 = arith.constant dense<0.000000e+00> : vector<16x64xf32>
    %123 = tpu.matmul %120, %122, %cst_102 {dimension_numbers = #tpu.dot_dimension_numbers<[1], [0], [0], [1], [0, 0, 1, 1], [], []>} : vector<16x128xbf16>, vector<128x64xbf16>, vector<16x64xf32> -> vector<16x64xf32>
    %124 = arith.addf %116, %123 : vector<16x64xf32>
    %c3_103 = arith.constant 3 : index
    %c0_104 = arith.constant 0 : index
    %c0_105 = arith.constant 0 : index
    %125 = vector.load %arg8[%c3_103, %c0_104, %c0_105] : memref<4x16x32xbf16, #tpu.memory_space<vmem>>, vector<1x16x32xbf16>
    %126 = vector.shape_cast %125 : vector<1x16x32xbf16> to vector<16x32xbf16>
    %cst_106 = arith.constant dense<0.000000e+00> : vector<16x128xf32>
    %127 = tpu.matmul %126, %99, %cst_106 {dimension_numbers = #tpu.dot_dimension_numbers<[1], [0], [0], [1], [0, 0, 1, 1], [], []>} : vector<16x32xbf16>, vector<32x128xbf16>, vector<16x128xf32> -> vector<16x128xf32>
    %128 = arith.truncf %127 : vector<16x128xf32> to vector<16x128xbf16>
    %c3_107 = arith.constant 3 : index
    %c0_108 = arith.constant 0 : index
    %c0_109 = arith.constant 0 : index
    %129 = vector.load %arg9[%c3_107, %c0_108, %c0_109] : memref<4x128x64xbf16, #tpu.memory_space<vmem>>, vector<1x128x64xbf16>
    %130 = vector.shape_cast %129 : vector<1x128x64xbf16> to vector<128x64xbf16>
    %cst_110 = arith.constant dense<0.000000e+00> : vector<16x64xf32>
    %131 = tpu.matmul %128, %130, %cst_110 {dimension_numbers = #tpu.dot_dimension_numbers<[1], [0], [0], [1], [0, 0, 1, 1], [], []>} : vector<16x128xbf16>, vector<128x64xbf16>, vector<16x64xf32> -> vector<16x64xf32>
    %132 = arith.addf %124, %131 : vector<16x64xf32>
    %c0_111 = arith.constant 0 : index
    %c0_112 = arith.constant 0 : index
    %133 = vector.load %arg10[%c0_111, %c0_112] : memref<64x64xf32, #tpu.memory_space<vmem>>, vector<64x64xf32>
    %cst_113 = arith.constant dense<0.000000e+00> : vector<16x64xf32>
    %134 = tpu.matmul %132, %133, %cst_113 {dimension_numbers = #tpu.dot_dimension_numbers<[1], [0], [0], [1], [0, 0, 1, 1], [], []>} : vector<16x64xf32>, vector<64x64xf32>, vector<16x64xf32> -> vector<16x64xf32>
    %cst_114 = arith.constant dense<0.000000e+00> : vector<64xf32>
    %135 = vector.multi_reduction <add>, %134, %cst_114 [0] : vector<16x64xf32> to vector<64xf32>
    %136 = vector.shape_cast %135 : vector<64xf32> to vector<1x64xf32>
    %137 = vector.broadcast %136 : vector<1x64xf32> to vector<16x64xf32>
    %138 = arith.subf %132, %137 : vector<16x64xf32>
    %139 = arith.mulf %138, %138 : vector<16x64xf32>
    %cst_115 = arith.constant dense<0.000000e+00> : vector<16x64xf32>
    %140 = tpu.matmul %139, %133, %cst_115 {dimension_numbers = #tpu.dot_dimension_numbers<[1], [0], [0], [1], [0, 0, 1, 1], [], []>} : vector<16x64xf32>, vector<64x64xf32>, vector<16x64xf32> -> vector<16x64xf32>
    %cst_116 = arith.constant dense<0.000000e+00> : vector<64xf32>
    %141 = vector.multi_reduction <add>, %140, %cst_116 [0] : vector<16x64xf32> to vector<64xf32>
    %142 = vector.shape_cast %141 : vector<64xf32> to vector<1x64xf32>
    %cst_117 = arith.constant 9.99999974E-6 : f32
    %143 = vector.broadcast %cst_117 : f32 to vector<1x64xf32>
    %144 = arith.addf %142, %143 : vector<1x64xf32>
    %145 = math.rsqrt %144 : vector<1x64xf32>
    %146 = vector.broadcast %145 : vector<1x64xf32> to vector<16x64xf32>
    %147 = arith.mulf %138, %146 : vector<16x64xf32>
    %c0_118 = arith.constant 0 : index
    %c0_119 = arith.constant 0 : index
    %148 = vector.load %arg11[%c0_118, %c0_119] : memref<1x64xf32, #tpu.memory_space<vmem>>, vector<1x64xf32>
    %149 = vector.broadcast %148 : vector<1x64xf32> to vector<16x64xf32>
    %150 = arith.mulf %147, %149 : vector<16x64xf32>
    %c0_120 = arith.constant 0 : index
    %c0_121 = arith.constant 0 : index
    %151 = vector.load %arg12[%c0_120, %c0_121] : memref<1x64xf32, #tpu.memory_space<vmem>>, vector<1x64xf32>
    %152 = vector.broadcast %151 : vector<1x64xf32> to vector<16x64xf32>
    %153 = arith.addf %150, %152 : vector<16x64xf32>
    %cst_122 = arith.constant 0.000000e+00 : f32
    %154 = vector.broadcast %cst_122 : f32 to vector<16x64xf32>
    %155 = arith.cmpf oge, %153, %154 : vector<16x64xf32>
    %cst_123 = arith.constant 2.000000e-01 : f32
    %156 = vector.broadcast %cst_123 : f32 to vector<16x64xf32>
    %157 = arith.mulf %156, %153 : vector<16x64xf32>
    %158 = arith.select %155, %153, %157 : vector<16x64xi1>, vector<16x64xf32>
    %159 = arith.truncf %158 : vector<16x64xf32> to vector<16x64xbf16>
    %cst_124 = arith.constant 0.000000e+00 : f32
    %160 = vector.broadcast %cst_124 : f32 to vector<8x32xf32>
    %c0_125 = arith.constant 0 : index
    %c0_126 = arith.constant 0 : index
    %c0_127 = arith.constant 0 : index
    %161 = vector.load %arg13[%c0_125, %c0_126, %c0_127] : memref<4x8x16xbf16, #tpu.memory_space<vmem>>, vector<1x8x16xbf16>
    %162 = vector.shape_cast %161 : vector<1x8x16xbf16> to vector<8x16xbf16>
    %cst_128 = arith.constant dense<0.000000e+00> : vector<8x64xf32>
    %163 = tpu.matmul %162, %159, %cst_128 {dimension_numbers = #tpu.dot_dimension_numbers<[1], [0], [0], [1], [0, 0, 1, 1], [], []>} : vector<8x16xbf16>, vector<16x64xbf16>, vector<8x64xf32> -> vector<8x64xf32>
    %164 = arith.truncf %163 : vector<8x64xf32> to vector<8x64xbf16>
    %c0_129 = arith.constant 0 : index
    %c0_130 = arith.constant 0 : index
    %c0_131 = arith.constant 0 : index
    %165 = vector.load %arg14[%c0_129, %c0_130, %c0_131] : memref<4x64x32xbf16, #tpu.memory_space<vmem>>, vector<1x64x32xbf16>
    %166 = vector.shape_cast %165 : vector<1x64x32xbf16> to vector<64x32xbf16>
    %cst_132 = arith.constant dense<0.000000e+00> : vector<8x32xf32>
    %167 = tpu.matmul %164, %166, %cst_132 {dimension_numbers = #tpu.dot_dimension_numbers<[1], [0], [0], [1], [0, 0, 1, 1], [], []>} : vector<8x64xbf16>, vector<64x32xbf16>, vector<8x32xf32> -> vector<8x32xf32>
    %168 = arith.addf %160, %167 : vector<8x32xf32>
    %c1_133 = arith.constant 1 : index
    %c0_134 = arith.constant 0 : index
    %c0_135 = arith.constant 0 : index
    %169 = vector.load %arg13[%c1_133, %c0_134, %c0_135] : memref<4x8x16xbf16, #tpu.memory_space<vmem>>, vector<1x8x16xbf16>
    %170 = vector.shape_cast %169 : vector<1x8x16xbf16> to vector<8x16xbf16>
    %cst_136 = arith.constant dense<0.000000e+00> : vector<8x64xf32>
    %171 = tpu.matmul %170, %159, %cst_136 {dimension_numbers = #tpu.dot_dimension_numbers<[1], [0], [0], [1], [0, 0, 1, 1], [], []>} : vector<8x16xbf16>, vector<16x64xbf16>, vector<8x64xf32> -> vector<8x64xf32>
    %172 = arith.truncf %171 : vector<8x64xf32> to vector<8x64xbf16>
    %c1_137 = arith.constant 1 : index
    %c0_138 = arith.constant 0 : index
    %c0_139 = arith.constant 0 : index
    %173 = vector.load %arg14[%c1_137, %c0_138, %c0_139] : memref<4x64x32xbf16, #tpu.memory_space<vmem>>, vector<1x64x32xbf16>
    %174 = vector.shape_cast %173 : vector<1x64x32xbf16> to vector<64x32xbf16>
    %cst_140 = arith.constant dense<0.000000e+00> : vector<8x32xf32>
    %175 = tpu.matmul %172, %174, %cst_140 {dimension_numbers = #tpu.dot_dimension_numbers<[1], [0], [0], [1], [0, 0, 1, 1], [], []>} : vector<8x64xbf16>, vector<64x32xbf16>, vector<8x32xf32> -> vector<8x32xf32>
    %176 = arith.addf %168, %175 : vector<8x32xf32>
    %c2_141 = arith.constant 2 : index
    %c0_142 = arith.constant 0 : index
    %c0_143 = arith.constant 0 : index
    %177 = vector.load %arg13[%c2_141, %c0_142, %c0_143] : memref<4x8x16xbf16, #tpu.memory_space<vmem>>, vector<1x8x16xbf16>
    %178 = vector.shape_cast %177 : vector<1x8x16xbf16> to vector<8x16xbf16>
    %cst_144 = arith.constant dense<0.000000e+00> : vector<8x64xf32>
    %179 = tpu.matmul %178, %159, %cst_144 {dimension_numbers = #tpu.dot_dimension_numbers<[1], [0], [0], [1], [0, 0, 1, 1], [], []>} : vector<8x16xbf16>, vector<16x64xbf16>, vector<8x64xf32> -> vector<8x64xf32>
    %180 = arith.truncf %179 : vector<8x64xf32> to vector<8x64xbf16>
    %c2_145 = arith.constant 2 : index
    %c0_146 = arith.constant 0 : index
    %c0_147 = arith.constant 0 : index
    %181 = vector.load %arg14[%c2_145, %c0_146, %c0_147] : memref<4x64x32xbf16, #tpu.memory_space<vmem>>, vector<1x64x32xbf16>
    %182 = vector.shape_cast %181 : vector<1x64x32xbf16> to vector<64x32xbf16>
    %cst_148 = arith.constant dense<0.000000e+00> : vector<8x32xf32>
    %183 = tpu.matmul %180, %182, %cst_148 {dimension_numbers = #tpu.dot_dimension_numbers<[1], [0], [0], [1], [0, 0, 1, 1], [], []>} : vector<8x64xbf16>, vector<64x32xbf16>, vector<8x32xf32> -> vector<8x32xf32>
    %184 = arith.addf %176, %183 : vector<8x32xf32>
    %c3_149 = arith.constant 3 : index
    %c0_150 = arith.constant 0 : index
    %c0_151 = arith.constant 0 : index
    %185 = vector.load %arg13[%c3_149, %c0_150, %c0_151] : memref<4x8x16xbf16, #tpu.memory_space<vmem>>, vector<1x8x16xbf16>
    %186 = vector.shape_cast %185 : vector<1x8x16xbf16> to vector<8x16xbf16>
    %cst_152 = arith.constant dense<0.000000e+00> : vector<8x64xf32>
    %187 = tpu.matmul %186, %159, %cst_152 {dimension_numbers = #tpu.dot_dimension_numbers<[1], [0], [0], [1], [0, 0, 1, 1], [], []>} : vector<8x16xbf16>, vector<16x64xbf16>, vector<8x64xf32> -> vector<8x64xf32>
    %188 = arith.truncf %187 : vector<8x64xf32> to vector<8x64xbf16>
    %c3_153 = arith.constant 3 : index
    %c0_154 = arith.constant 0 : index
    %c0_155 = arith.constant 0 : index
    %189 = vector.load %arg14[%c3_153, %c0_154, %c0_155] : memref<4x64x32xbf16, #tpu.memory_space<vmem>>, vector<1x64x32xbf16>
    %190 = vector.shape_cast %189 : vector<1x64x32xbf16> to vector<64x32xbf16>
    %cst_156 = arith.constant dense<0.000000e+00> : vector<8x32xf32>
    %191 = tpu.matmul %188, %190, %cst_156 {dimension_numbers = #tpu.dot_dimension_numbers<[1], [0], [0], [1], [0, 0, 1, 1], [], []>} : vector<8x64xbf16>, vector<64x32xbf16>, vector<8x32xf32> -> vector<8x32xf32>
    %192 = arith.addf %184, %191 : vector<8x32xf32>
    %c0_157 = arith.constant 0 : index
    %c0_158 = arith.constant 0 : index
    %193 = vector.load %arg15[%c0_157, %c0_158] : memref<32x32xf32, #tpu.memory_space<vmem>>, vector<32x32xf32>
    %cst_159 = arith.constant dense<0.000000e+00> : vector<8x32xf32>
    %194 = tpu.matmul %192, %193, %cst_159 {dimension_numbers = #tpu.dot_dimension_numbers<[1], [0], [0], [1], [0, 0, 1, 1], [], []>} : vector<8x32xf32>, vector<32x32xf32>, vector<8x32xf32> -> vector<8x32xf32>
    %cst_160 = arith.constant dense<0.000000e+00> : vector<32xf32>
    %195 = vector.multi_reduction <add>, %194, %cst_160 [0] : vector<8x32xf32> to vector<32xf32>
    %196 = vector.shape_cast %195 : vector<32xf32> to vector<1x32xf32>
    %197 = vector.broadcast %196 : vector<1x32xf32> to vector<8x32xf32>
    %198 = arith.subf %192, %197 : vector<8x32xf32>
    %199 = arith.mulf %198, %198 : vector<8x32xf32>
    %cst_161 = arith.constant dense<0.000000e+00> : vector<8x32xf32>
    %200 = tpu.matmul %199, %193, %cst_161 {dimension_numbers = #tpu.dot_dimension_numbers<[1], [0], [0], [1], [0, 0, 1, 1], [], []>} : vector<8x32xf32>, vector<32x32xf32>, vector<8x32xf32> -> vector<8x32xf32>
    %cst_162 = arith.constant dense<0.000000e+00> : vector<32xf32>
    %201 = vector.multi_reduction <add>, %200, %cst_162 [0] : vector<8x32xf32> to vector<32xf32>
    %202 = vector.shape_cast %201 : vector<32xf32> to vector<1x32xf32>
    %cst_163 = arith.constant 9.99999974E-6 : f32
    %203 = vector.broadcast %cst_163 : f32 to vector<1x32xf32>
    %204 = arith.addf %202, %203 : vector<1x32xf32>
    %205 = math.rsqrt %204 : vector<1x32xf32>
    %206 = vector.broadcast %205 : vector<1x32xf32> to vector<8x32xf32>
    %207 = arith.mulf %198, %206 : vector<8x32xf32>
    %c0_164 = arith.constant 0 : index
    %c0_165 = arith.constant 0 : index
    %208 = vector.load %arg16[%c0_164, %c0_165] : memref<1x32xf32, #tpu.memory_space<vmem>>, vector<1x32xf32>
    %209 = vector.broadcast %208 : vector<1x32xf32> to vector<8x32xf32>
    %210 = arith.mulf %207, %209 : vector<8x32xf32>
    %c0_166 = arith.constant 0 : index
    %c0_167 = arith.constant 0 : index
    %211 = vector.load %arg17[%c0_166, %c0_167] : memref<1x32xf32, #tpu.memory_space<vmem>>, vector<1x32xf32>
    %212 = vector.broadcast %211 : vector<1x32xf32> to vector<8x32xf32>
    %213 = arith.addf %210, %212 : vector<8x32xf32>
    %cst_168 = arith.constant 0.000000e+00 : f32
    %214 = vector.broadcast %cst_168 : f32 to vector<8x32xf32>
    %215 = arith.cmpf oge, %213, %214 : vector<8x32xf32>
    %cst_169 = arith.constant 2.000000e-01 : f32
    %216 = vector.broadcast %cst_169 : f32 to vector<8x32xf32>
    %217 = arith.mulf %216, %213 : vector<8x32xf32>
    %218 = arith.select %215, %213, %217 : vector<8x32xi1>, vector<8x32xf32>
    %219 = arith.truncf %218 : vector<8x32xf32> to vector<8x32xbf16>
    %cst_170 = arith.constant 0.000000e+00 : f32
    %220 = vector.broadcast %cst_170 : f32 to vector<2x1xf32>
    %c0_171 = arith.constant 0 : index
    %c0_172 = arith.constant 0 : index
    %c0_173 = arith.constant 0 : index
    %221 = vector.load %arg18[%c0_171, %c0_172, %c0_173] : memref<4x2x8xbf16, #tpu.memory_space<vmem>>, vector<1x2x8xbf16>
    %222 = vector.shape_cast %221 : vector<1x2x8xbf16> to vector<2x8xbf16>
    %cst_174 = arith.constant dense<0.000000e+00> : vector<2x32xf32>
    %223 = tpu.matmul %222, %219, %cst_174 {dimension_numbers = #tpu.dot_dimension_numbers<[1], [0], [0], [1], [0, 0, 1, 1], [], []>} : vector<2x8xbf16>, vector<8x32xbf16>, vector<2x32xf32> -> vector<2x32xf32>
    %224 = arith.truncf %223 : vector<2x32xf32> to vector<2x32xbf16>
    %c0_175 = arith.constant 0 : index
    %c0_176 = arith.constant 0 : index
    %c0_177 = arith.constant 0 : index
    %225 = vector.load %arg19[%c0_175, %c0_176, %c0_177] : memref<4x32x1xbf16, #tpu.memory_space<vmem>>, vector<1x32x1xbf16>
    %226 = vector.shape_cast %225 : vector<1x32x1xbf16> to vector<32x1xbf16>
    %cst_178 = arith.constant dense<0.000000e+00> : vector<2x1xf32>
    %227 = tpu.matmul %224, %226, %cst_178 {dimension_numbers = #tpu.dot_dimension_numbers<[1], [0], [0], [1], [0, 0, 1, 1], [], []>} : vector<2x32xbf16>, vector<32x1xbf16>, vector<2x1xf32> -> vector<2x1xf32>
    %228 = arith.addf %220, %227 : vector<2x1xf32>
    %c1_179 = arith.constant 1 : index
    %c0_180 = arith.constant 0 : index
    %c0_181 = arith.constant 0 : index
    %229 = vector.load %arg18[%c1_179, %c0_180, %c0_181] : memref<4x2x8xbf16, #tpu.memory_space<vmem>>, vector<1x2x8xbf16>
    %230 = vector.shape_cast %229 : vector<1x2x8xbf16> to vector<2x8xbf16>
    %cst_182 = arith.constant dense<0.000000e+00> : vector<2x32xf32>
    %231 = tpu.matmul %230, %219, %cst_182 {dimension_numbers = #tpu.dot_dimension_numbers<[1], [0], [0], [1], [0, 0, 1, 1], [], []>} : vector<2x8xbf16>, vector<8x32xbf16>, vector<2x32xf32> -> vector<2x32xf32>
    %232 = arith.truncf %231 : vector<2x32xf32> to vector<2x32xbf16>
    %c1_183 = arith.constant 1 : index
    %c0_184 = arith.constant 0 : index
    %c0_185 = arith.constant 0 : index
    %233 = vector.load %arg19[%c1_183, %c0_184, %c0_185] : memref<4x32x1xbf16, #tpu.memory_space<vmem>>, vector<1x32x1xbf16>
    %234 = vector.shape_cast %233 : vector<1x32x1xbf16> to vector<32x1xbf16>
    %cst_186 = arith.constant dense<0.000000e+00> : vector<2x1xf32>
    %235 = tpu.matmul %232, %234, %cst_186 {dimension_numbers = #tpu.dot_dimension_numbers<[1], [0], [0], [1], [0, 0, 1, 1], [], []>} : vector<2x32xbf16>, vector<32x1xbf16>, vector<2x1xf32> -> vector<2x1xf32>
    %236 = arith.addf %228, %235 : vector<2x1xf32>
    %c2_187 = arith.constant 2 : index
    %c0_188 = arith.constant 0 : index
    %c0_189 = arith.constant 0 : index
    %237 = vector.load %arg18[%c2_187, %c0_188, %c0_189] : memref<4x2x8xbf16, #tpu.memory_space<vmem>>, vector<1x2x8xbf16>
    %238 = vector.shape_cast %237 : vector<1x2x8xbf16> to vector<2x8xbf16>
    %cst_190 = arith.constant dense<0.000000e+00> : vector<2x32xf32>
    %239 = tpu.matmul %238, %219, %cst_190 {dimension_numbers = #tpu.dot_dimension_numbers<[1], [0], [0], [1], [0, 0, 1, 1], [], []>} : vector<2x8xbf16>, vector<8x32xbf16>, vector<2x32xf32> -> vector<2x32xf32>
    %240 = arith.truncf %239 : vector<2x32xf32> to vector<2x32xbf16>
    %c2_191 = arith.constant 2 : index
    %c0_192 = arith.constant 0 : index
    %c0_193 = arith.constant 0 : index
    %241 = vector.load %arg19[%c2_191, %c0_192, %c0_193] : memref<4x32x1xbf16, #tpu.memory_space<vmem>>, vector<1x32x1xbf16>
    %242 = vector.shape_cast %241 : vector<1x32x1xbf16> to vector<32x1xbf16>
    %cst_194 = arith.constant dense<0.000000e+00> : vector<2x1xf32>
    %243 = tpu.matmul %240, %242, %cst_194 {dimension_numbers = #tpu.dot_dimension_numbers<[1], [0], [0], [1], [0, 0, 1, 1], [], []>} : vector<2x32xbf16>, vector<32x1xbf16>, vector<2x1xf32> -> vector<2x1xf32>
    %244 = arith.addf %236, %243 : vector<2x1xf32>
    %c3_195 = arith.constant 3 : index
    %c0_196 = arith.constant 0 : index
    %c0_197 = arith.constant 0 : index
    %245 = vector.load %arg18[%c3_195, %c0_196, %c0_197] : memref<4x2x8xbf16, #tpu.memory_space<vmem>>, vector<1x2x8xbf16>
    %246 = vector.shape_cast %245 : vector<1x2x8xbf16> to vector<2x8xbf16>
    %cst_198 = arith.constant dense<0.000000e+00> : vector<2x32xf32>
    %247 = tpu.matmul %246, %219, %cst_198 {dimension_numbers = #tpu.dot_dimension_numbers<[1], [0], [0], [1], [0, 0, 1, 1], [], []>} : vector<2x8xbf16>, vector<8x32xbf16>, vector<2x32xf32> -> vector<2x32xf32>
    %248 = arith.truncf %247 : vector<2x32xf32> to vector<2x32xbf16>
    %c3_199 = arith.constant 3 : index
    %c0_200 = arith.constant 0 : index
    %c0_201 = arith.constant 0 : index
    %249 = vector.load %arg19[%c3_199, %c0_200, %c0_201] : memref<4x32x1xbf16, #tpu.memory_space<vmem>>, vector<1x32x1xbf16>
    %250 = vector.shape_cast %249 : vector<1x32x1xbf16> to vector<32x1xbf16>
    %cst_202 = arith.constant dense<0.000000e+00> : vector<2x1xf32>
    %251 = tpu.matmul %248, %250, %cst_202 {dimension_numbers = #tpu.dot_dimension_numbers<[1], [0], [0], [1], [0, 0, 1, 1], [], []>} : vector<2x32xbf16>, vector<32x1xbf16>, vector<2x1xf32> -> vector<2x1xf32>
    %252 = arith.addf %244, %251 : vector<2x1xf32>
    %253 = arith.negf %252 : vector<2x1xf32>
    %254 = math.exp %253 : vector<2x1xf32>
    %cst_203 = arith.constant 1.000000e+00 : f32
    %255 = vector.broadcast %cst_203 : f32 to vector<2x1xf32>
    %256 = arith.addf %255, %254 : vector<2x1xf32>
    %257 = arith.divf %255, %256 : vector<2x1xf32>
    %c0_204 = arith.constant 0 : index
    %c0_205 = arith.constant 0 : index
    %258 = vector.load %arg20[%c0_204, %c0_205] : memref<2x1xf32, #tpu.memory_space<vmem>>, vector<2x1xf32>
    tpu.vector_store %arg20[%c0_204, %c0_205], %257 {strides = array<i32>} : memref<2x1xf32, #tpu.memory_space<vmem>>, vector<2x1xf32>,
    return
  }
}

</mosaic_0001>

<bundles_post_ra>
// kernel: forward.1
= control target key start
LH: loop header
LB: loop body
LE: loop exit
PB: predicated region body
PF: predicated region fallthrough
CT: control target
= control target key end

     0   :  { %v6681_v1 = vmov 0   ;;  %vm558_vm0 = vcmask 523264   ;;  %s8314_s0 = inlined_call_operand.vmem [shape: bf16[128,192], index: 0, kind: input, shape index: {}]   ;;  %s8315_s1 = inlined_call_operand.vmem [shape: bf16[4,64,128], index: 1, kind: input, shape index: {}]   ;;  %s8316_s2 = inlined_call_operand.vmem [shape: bf16[4,192,256], index: 2, kind: input, shape index: {}]   ;;  %s8317_s3 = inlined_call_operand.vmem [shape: bf16[4,32,64], index: 3, kind: input, shape index: {}]   ;;  %s8318_s4 = inlined_call_operand.vmem [shape: bf16[4,256,128], index: 4, kind: input, shape index: {}]   ;;  %s8319_s5 = inlined_call_operand.vmem [shape: f32[128,128], index: 5, kind: input, shape index: {}]   ;;  %s8320_s8 = inlined_call_operand.vmem [shape: bf16[4,16,32], index: 8, kind: input, shape index: {}]   ;;  %s8321_s9 = inlined_call_operand.vmem [shape: bf16[4,128,64], index: 9, kind: input, shape index: {}]   ;;  %s8322_s6 = inlined_call_operand.vmem [shape: f32[1,128], index: 6, kind: input, shape index: {}]   ;;  %s8323_s7 = inlined_call_operand.vmem [shape: f32[1,128], index: 7, kind: input, shape index: {}]   ;;  %s8324_s10 = inlined_call_operand.vmem [shape: f32[64,64], index: 10, kind: input, shape index: {}]   ;;  %s8325_s14 = inlined_call_operand.vmem [shape: bf16[4,64,32], index: 14, kind: input, shape index: {}]   ;;  %s8326_s11 = inlined_call_operand.vmem [shape: f32[1,64], index: 11, kind: input, shape index: {}]   ;;  %s8327_s12 = inlined_call_operand.vmem [shape: f32[1,64], index: 12, kind: input, shape index: {}]   ;;  %s8328_s13 = inlined_call_operand.vmem [shape: bf16[4,8,16], index: 13, kind: input, shape index: {}]   ;;  %s8329_s15 = inlined_call_operand.vmem [shape: f32[32,32], index: 15, kind: input, shape index: {}]   ;;  %s8330_s19 = inlined_call_operand.vmem [shape: bf16[4,32,1], index: 19, kind: input, shape index: {}]   ;;  %s8331_s16 = inlined_call_operand.vmem [shape: f32[1,32], index: 16, kind: input, shape index: {}]   ;;  %s8332_s17 = inlined_call_operand.vmem [shape: f32[1,32], index: 17, kind: input, shape index: {}]   ;;  %s8333_s18 = inlined_call_operand.vmem [shape: bf16[4,2,8], index: 18, kind: input, shape index: {}]   ;;  %s8334_s20 = inlined_call_operand.vmem [shape: f32[2,1], index: 20, kind: output, shape index: {}]  }
   0x1   :  { %8340 = sst [smem:[#allocation2_spill]] %s8314_s0  ;;  %364 = vmatprep.mubr.bf16.mxu1 %v6681_v1  ;;  %226 = vmatprep.mubr.bf16.mxu0 %v6681_v1 }
   0x2   :  { %8341 = sst [smem:[#allocation3_spill]] %s8315_s1  ;;  %s8345_s23 = sld [smem:[#allocation2_spill]] }
   0x3   :  { %8342 = sst [smem:[#allocation4_spill]] %s8316_s2 }
   0x4   :  { %8343 = sst [smem:[#allocation5_spill]] %s8317_s3  ;;  %s8346_s26 = sld [smem:[#allocation4_spill]] }
   0x5   :  { %8344 = sst [smem:[#allocation6_spill]] %s8318_s4  ;;  %s8347_s4 = sld [smem:[#allocation3_spill]] }
   0x6   :  { %s8349_s24 = sld [smem:[#allocation6_spill]] }
   0x8   :  { %v6793_v0 = vld [vmem:[%s8345_s23 + $0x4] ss:$8 sps:$4 sm:$0xff]   ;;  %v6800_v2 = vld [vmem:[%s8345_s23] ss:$8 sps:$4 sm:$0xff]   ;;  %v6806_v3 = vld [vmem:[%s8345_s23 + $0x14] ss:$8 sps:$4 sm:$0xff]  }
   0x9   :  { %332 = vmatprep.subr.bf16.mxu1 %v6793_v0  ;;  %194 = vmatprep.subr.bf16.mxu0 %v6793_v0  ;;  %v6813_v4 = vld [vmem:[%s8345_s23 + $0x10] ss:$8 sps:$4 sm:$0xff]   ;;  %v6820_v5 = vld [vmem:[%s8345_s23 + $0x24] ss:$8 sps:$4 sm:$0xff]   ;;  %v6827_v6 = vld [vmem:[%s8345_s23 + $0x20] ss:$8 sps:$4 sm:$0xff]  }
   0xa   :  { %333 = vmatpush1.bf16.msra.mxu1 %v6800_v2  ;;  %195 = vmatpush1.bf16.msra.mxu0 %v6800_v2  ;;  %v6834_v7 = vld [vmem:[%s8345_s23 + $0x34] ss:$8 sps:$4 sm:$0xff]   ;;  %v6841_v8 = vld [vmem:[%s8345_s23 + $0x30] ss:$8 sps:$4 sm:$0xff]   ;;  %v6848_v9 = vld [vmem:[%s8345_s23 + $0x44] ss:$8 sps:$4 sm:$0xff]  }
   0xb   :  { %334 = vmatprep.subr.bf16.mxu1 %v6806_v3  ;;  %196 = vmatprep.subr.bf16.mxu0 %v6806_v3  ;;  %v6855_v10 = vld [vmem:[%s8345_s23 + $0x40] ss:$8 sps:$4 sm:$0xff]   ;;  %v6862_v11 = vld [vmem:[%s8345_s23 + $0x54] ss:$8 sps:$4 sm:$0xff]   ;;  %v6869_v12 = vld [vmem:[%s8345_s23 + $0x50] ss:$8 sps:$4 sm:$0xff]  }
   0xc   :  { %v6876_v13 = vld [vmem:[%s8345_s23 + $0x64] ss:$8 sps:$4 sm:$0xff]   ;;  %v6883_v14 = vld [vmem:[%s8345_s23 + $0x60] ss:$8 sps:$4 sm:$0xff]   ;;  %v6890_v15 = vld [vmem:[%s8345_s23 + $0x74] ss:$8 sps:$4 sm:$0xff]  }
   0xd   :  { %v6897_v16 = vld [vmem:[%s8345_s23 + $0x70] ss:$8 sps:$4 sm:$0xff]   ;;  %v6397_v17 = vld [vmem:[%s8346_s26 + $0xc4] ss:$8 sps:$4 sm:$0xff]   ;;  %v6395_v20 = vld [vmem:[%s8346_s26 + $0xc0] ss:$8 sps:$4 sm:$0xff]  }
   0xe   :  { %335 = vmatpush1.bf16.msra.mxu1 %v6813_v4  ;;  %197 = vmatpush1.bf16.msra.mxu0 %v6813_v4  ;;  %v6379_v18 = vld [vmem:[%s8347_s4 + $0x20] sm:$0xff]   ;;  %v6400_v21 = vld [vmem:[%s8346_s26 + $0xd4] ss:$8 sps:$4 sm:$0xff]   ;;  %v6398_v22 = vld [vmem:[%s8346_s26 + $0xd0] ss:$8 sps:$4 sm:$0xff]   ;;  %s8348_s23 = sld [smem:[#allocation5_spill]] }
   0xf   :  { %336 = vmatprep.subr.bf16.mxu1 %v6820_v5  ;;  %198 = vmatprep.subr.bf16.mxu0 %v6820_v5  ;;  %v6383_v19 = vld [vmem:[%s8347_s4] sm:$0xff]   ;;  %v6380_v23 = vld [vmem:[%s8347_s4 + $0x28] sm:$0xff]   ;;  %v6406_v27 = vld [vmem:[%s8346_s26 + $0xf4] ss:$8 sps:$4 sm:$0xff]  }
  0x10   :  { %v6384_v24 = vld [vmem:[%s8347_s4 + $0x8] sm:$0xff]   ;;  %v6381_v28 = vld [vmem:[%s8347_s4 + $0x30] sm:$0xff]   ;;  %v6382_v33 = vld [vmem:[%s8347_s4 + $0x38] sm:$0xff]  }
  0x11   :  { %v6401_v25 = vld [vmem:[%s8346_s26 + $0xe0] ss:$8 sps:$4 sm:$0xff]   ;;  %v6403_v26 = vld [vmem:[%s8346_s26 + $0xe4] ss:$8 sps:$4 sm:$0xff]   ;;  %v6385_v29 = vld [vmem:[%s8347_s4 + $0x10] sm:$0xff]  }
  0x12   :  { %337 = vmatpush1.bf16.msra.mxu1 %v6827_v6  ;;  %199 = vmatpush1.bf16.msra.mxu0 %v6827_v6  ;;  %v6404_v30 = vld [vmem:[%s8346_s26 + $0xf0] ss:$8 sps:$4 sm:$0xff]   ;;  %v6409_v31 = vld [vmem:[%s8346_s26 + $0x104] ss:$8 sps:$4 sm:$0xff]   ;;  %v6407_v32 = vld [vmem:[%s8346_s26 + $0x100] ss:$8 sps:$4 sm:$0xff]  }
  0x13   :  { %338 = vmatprep.subr.bf16.mxu1 %v6834_v7  ;;  %200 = vmatprep.subr.bf16.mxu0 %v6834_v7  ;;  %v6386_v34 = vld [vmem:[%s8347_s4 + $0x18] sm:$0xff]   ;;  %v6415_v37 = vld [vmem:[%s8346_s26 + $0x124] ss:$8 sps:$4 sm:$0xff]   ;;  %v6413_v38 = vld [vmem:[%s8346_s26 + $0x120] ss:$8 sps:$4 sm:$0xff]  }
  0x14   :  { %v6412_v35 = vld [vmem:[%s8346_s26 + $0x114] ss:$8 sps:$4 sm:$0xff]   ;;  %v6410_v36 = vld [vmem:[%s8346_s26 + $0x110] ss:$8 sps:$4 sm:$0xff]   ;;  %v6387_v39 = vld [vmem:[%s8347_s4 + $0x40] sm:$0xff]  }
  0x15   :  { %v6418_v40 = vld [vmem:[%s8346_s26 + $0x134] ss:$8 sps:$4 sm:$0xff]   ;;  %v6416_v41 = vld [vmem:[%s8346_s26 + $0x130] ss:$8 sps:$4 sm:$0xff]   ;;  %v6421_v42 = vld [vmem:[%s8346_s26 + $0x144] ss:$8 sps:$4 sm:$0xff]  }
  0x16   :  { %339 = vmatpush1.bf16.msra.mxu1 %v6841_v8  ;;  %201 = vmatpush1.bf16.msra.mxu0 %v6841_v8  ;;  %v6419_v43 = vld [vmem:[%s8346_s26 + $0x140] ss:$8 sps:$4 sm:$0xff]   ;;  %v6424_v45 = vld [vmem:[%s8346_s26 + $0x154] ss:$8 sps:$4 sm:$0xff]   ;;  %v6422_v46 = vld [vmem:[%s8346_s26 + $0x150] ss:$8 sps:$4 sm:$0xff]  }
  0x17   :  { %340 = vmatprep.subr.bf16.mxu1 %v6848_v9  ;;  %202 = vmatprep.subr.bf16.mxu0 %v6848_v9  ;;  %v6388_v44 = vld [vmem:[%s8347_s4 + $0x48] sm:$0xff]   ;;  %v6389_v49 = vld [vmem:[%s8347_s4 + $0x50] sm:$0xff]   ;;  %v6390_v50 = vld [vmem:[%s8347_s4 + $0x58] sm:$0xff]  }
  0x18   :  { %v6427_v47 = vld [vmem:[%s8346_s26 + $0x164] ss:$8 sps:$4 sm:$0xff]   ;;  %v6425_v48 = vld [vmem:[%s8346_s26 + $0x160] ss:$8 sps:$4 sm:$0xff]   ;;  %v6393_v53 = vld [vmem:[%s8347_s4 + $0x70] sm:$0xff]  }
  0x19   :  { %v6391_v51 = vld [vmem:[%s8347_s4 + $0x60] sm:$0xff]   ;;  %v6392_v52 = vld [vmem:[%s8347_s4 + $0x68] sm:$0xff]   ;;  %v6430_v54 = vld [vmem:[%s8346_s26 + $0x174] ss:$8 sps:$4 sm:$0xff]  }
  0x1a   :  { %341 = vmatpush1.bf16.msra.mxu1 %v6855_v10  ;;  %203 = vmatpush1.bf16.msra.mxu0 %v6855_v10  ;;  %v6394_v55 = vld [vmem:[%s8347_s4 + $0x78] sm:$0xff]   ;;  %v6433_v57 = vld [vmem:[%s8346_s26 + $0x4] ss:$8 sps:$4 sm:$0xff]  }
  0x1b   :  { %342 = vmatprep.subr.bf16.mxu1 %v6862_v11  ;;  %204 = vmatprep.subr.bf16.mxu0 %v6862_v11  ;;  %v6428_v56 = vld [vmem:[%s8346_s26 + $0x170] ss:$8 sps:$4 sm:$0xff]  }
  0x1e   :  { %343 = vmatpush1.bf16.msra.mxu1 %v6869_v12  ;;  %205 = vmatpush1.bf16.msra.mxu0 %v6869_v12 }
  0x1f   :  { %344 = vmatprep.subr.bf16.mxu1 %v6876_v13  ;;  %206 = vmatprep.subr.bf16.mxu0 %v6876_v13 }
  0x22   :  { %345 = vmatpush1.bf16.msra.mxu1 %v6883_v14  ;;  %207 = vmatpush1.bf16.msra.mxu0 %v6883_v14 }
  0x23   :  { %346 = vmatprep.subr.bf16.mxu1 %v6890_v15  ;;  %208 = vmatprep.subr.bf16.mxu0 %v6890_v15 }
  0x26   :  { %347 = vmatpush1.bf16.msra.mxu1 %v6897_v16  ;;  %209 = vmatpush1.bf16.msra.mxu0 %v6897_v16 }
  0x27   :  { %882 = vmatprep.subr.bf16.mxu1 %v6793_v0  ;;  %571 = vmatprep.subr.bf16.mxu0 %v6397_v17 }
  0x29   :  { %365 = vmatmul.mubr.bf16.vlgmr.msra.gmra.mrb[0].mxu1 %v6379_v18  ;;  %227 = vmatmul.mubr.bf16.vlgmr.msra.gmra.mrb[0].mxu0 %v6383_v19 }
  0x2a   :  { %374 = vmatprep.mubr.bf16.mxu1 %v6681_v1  ;;  %883 = vmatpush1.bf16.msra.mxu1 %v6800_v2 }
  0x2b   :  { %884 = vmatprep.subr.bf16.mxu1 %v6806_v3  ;;  %236 = vmatprep.mubr.bf16.mxu0 %v6681_v1 }
  0x2c   :  { %572 = vmatpush1.bf16.msra.mxu0 %v6395_v20 }
  0x2d   :  { %573 = vmatprep.subr.bf16.mxu0 %v6400_v21  ;;  %v6437_v21 = vld [vmem:[%s8346_s26 + $0x20] ss:$8 sps:$4 sm:$0xff]  }
  0x2e   :  { %885 = vmatpush1.bf16.msra.mxu1 %v6813_v4 }
  0x2f   :  { %886 = vmatprep.subr.bf16.mxu1 %v6820_v5 }
  0x30   :  { %574 = vmatpush1.bf16.msra.mxu0 %v6398_v22 }
  0x31   :  { %375 = vmatmul.mubr.bf16.gmra.mrb[4].mxu1 %v6380_v23  ;;  %237 = vmatmul.mubr.bf16.gmra.mrb[4].mxu0 %v6384_v24  ;;  %v6442_v24 = vld [vmem:[%s8346_s26 + $0x34] ss:$8 sps:$4 sm:$0xff]  }
  0x32   :  { %384 = vmatprep.mubr.bf16.mxu1 %v6681_v1  ;;  %887 = vmatpush1.bf16.msra.mxu1 %v6827_v6 }
  0x33   :  { %888 = vmatprep.subr.bf16.mxu1 %v6834_v7  ;;  %246 = vmatprep.mubr.bf16.mxu0 %v6681_v1 }
  0x34   :  { %575 = vmatprep.subr.bf16.mxu0 %v6403_v26 }
  0x35   :  { %576 = vmatpush1.bf16.msra.mxu0 %v6401_v25  ;;  %v6440_v25 = vld [vmem:[%s8346_s26 + $0x30] ss:$8 sps:$4 sm:$0xff]  }
  0x36   :  { %889 = vmatpush1.bf16.msra.mxu1 %v6841_v8  ;;  %577 = vmatprep.subr.bf16.mxu0 %v6406_v27 }
  0x37   :  { %890 = vmatprep.subr.bf16.mxu1 %v6848_v9 }
  0x39   :  { %385 = vmatmul.mubr.bf16.gmra.mrb[8].mxu1 %v6381_v28  ;;  %247 = vmatmul.mubr.bf16.gmra.mrb[8].mxu0 %v6385_v29  ;;  %v6445_v28 = vld [vmem:[%s8346_s26 + $0x44] ss:$8 sps:$4 sm:$0xff]  }
  0x3a   :  { %394 = vmatprep.mubr.bf16.mxu1 %v6681_v1  ;;  %891 = vmatpush1.bf16.msra.mxu1 %v6855_v10 }
  0x3b   :  { %892 = vmatprep.subr.bf16.mxu1 %v6862_v11  ;;  %256 = vmatprep.mubr.bf16.mxu0 %v6681_v1 }
  0x3c   :  { %578 = vmatpush1.bf16.msra.mxu0 %v6404_v30 }
  0x3d   :  { %579 = vmatprep.subr.bf16.mxu0 %v6409_v31 }
  0x3e   :  { %893 = vmatpush1.bf16.msra.mxu1 %v6869_v12 }
  0x3f   :  { %894 = vmatprep.subr.bf16.mxu1 %v6876_v13 }
  0x40   :  { %580 = vmatpush1.bf16.msra.mxu0 %v6407_v32 }
  0x41   :  { %395 = vmatmul.mubr.bf16.gmra.mrb[12].mxu1 %v6382_v33  ;;  %257 = vmatmul.mubr.bf16.gmra.mrb[12].mxu0 %v6386_v34 }
  0x42   :  { %895 = vmatpush1.bf16.msra.mxu1 %v6883_v14  ;;  %914 = vmatprep.mubr.bf16.mxu1 %v6681_v1 }
  0x43   :  { %896 = vmatprep.subr.bf16.mxu1 %v6890_v15  ;;  %581 = vmatprep.subr.bf16.mxu0 %v6412_v35 }
  0x44   :  { %582 = vmatpush1.bf16.msra.mxu0 %v6410_v36 }
  0x45   :  { %583 = vmatprep.subr.bf16.mxu0 %v6415_v37  ;;  %v6443_v37 = vld [vmem:[%s8346_s26 + $0x40] ss:$8 sps:$4 sm:$0xff]  }
  0x46   :  { %897 = vmatpush1.bf16.msra.mxu1 %v6897_v16 }
  0x47   :  { %1242 = vmatprep.subr.bf16.mxu1 %v6793_v0 }
  0x48   :  { %584 = vmatpush1.bf16.msra.mxu0 %v6413_v38 }
  0x49   :  { %915 = vmatmul.mubr.bf16.vlgmr.msra.gmra.mrb[16].mxu1 %v6387_v39  ;;  %585 = vmatprep.subr.bf16.mxu0 %v6418_v40  ;;  %v6448_v40 = vld [vmem:[%s8346_s26 + $0x54] ss:$8 sps:$4 sm:$0xff]  }
  0x4a   :  { %1243 = vmatpush1.bf16.msra.mxu1 %v6800_v2  ;;  %924 = vmatprep.mubr.bf16.mxu1 %v6681_v1 }
  0x4b   :  { %1244 = vmatprep.subr.bf16.mxu1 %v6806_v3 }
  0x4c   :  { %586 = vmatpush1.bf16.msra.mxu0 %v6416_v41  ;;  %v6446_v41 = vld [vmem:[%s8346_s26 + $0x50] ss:$8 sps:$4 sm:$0xff]  }
  0x4d   :  { %587 = vmatprep.subr.bf16.mxu0 %v6421_v42 }
  0x4e   :  { %1245 = vmatpush1.bf16.msra.mxu1 %v6813_v4 }
  0x4f   :  { %1246 = vmatprep.subr.bf16.mxu1 %v6820_v5 }
  0x50   :  { %588 = vmatpush1.bf16.msra.mxu0 %v6419_v43 }
  0x51   :  { %925 = vmatmul.mubr.bf16.gmra.mrb[20].mxu1 %v6388_v44  ;;  %589 = vmatprep.subr.bf16.mxu0 %v6424_v45  ;;  %v6451_v44 = vld [vmem:[%s8346_s26 + $0x64] ss:$8 sps:$4 sm:$0xff]  }
  0x52   :  { %1247 = vmatpush1.bf16.msra.mxu1 %v6827_v6  ;;  %934 = vmatprep.mubr.bf16.mxu1 %v6681_v1  ;;  %v6431_v6 = vld [vmem:[%s8346_s26] ss:$8 sps:$4 sm:$0xff]  }
  0x53   :  { %1248 = vmatprep.subr.bf16.mxu1 %v6834_v7 }
  0x54   :  { %590 = vmatpush1.bf16.msra.mxu0 %v6422_v46 }
  0x55   :  { %591 = vmatprep.subr.bf16.mxu0 %v6427_v47 }
  0x56   :  { %1249 = vmatpush1.bf16.msra.mxu1 %v6841_v8  ;;  %v6436_v8 = vld [vmem:[%s8346_s26 + $0x14] ss:$8 sps:$4 sm:$0xff]  }
  0x57   :  { %1250 = vmatprep.subr.bf16.mxu1 %v6848_v9  ;;  %v6434_v9 = vld [vmem:[%s8346_s26 + $0x10] ss:$8 sps:$4 sm:$0xff]  }
  0x58   :  { %592 = vmatpush1.bf16.msra.mxu0 %v6425_v48 }
  0x59   :  { %935 = vmatmul.mubr.bf16.gmra.mrb[24].mxu1 %v6389_v49  ;;  %593 = vmatprep.subr.bf16.mxu0 %v6430_v54 }
  0x5a   :  { %1251 = vmatpush1.bf16.msra.mxu1 %v6855_v10  ;;  %944 = vmatprep.mubr.bf16.mxu1 %v6681_v1 }
  0x5b   :  { %1252 = vmatprep.subr.bf16.mxu1 %v6862_v11 }
  0x5c   :  { %594 = vmatpush1.bf16.msra.mxu0 %v6428_v56  ;;  %v6454_v56 = vld [vmem:[%s8346_s26 + $0x74] ss:$8 sps:$4 sm:$0xff]  }
  0x5d   :  { %776 = vmatprep.subr.bf16.mxu0 %v6433_v57  ;;  %v6452_v57 = vld [vmem:[%s8346_s26 + $0x70] ss:$8 sps:$4 sm:$0xff]  }
  0x5e   :  { %1253 = vmatpush1.bf16.msra.mxu1 %v6869_v12  ;;  %v6439_v12 = vld [vmem:[%s8346_s26 + $0x24] ss:$8 sps:$4 sm:$0xff]  }
  0x5f   :  { %1254 = vmatprep.subr.bf16.mxu1 %v6876_v13 }
  0x61   :  { %945 = vmatmul.mubr.bf16.gmra.mrb[28].mxu1 %v6390_v50 }
  0x62   :  { %1255 = vmatpush1.bf16.msra.mxu1 %v6883_v14  ;;  %1274 = vmatprep.mubr.bf16.mxu1 %v6681_v1 }
  0x63   :  { %1256 = vmatprep.subr.bf16.mxu1 %v6890_v15 }
  0x66   :  { %1257 = vmatpush1.bf16.msra.mxu1 %v6897_v16 }
  0x69   :  { %1275 = vmatmul.mubr.bf16.vlgmr.msra.gmra.mrb[32].mxu1 %v6391_v51 }
  0x6a   :  { %1284 = vmatprep.mubr.bf16.mxu1 %v6681_v1 }
  0x71   :  { %1285 = vmatmul.mubr.bf16.gmra.mrb[36].mxu1 %v6392_v52 }
  0x72   :  { %1294 = vmatprep.mubr.bf16.mxu1 %v6681_v1 }
  0x79   :  { %1295 = vmatmul.mubr.bf16.gmra.mrb[40].mxu1 %v6393_v53  ;;  %v6449_v53 = vld [vmem:[%s8346_s26 + $0x60] ss:$8 sps:$4 sm:$0xff]  }
  0x7a   :  { %1304 = vmatprep.mubr.bf16.mxu1 %v6681_v1 }
  0x81   :  { %1305 = vmatmul.mubr.bf16.gmra.mrb[44].mxu1 %v6394_v55 }
  0x82   :  { %1677 = vmatprep.mubr.bf16.mxu1 %v6681_v1 }
  0xfc   :  { %v366_v58 = vpop.f32.mrb[0].mxu1  ;;  %v7074_v59 = vpop.f32.mrb[0].mxu0 }
  0xfd   :  { %v368_v60 = vpop.f32.mrb[1].mxu1  ;;  %v7076_v61 = vpop.f32.mrb[1].mxu0 }
  0xfe   :  { %v370_v62 = vpop.f32.mrb[2].mxu1  ;;  %v7078_v63 = vpop.f32.mrb[2].mxu0 }
  0xff   :  { %v405_v0 = vpack.c.bf16 %v370_v62, %v366_v58  ;;  %v372_v2 = vpop.f32.mrb[3].mxu1  ;;  %v267_v3 = vpack.c.bf16 %v7078_v63, %v7074_v59  ;;  %v7082_v4 = vpop.f32.mrb[3].mxu0 }
 0x100   :  { %v406_v5 = vpack.c.bf16 %v372_v2, %v368_v60  ;;  %v268_v7 = vpack.c.bf16 %v7082_v4, %v7076_v61  ;;  %v6457_v60 = vld [vmem:[%s8346_s26 + $0x84] ss:$8 sps:$4 sm:$0xff]   ;;  %v6455_v61 = vld [vmem:[%s8346_s26 + $0x80] ss:$8 sps:$4 sm:$0xff]  }
 0x102   :  { %4968 = vmatprep.mubr.msk.bf16.mxu0 %vm558_vm0, %v406_v5 }
 0x103   :  { %604 = vmatmul.mubr.bf16.vlgmr.msra.gmra.mrb[16].mxu0 %v405_v0 }
 0x104   :  { %777 = vmatpush1.bf16.msra.mxu0 %v6431_v6  ;;  %v376_v10 = vpop.f32.mrb[4].mxu1  ;;  %v7096_v11 = vpop.f32.mrb[4].mxu0  ;;  %v6460_v6 = vld [vmem:[%s8346_s26 + $0x94] ss:$8 sps:$4 sm:$0xff]  }
 0x105   :  { %778 = vmatprep.subr.bf16.mxu0 %v6436_v8  ;;  %v378_v13 = vpop.f32.mrb[5].mxu1  ;;  %v7101_v14 = vpop.f32.mrb[5].mxu0 }
 0x106   :  { %v380_v15 = vpop.f32.mrb[6].mxu1  ;;  %v7103_v16 = vpop.f32.mrb[6].mxu0 }
 0x107   :  { %v407_v17 = vpack.c.bf16 %v380_v15, %v376_v10  ;;  %v382_v18 = vpop.f32.mrb[7].mxu1  ;;  %v269_v19 = vpack.c.bf16 %v7103_v16, %v7096_v11  ;;  %v7107_v20 = vpop.f32.mrb[7].mxu0 }
 0x108   :  { %779 = vmatpush1.bf16.msra.mxu0 %v6434_v9  ;;  %v408_v22 = vpack.c.bf16 %v382_v18, %v378_v13  ;;  %v270_v23 = vpack.c.bf16 %v7107_v20, %v7101_v14  ;;  %v6463_v9 = vld [vmem:[%s8346_s26 + $0xa4] ss:$8 sps:$4 sm:$0xff]   ;;  %v6473_v14 = vld [vmem:[%s8346_s26 + $0x1a0] ss:$8 sps:$4 sm:$0xff]  }
 0x109   :  { %780 = vmatprep.subr.bf16.mxu0 %v6439_v12 }
 0x10a   :  { %4969 = vmatprep.mubr.msk.bf16.mxu0 %vm558_vm0, %v408_v22  ;;  %v6464_v22 = vld [vmem:[%s8346_s26 + $0xb0] ss:$8 sps:$4 sm:$0xff]  }
 0x10b   :  { %614 = vmatmul.mubr.bf16.gmra.mrb[20].mxu0 %v407_v17  ;;  %v6461_v17 = vld [vmem:[%s8346_s26 + $0xa0] ss:$8 sps:$4 sm:$0xff]  }
 0x10c   :  { %781 = vmatpush1.bf16.msra.mxu0 %v6437_v21  ;;  %v386_v26 = vpop.f32.mrb[8].mxu1  ;;  %v7121_v27 = vpop.f32.mrb[8].mxu0  ;;  %v6466_v21 = vld [vmem:[%s8346_s26 + $0xb4] ss:$8 sps:$4 sm:$0xff]  }
 0x10d   :  { %782 = vmatprep.subr.bf16.mxu0 %v6442_v24  ;;  %v388_v29 = vpop.f32.mrb[9].mxu1  ;;  %v7126_v30 = vpop.f32.mrb[9].mxu0 }
 0x10e   :  { %v390_v31 = vpop.f32.mrb[10].mxu1  ;;  %v7128_v32 = vpop.f32.mrb[10].mxu0 }
 0x10f   :  { %v409_v33 = vpack.c.bf16 %v390_v31, %v386_v26  ;;  %v392_v34 = vpop.f32.mrb[11].mxu1  ;;  %v271_v35 = vpack.c.bf16 %v7128_v32, %v7121_v27  ;;  %v7132_v36 = vpop.f32.mrb[11].mxu0 }
 0x110   :  { %783 = vmatpush1.bf16.msra.mxu0 %v6440_v25  ;;  %v410_v38 = vpack.c.bf16 %v392_v34, %v388_v29  ;;  %v272_v39 = vpack.c.bf16 %v7132_v36, %v7126_v30  ;;  %v6469_v25 = vld [vmem:[%s8346_s26 + $0x184] ss:$8 sps:$4 sm:$0xff]   ;;  %v6479_v30 = vld [vmem:[%s8346_s26 + $0x1c0] ss:$8 sps:$4 sm:$0xff]  }
 0x111   :  { %784 = vmatprep.subr.bf16.mxu0 %v6445_v28 }
 0x112   :  { %4970 = vmatprep.mubr.msk.bf16.mxu0 %vm558_vm0, %v410_v38  ;;  %v6470_v38 = vld [vmem:[%s8346_s26 + $0x190] ss:$8 sps:$4 sm:$0xff]  }
 0x113   :  { %624 = vmatmul.mubr.bf16.gmra.mrb[24].mxu0 %v409_v33  ;;  %v6467_v33 = vld [vmem:[%s8346_s26 + $0x180] ss:$8 sps:$4 sm:$0xff]  }
 0x114   :  { %785 = vmatpush1.bf16.msra.mxu0 %v6443_v37  ;;  %v396_v42 = vpop.f32.mrb[12].mxu1  ;;  %v7146_v43 = vpop.f32.mrb[12].mxu0  ;;  %v6472_v37 = vld [vmem:[%s8346_s26 + $0x194] ss:$8 sps:$4 sm:$0xff]  }
 0x115   :  { %786 = vmatprep.subr.bf16.mxu0 %v6448_v40  ;;  %v398_v45 = vpop.f32.mrb[13].mxu1  ;;  %v7151_v46 = vpop.f32.mrb[13].mxu0 }
 0x116   :  { %v400_v47 = vpop.f32.mrb[14].mxu1  ;;  %v7153_v48 = vpop.f32.mrb[14].mxu0 }
 0x117   :  { %v411_v49 = vpack.c.bf16 %v400_v47, %v396_v42  ;;  %v402_v50 = vpop.f32.mrb[15].mxu1  ;;  %v273_v51 = vpack.c.bf16 %v7153_v48, %v7146_v43  ;;  %v7157_v52 = vpop.f32.mrb[15].mxu0  ;;  %v6481_v47 = vld [vmem:[%s8346_s26 + $0x1c4] ss:$8 sps:$4 sm:$0xff]  }
 0x118   :  { %787 = vmatpush1.bf16.msra.mxu0 %v6446_v41  ;;  %v412_v54 = vpack.c.bf16 %v402_v50, %v398_v45  ;;  %v274_v55 = vpack.c.bf16 %v7157_v52, %v7151_v46  ;;  %v6475_v41 = vld [vmem:[%s8346_s26 + $0x1a4] ss:$8 sps:$4 sm:$0xff]   ;;  %v6482_v50 = vld [vmem:[%s8346_s26 + $0x1d0] ss:$8 sps:$4 sm:$0xff]   ;;  %v6485_v46 = vld [vmem:[%s8346_s26 + $0x1e0] ss:$8 sps:$4 sm:$0xff]  }
 0x119   :  { %788 = vmatprep.subr.bf16.mxu0 %v6451_v44  ;;  %v6476_v44 = vld [vmem:[%s8346_s26 + $0x1b0] ss:$8 sps:$4 sm:$0xff]  }
 0x11a   :  { %4971 = vmatprep.mubr.msk.bf16.mxu0 %vm558_vm0, %v412_v54  ;;  %v6487_v54 = vld [vmem:[%s8346_s26 + $0x1e4] ss:$8 sps:$4 sm:$0xff]  }
 0x11b   :  { %634 = vmatmul.mubr.bf16.gmra.mrb[28].mxu0 %v411_v49 }
 0x11c   :  { %789 = vmatpush1.bf16.msra.mxu0 %v6449_v53  ;;  %4996 = vmatprep.mubr.msk.bf16.mxu0 %vm558_vm0, %v268_v7  ;;  %v7175_v58 = vpop.f32.mrb[16].mxu1  ;;  %v6458_v7 = vld [vmem:[%s8346_s26 + $0x90] ss:$8 sps:$4 sm:$0xff]  }
 0x11d   :  { %790 = vmatprep.subr.bf16.mxu0 %v6454_v56  ;;  %v7180_v62 = vpop.f32.mrb[17].mxu1 }
 0x11e   :  { %v7182_v0 = vpop.f32.mrb[18].mxu1 }
 0x11f   :  { %v955_v2 = vpack.c.bf16 %v7182_v0, %v7175_v58  ;;  %v7186_v5 = vpop.f32.mrb[19].mxu1  ;;  %v6509_v58 = vld [vmem:[%s8346_s26 + $0x260] ss:$8 sps:$4 sm:$0xff]   ;;  %v6514_v0 = vld [vmem:[%s8346_s26 + $0x274] ss:$8 sps:$4 sm:$0xff]  }
 0x120   :  { %791 = vmatpush1.bf16.msra.mxu0 %v6452_v57  ;;  %v956_v4 = vpack.c.bf16 %v7186_v5, %v7180_v62  ;;  %v6488_v57 = vld [vmem:[%s8346_s26 + $0x1f0] ss:$8 sps:$4 sm:$0xff]   ;;  %v6491_v62 = vld [vmem:[%s8346_s26 + $0x200] ss:$8 sps:$4 sm:$0xff]  }
 0x121   :  { %792 = vmatprep.subr.bf16.mxu0 %v6457_v60 }
 0x124   :  { %793 = vmatpush1.bf16.msra.mxu0 %v6455_v61  ;;  %v7199_v8 = vpop.f32.mrb[20].mxu1  ;;  %v6493_v61 = vld [vmem:[%s8346_s26 + $0x204] ss:$8 sps:$4 sm:$0xff]  }
 0x125   :  { %794 = vmatprep.subr.bf16.mxu0 %v6460_v6  ;;  %v7204_v10 = vpop.f32.mrb[21].mxu1 }
 0x126   :  { %v7206_v12 = vpop.f32.mrb[22].mxu1 }
 0x127   :  { %v957_v13 = vpack.c.bf16 %v7206_v12, %v7199_v8  ;;  %v7210_v15 = vpop.f32.mrb[23].mxu1  ;;  %v6515_v8 = vld [vmem:[%s8346_s26 + $0x280] ss:$8 sps:$4 sm:$0xff]   ;;  %v6520_v12 = vld [vmem:[%s8346_s26 + $0x294] ss:$8 sps:$4 sm:$0xff]  }
 0x128   :  { %795 = vmatpush1.bf16.msra.mxu0 %v6458_v7  ;;  %v958_v18 = vpack.c.bf16 %v7210_v15, %v7204_v10  ;;  %v6494_v7 = vld [vmem:[%s8346_s26 + $0x210] ss:$8 sps:$4 sm:$0xff]   ;;  %v6517_v10 = vld [vmem:[%s8346_s26 + $0x284] ss:$8 sps:$4 sm:$0xff]  }
 0x129   :  { %796 = vmatprep.subr.bf16.mxu0 %v6463_v9  ;;  %v6523_v15 = vld [vmem:[%s8346_s26 + $0x2a4] ss:$8 sps:$4 sm:$0xff]  }
 0x12c   :  { %797 = vmatpush1.bf16.msra.mxu0 %v6461_v17  ;;  %v7223_v24 = vpop.f32.mrb[24].mxu1  ;;  %v6499_v17 = vld [vmem:[%s8346_s26 + $0x224] ss:$8 sps:$4 sm:$0xff]  }
 0x12d   :  { %798 = vmatprep.subr.bf16.mxu0 %v6466_v21  ;;  %v7228_v26 = vpop.f32.mrb[25].mxu1 }
 0x12e   :  { %v7230_v28 = vpop.f32.mrb[26].mxu1 }
 0x12f   :  { %v959_v29 = vpack.c.bf16 %v7230_v28, %v7223_v24  ;;  %v7234_v31 = vpop.f32.mrb[27].mxu1  ;;  %v6526_v24 = vld [vmem:[%s8346_s26 + $0x2b4] ss:$8 sps:$4 sm:$0xff]   ;;  %v6529_v28 = vld [vmem:[%s8346_s26 + $0x2c4] ss:$8 sps:$4 sm:$0xff]  }
 0x130   :  { %799 = vmatpush1.bf16.msra.mxu0 %v6464_v22  ;;  %v960_v34 = vpack.c.bf16 %v7234_v31, %v7228_v26  ;;  %v6524_v26 = vld [vmem:[%s8346_s26 + $0x2b0] ss:$8 sps:$4 sm:$0xff]   ;;  %v6532_v31 = vld [vmem:[%s8346_s26 + $0x2d4] ss:$8 sps:$4 sm:$0xff]  }
 0x131   :  { %1120 = vmatprep.subr.bf16.mxu0 %v6469_v25 }
 0x133   :  { %809 = vmatmul.mubr.bf16.vlgmr.msra.gmra.mrb[16].mxu0 %v267_v3 }
 0x134   :  { %1121 = vmatpush1.bf16.msra.mxu0 %v6467_v33  ;;  %4997 = vmatprep.mubr.msk.bf16.mxu0 %vm558_vm0, %v270_v23  ;;  %v7254_v40 = vpop.f32.mrb[28].mxu1  ;;  %v6478_v23 = vld [vmem:[%s8346_s26 + $0x1b4] ss:$8 sps:$4 sm:$0xff]  }
 0x135   :  { %1122 = vmatprep.subr.bf16.mxu0 %v6472_v37  ;;  %v7259_v42 = vpop.f32.mrb[29].mxu1  ;;  %v6497_v37 = vld [vmem:[%s8346_s26 + $0x220] ss:$8 sps:$4 sm:$0xff]  }
 0x136   :  { %v7261_v59 = vpop.f32.mrb[30].mxu1 }
 0x137   :  { %v961_v63 = vpack.c.bf16 %v7261_v59, %v7254_v40  ;;  %v7265_v3 = vpop.f32.mrb[31].mxu1  ;;  %v6535_v40 = vld [vmem:[%s8346_s26 + $0x2e4] ss:$8 sps:$4 sm:$0xff]   ;;  %v6538_v59 = vld [vmem:[%s8346_s26 + $0x2f4] ss:$8 sps:$4 sm:$0xff]  }
 0x138   :  { %1123 = vmatpush1.bf16.msra.mxu0 %v6470_v38  ;;  %v962_v20 = vpack.c.bf16 %v7265_v3, %v7259_v42  ;;  %v6533_v42 = vld [vmem:[%s8346_s26 + $0x2e0] ss:$8 sps:$4 sm:$0xff]  }
 0x139   :  { %1124 = vmatprep.subr.bf16.mxu0 %v6475_v41  ;;  %v6502_v41 = vld [vmem:[%s8346_s26 + $0x234] ss:$8 sps:$4 sm:$0xff]  }
 0x13b   :  { %819 = vmatmul.mubr.bf16.gmra.mrb[20].mxu0 %v269_v19 }
 0x13c   :  { %1125 = vmatpush1.bf16.msra.mxu0 %v6473_v14  ;;  %4998 = vmatprep.mubr.msk.bf16.mxu0 %vm558_vm0, %v272_v39  ;;  %v7285_v45 = vpop.f32.mrb[32].mxu1  ;;  %v6484_v39 = vld [vmem:[%s8346_s26 + $0x1d4] ss:$8 sps:$4 sm:$0xff]   ;;  %v6500_v14 = vld [vmem:[%s8346_s26 + $0x230] ss:$8 sps:$4 sm:$0xff]  }
 0x13d   :  { %1126 = vmatprep.subr.bf16.mxu0 %v6478_v23  ;;  %v7290_v49 = vpop.f32.mrb[33].mxu1  ;;  %v6505_v23 = vld [vmem:[%s8346_s26 + $0x244] ss:$8 sps:$4 sm:$0xff]  }
 0x13e   :  { %v7292_v11 = vpop.f32.mrb[34].mxu1 }
 0x13f   :  { %v1315_v16 = vpack.c.bf16 %v7292_v11, %v7285_v45  ;;  %v7296_v19 = vpop.f32.mrb[35].mxu1 }
 0x140   :  { %1127 = vmatpush1.bf16.msra.mxu0 %v6476_v44  ;;  %v1316_v36 = vpack.c.bf16 %v7296_v19, %v7290_v49  ;;  %v6503_v44 = vld [vmem:[%s8346_s26 + $0x240] ss:$8 sps:$4 sm:$0xff]  }
 0x141   :  { %1128 = vmatprep.subr.bf16.mxu0 %v6481_v47  ;;  %v6508_v47 = vld [vmem:[%s8346_s26 + $0x254] ss:$8 sps:$4 sm:$0xff]  }
 0x143   :  { %829 = vmatmul.mubr.bf16.gmra.mrb[24].mxu0 %v271_v35 }
 0x144   :  { %1129 = vmatpush1.bf16.msra.mxu0 %v6479_v30  ;;  %4999 = vmatprep.mubr.msk.bf16.mxu0 %vm558_vm0, %v274_v55  ;;  %v7316_v53 = vpop.f32.mrb[36].mxu1  ;;  %v6490_v55 = vld [vmem:[%s8346_s26 + $0x1f4] ss:$8 sps:$4 sm:$0xff]   ;;  %v6506_v30 = vld [vmem:[%s8346_s26 + $0x250] ss:$8 sps:$4 sm:$0xff]  }
 0x145   :  { %1130 = vmatprep.subr.bf16.mxu0 %v6484_v39  ;;  %v7321_v56 = vpop.f32.mrb[37].mxu1  ;;  %v6511_v39 = vld [vmem:[%s8346_s26 + $0x264] ss:$8 sps:$4 sm:$0xff]  }
 0x146   :  { %v7323_v27 = vpop.f32.mrb[38].mxu1 }
 0x147   :  { %v1317_v32 = vpack.c.bf16 %v7323_v27, %v7316_v53  ;;  %v7327_v35 = vpop.f32.mrb[39].mxu1 }
 0x148   :  { %1131 = vmatpush1.bf16.msra.mxu0 %v6482_v50  ;;  %v1318_v52 = vpack.c.bf16 %v7327_v35, %v7321_v56 }
 0x149   :  { %1132 = vmatprep.subr.bf16.mxu0 %v6487_v54 }
 0x14b   :  { %839 = vmatmul.mubr.bf16.gmra.mrb[28].mxu0 %v273_v51 }
 0x14c   :  { %1133 = vmatpush1.bf16.msra.mxu0 %v6485_v46  ;;  %5060 = vmatprep.mubr.msk.bf16.mxu0 %vm558_vm0, %v956_v4  ;;  %v7347_v60 = vpop.f32.mrb[40].mxu1  ;;  %v6496_v4 = vld [vmem:[%s8346_s26 + $0x214] ss:$8 sps:$4 sm:$0xff]  }
 0x14d   :  { %1134 = vmatprep.subr.bf16.mxu0 %v6490_v55  ;;  %v7352_v6 = vpop.f32.mrb[41].mxu1 }
 0x14e   :  { %v7354_v43 = vpop.f32.mrb[42].mxu1 }
 0x14f   :  { %v1319_v48 = vpack.c.bf16 %v7354_v43, %v7347_v60  ;;  %v7358_v51 = vpop.f32.mrb[43].mxu1 }
 0x150   :  { %1135 = vmatpush1.bf16.msra.mxu0 %v6488_v57  ;;  %v1320_v5 = vpack.c.bf16 %v7358_v51, %v7352_v6 }
 0x151   :  { %1136 = vmatprep.subr.bf16.mxu0 %v6493_v61 }
 0x154   :  { %1137 = vmatpush1.bf16.msra.mxu0 %v6491_v62  ;;  %v7371_v9 = vpop.f32.mrb[44].mxu1 }
 0x155   :  { %1138 = vmatprep.subr.bf16.mxu0 %v6496_v4  ;;  %v7376_v21 = vpop.f32.mrb[45].mxu1 }
 0x156   :  { %v7378_v22 = vpop.f32.mrb[46].mxu1 }
 0x157   :  { %v1321_v25 = vpack.c.bf16 %v7378_v22, %v7371_v9  ;;  %v7382_v33 = vpop.f32.mrb[47].mxu1 }
 0x158   :  { %1139 = vmatpush1.bf16.msra.mxu0 %v6494_v7  ;;  %v1322_v38 = vpack.c.bf16 %v7382_v33, %v7376_v21 }
 0x159   :  { %1140 = vmatprep.subr.bf16.mxu0 %v6499_v17 }
 0x15c   :  { %1141 = vmatpush1.bf16.msra.mxu0 %v6497_v37 }
 0x15d   :  { %1142 = vmatprep.subr.bf16.mxu0 %v6502_v41 }
 0x160   :  { %1143 = vmatpush1.bf16.msra.mxu0 %v6500_v14 }
 0x161   :  { %1480 = vmatprep.subr.bf16.mxu0 %v6505_v23 }
 0x163   :  { %1153 = vmatmul.mubr.bf16.vlgmr.msra.gmra.mrb[16].mxu0 %v955_v2  ;;  %v6512_v2 = vld [vmem:[%s8346_s26 + $0x270] ss:$8 sps:$4 sm:$0xff]  }
 0x164   :  { %1481 = vmatpush1.bf16.msra.mxu0 %v6503_v44  ;;  %5061 = vmatprep.mubr.msk.bf16.mxu0 %vm558_vm0, %v958_v18  ;;  %v6521_v18 = vld [vmem:[%s8346_s26 + $0x2a0] ss:$8 sps:$4 sm:$0xff]  }
 0x165   :  { %1482 = vmatprep.subr.bf16.mxu0 %v6508_v47 }
 0x168   :  { %1483 = vmatpush1.bf16.msra.mxu0 %v6506_v30 }
 0x169   :  { %1484 = vmatprep.subr.bf16.mxu0 %v6511_v39 }
 0x16b   :  { %1163 = vmatmul.mubr.bf16.gmra.mrb[20].mxu0 %v957_v13  ;;  %v6518_v13 = vld [vmem:[%s8346_s26 + $0x290] ss:$8 sps:$4 sm:$0xff]  }
 0x16c   :  { %1485 = vmatpush1.bf16.msra.mxu0 %v6509_v58  ;;  %5062 = vmatprep.mubr.msk.bf16.mxu0 %vm558_vm0, %v960_v34  ;;  %v6530_v34 = vld [vmem:[%s8346_s26 + $0x2d0] ss:$8 sps:$4 sm:$0xff]  }
 0x16d   :  { %1486 = vmatprep.subr.bf16.mxu0 %v6514_v0 }
 0x170   :  { %1487 = vmatpush1.bf16.msra.mxu0 %v6512_v2 }
 0x171   :  { %1488 = vmatprep.subr.bf16.mxu0 %v6517_v10 }
 0x173   :  { %1173 = vmatmul.mubr.bf16.gmra.mrb[24].mxu0 %v959_v29  ;;  %v6527_v29 = vld [vmem:[%s8346_s26 + $0x2c0] ss:$8 sps:$4 sm:$0xff]  }
 0x174   :  { %1489 = vmatpush1.bf16.msra.mxu0 %v6515_v8  ;;  %5063 = vmatprep.mubr.msk.bf16.mxu0 %vm558_vm0, %v962_v20 }
 0x175   :  { %1490 = vmatprep.subr.bf16.mxu0 %v6520_v12 }
 0x178   :  { %1491 = vmatpush1.bf16.msra.mxu0 %v6518_v13 }
 0x179   :  { %1492 = vmatprep.subr.bf16.mxu0 %v6523_v15 }
 0x17b   :  { %1183 = vmatmul.mubr.bf16.gmra.mrb[28].mxu0 %v961_v63  ;;  %v6536_v63 = vld [vmem:[%s8346_s26 + $0x2f0] ss:$8 sps:$4 sm:$0xff]  }
 0x17c   :  { %1493 = vmatpush1.bf16.msra.mxu0 %v6521_v18  ;;  %5124 = vmatprep.mubr.msk.bf16.mxu0 %vm558_vm0, %v1316_v36 }
 0x17d   :  { %1494 = vmatprep.subr.bf16.mxu0 %v6526_v24 }
 0x180   :  { %1495 = vmatpush1.bf16.msra.mxu0 %v6524_v26 }
 0x181   :  { %1496 = vmatprep.subr.bf16.mxu0 %v6529_v28 }
 0x184   :  { %1497 = vmatpush1.bf16.msra.mxu0 %v6527_v29  ;;  %v6539_v29 = vld [vmem:[%s8348_s23] sm:$0xff]  }
 0x185   :  { %1498 = vmatprep.subr.bf16.mxu0 %v6532_v31  ;;  %v6540_v31 = vld [vmem:[%s8348_s23 + $0x8] sm:$0xff]  }
 0x188   :  { %1499 = vmatpush1.bf16.msra.mxu0 %v6530_v34  ;;  %v6543_v34 = vld [vmem:[%s8349_s24 + $0xc0] sm:$0xff]  }
 0x189   :  { %1500 = vmatprep.subr.bf16.mxu0 %v6535_v40  ;;  %v6541_v40 = vld [vmem:[%s8348_s23 + $0x10] sm:$0xff]  }
 0x18c   :  { %1501 = vmatpush1.bf16.msra.mxu0 %v6533_v42  ;;  %v6544_v42 = vld [vmem:[%s8349_s24 + $0x80] sm:$0xff]  }
 0x18d   :  { %1502 = vmatprep.subr.bf16.mxu0 %v6538_v59  ;;  %v6545_v59 = vld [vmem:[%s8349_s24 + $0xc8] sm:$0xff]  }
 0x190   :  { %1503 = vmatpush1.bf16.msra.mxu0 %v6536_v63  ;;  %v6546_v63 = vld [vmem:[%s8349_s24 + $0x88] sm:$0xff]  }
 0x193   :  { %1513 = vmatmul.mubr.bf16.vlgmr.msra.gmra.mrb[16].mxu0 %v1315_v16 }
 0x194   :  { %5125 = vmatprep.mubr.msk.bf16.mxu0 %vm558_vm0, %v1318_v52 }
 0x19b   :  { %1523 = vmatmul.mubr.bf16.gmra.mrb[20].mxu0 %v1317_v32 }
 0x19c   :  { %5126 = vmatprep.mubr.msk.bf16.mxu0 %vm558_vm0, %v1320_v5 }
 0x1a3   :  { %1533 = vmatmul.mubr.bf16.gmra.mrb[24].mxu0 %v1319_v48 }
 0x1a4   :  { %5127 = vmatprep.mubr.msk.bf16.mxu0 %vm558_vm0, %v1322_v38 }
 0x1ab   :  { %1543 = vmatmul.mubr.bf16.gmra.mrb[28].mxu0 %v1321_v25 }
 0x266   :  { %v1514_v3 = vpop.f32.mrb[16].mxu0 }
 0x267   :  { %v1585_v20 = vmul.f32 0.2, %v1514_v3  ;;  %v1516_v45 = vpop.f32.mrb[17].mxu0  ;;  %vm1569_vm1 = vcmp.ge.f32.partialorder %v1514_v3, 0.0 }
 0x268   :  { %v1586_v49 = vmul.f32 0.2, %v1516_v45  ;;  %v1518_v11 = vpop.f32.mrb[18].mxu0  ;;  %vm1570_vm2 = vcmp.ge.f32.partialorder %v1516_v45, 0.0 }
 0x269   :  { %vm1571_vm3 = vcmp.ge.f32.partialorder %v1518_v11, 0.0  ;;  %v1587_v16 = vmul.f32 0.2, %v1518_v11  ;;  %v1520_v19 = vpop.f32.mrb[19].mxu0  ;;  %v1601_v50 = vsel %vm1569_vm1, %v1514_v3, %v1585_v20  ;;  %v6547_v3 = vld [vmem:[%s8349_s24 + $0xd0] sm:$0xff]   ;;  %v6542_v20 = vld [vmem:[%s8348_s23 + $0x18] sm:$0xff]  }
 0x26a   :  { %vm1572_vm4 = vcmp.ge.f32.partialorder %v1520_v19, 0.0  ;;  %v1588_v36 = vmul.f32 0.2, %v1520_v19  ;;  %v1602_v54 = vsel %vm1570_vm2, %v1516_v45, %v1586_v49  ;;  %v6548_v45 = vld [vmem:[%s8349_s24 + $0x90] sm:$0xff]   ;;  %v6549_v49 = vld [vmem:[%s8349_s24 + $0xd8] sm:$0xff]   ;;  %vm6683_vm2 = vmmov 0  }
 0x26b   :  { %v1603_v53 = vsel %vm1571_vm3, %v1518_v11, %v1587_v16  ;;  %v6550_v11 = vld [vmem:[%s8349_s24 + $0x98] sm:$0xff]   ;;  %v6551_v16 = vld [vmem:[%s8349_s24 + $0xe0] sm:$0xff]  }
 0x26c   :  { %v7519_v56 = vpack.c.bf16 %v1603_v53, %v1601_v50  ;;  %v1604_v27 = vsel %vm1572_vm4, %v1520_v19, %v1588_v36  ;;  %v6552_v19 = vld [vmem:[%s8349_s24 + $0xa0] sm:$0xff]   ;;  %v6553_v36 = vld [vmem:[%s8349_s24 + $0xe8] sm:$0xff]   ;;  %v6555_v53 = vld [vmem:[%s8349_s24 + $0xf0] sm:$0xff]  }
 0x26d   :  { %v7521_v32 = vpack.c.bf16 %v1604_v27, %v1602_v54  ;;  %v6554_v50 = vld [vmem:[%s8349_s24 + $0xa8] sm:$0xff]   ;;  %v6556_v54 = vld [vmem:[%s8349_s24 + $0xb0] sm:$0xff]   ;;  %v6557_v27 = vld [vmem:[%s8349_s24 + $0xf8] sm:$0xff]  }
 0x26e   :  { %v1524_v35 = vpop.f32.mrb[20].mxu0 }
 0x26f   :  { %v1589_v46 = vmul.f32 0.2, %v1524_v35  ;;  %v1526_v52 = vpop.f32.mrb[21].mxu0  ;;  %1645 = vmatprep.subr.bf16.mxu1 %v7521_v32  ;;  %vm1573_vm5 = vcmp.ge.f32.partialorder %v1524_v35, 0.0 }
 0x270   :  { %v1590_v55 = vmul.f32 0.2, %v1526_v52  ;;  %v1528_v57 = vpop.f32.mrb[22].mxu0  ;;  %1646 = vmatpush1.bf16.msra.mxu1 %v7519_v56  ;;  %vm1574_vm6 = vcmp.ge.f32.partialorder %v1526_v52, 0.0 }
 0x271   :  { %vm1575_vm7 = vcmp.ge.f32.partialorder %v1528_v57, 0.0  ;;  %v1591_v60 = vmul.f32 0.2, %v1528_v57  ;;  %v1530_v61 = vpop.f32.mrb[23].mxu0  ;;  %v1605_v43 = vsel %vm1573_vm5, %v1524_v35, %v1589_v46  ;;  %v6558_v35 = vld [vmem:[%s8349_s24 + $0xb8] sm:$0xff]   ;;  %v6559_v46 = vld [vmem:[%s8349_s24 + $0x40] sm:$0xff]  }
 0x272   :  { %vm1576_vm8 = vcmp.ge.f32.partialorder %v1530_v61, 0.0  ;;  %v1592_v6 = vmul.f32 0.2, %v1530_v61  ;;  %v1606_v51 = vsel %vm1574_vm6, %v1526_v52, %v1590_v55 }
 0x273   :  { %v1607_v48 = vsel %vm1575_vm7, %v1528_v57, %v1591_v60  ;;  %vm2916_vm7 = vcmask 261120  }
 0x274   :  { %v7525_v62 = vpack.c.bf16 %v1607_v48, %v1605_v43  ;;  %v1608_v5 = vsel %vm1576_vm8, %v1530_v61, %v1592_v6 }
 0x275   :  { %v7527_v4 = vpack.c.bf16 %v1608_v5, %v1606_v51 }
 0x276   :  { %v1534_v7 = vpop.f32.mrb[24].mxu0 }
 0x277   :  { %v1593_v9 = vmul.f32 0.2, %v1534_v7  ;;  %v1536_v17 = vpop.f32.mrb[25].mxu0  ;;  %1647 = vmatprep.subr.bf16.mxu1 %v7527_v4  ;;  %vm1577_vm9 = vcmp.ge.f32.partialorder %v1534_v7, 0.0 }
 0x278   :  { %v1594_v21 = vmul.f32 0.2, %v1536_v17  ;;  %v1538_v22 = vpop.f32.mrb[26].mxu0  ;;  %1648 = vmatpush1.bf16.msra.mxu1 %v7525_v62  ;;  %vm1578_vm10 = vcmp.ge.f32.partialorder %v1536_v17, 0.0 }
 0x279   :  { %vm1579_vm11 = vcmp.ge.f32.partialorder %v1538_v22, 0.0  ;;  %v1595_v25 = vmul.f32 0.2, %v1538_v22  ;;  %v1540_v33 = vpop.f32.mrb[27].mxu0  ;;  %v1609_v38 = vsel %vm1577_vm9, %v1534_v7, %v1593_v9 }
 0x27a   :  { %vm1580_vm12 = vcmp.ge.f32.partialorder %v1540_v33, 0.0  ;;  %v1596_v37 = vmul.f32 0.2, %v1540_v33  ;;  %v1610_v14 = vsel %vm1578_vm10, %v1536_v17, %v1594_v21  ;;  %vm3770_vm10 = vcmask 130048  }
 0x27b   :  { %v1611_v41 = vsel %vm1579_vm11, %v1538_v22, %v1595_v25  ;;  %vm4452_vm11 = vcmask 1043456  }
 0x27c   :  { %v7531_v23 = vpack.c.bf16 %v1611_v41, %v1609_v38  ;;  %v1612_v44 = vsel %vm1580_vm12, %v1540_v33, %v1596_v37  ;;  %v6560_v38 = vld [vmem:[%s8349_s24] sm:$0xff]   ;;  %v6561_v41 = vld [vmem:[%s8349_s24 + $0x48] sm:$0xff]   ;;  %vm4448_vm12 = vcmask 64512  }
 0x27d   :  { %v7533_v47 = vpack.c.bf16 %v1612_v44, %v1610_v14  ;;  %v6562_v44 = vld [vmem:[%s8349_s24 + $0x8] sm:$0xff]  }
 0x27e   :  { %v1544_v30 = vpop.f32.mrb[28].mxu0 }
 0x27f   :  { %v1597_v39 = vmul.f32 0.2, %v1544_v30  ;;  %v1546_v58 = vpop.f32.mrb[29].mxu0  ;;  %1649 = vmatprep.subr.bf16.mxu1 %v7533_v47  ;;  %vm1581_vm13 = vcmp.ge.f32.partialorder %v1544_v30, 0.0 }
 0x280   :  { %v1598_v0 = vmul.f32 0.2, %v1546_v58  ;;  %v1548_v2 = vpop.f32.mrb[30].mxu0  ;;  %1650 = vmatpush1.bf16.msra.mxu1 %v7531_v23  ;;  %vm1582_vm14 = vcmp.ge.f32.partialorder %v1546_v58, 0.0 }
 0x281   :  { %vm1583_vm15 = vcmp.ge.f32.partialorder %v1548_v2, 0.0  ;;  %v1599_v10 = vmul.f32 0.2, %v1548_v2  ;;  %v1550_v8 = vpop.f32.mrb[31].mxu0  ;;  %v1613_v13 = vsel %vm1581_vm13, %v1544_v30, %v1597_v39  ;;  %v6563_v39 = vld [vmem:[%s8349_s24 + $0x50] sm:$0xff]   ;;  %vm4882_vm13 = vcmask 1024  }
 0x282   :  { %vm1584_vm1 = vcmp.ge.f32.partialorder %v1550_v8, 0.0  ;;  %v1600_v12 = vmul.f32 0.2, %v1550_v8  ;;  %v1614_v18 = vsel %vm1582_vm14, %v1546_v58, %v1598_v0 }
 0x283   :  { %v1615_v15 = vsel %vm1583_vm15, %v1548_v2, %v1599_v10 }
 0x284   :  { %v7537_v24 = vpack.c.bf16 %v1615_v15, %v1613_v13  ;;  %v1616_v26 = vsel %vm1584_vm1, %v1550_v8, %v1600_v12  ;;  %v6564_v8 = vld [vmem:[%s8349_s24 + $0x10] sm:$0xff]   ;;  %v6565_v12 = vld [vmem:[%s8349_s24 + $0x58] sm:$0xff]   ;;  %v6567_v15 = vld [vmem:[%s8349_s24 + $0x60] sm:$0xff]  }
 0x285   :  { %v7539_v28 = vpack.c.bf16 %v1616_v26, %v1614_v18  ;;  %v6566_v13 = vld [vmem:[%s8349_s24 + $0x18] sm:$0xff]   ;;  %v6568_v18 = vld [vmem:[%s8349_s24 + $0x20] sm:$0xff]   ;;  %v6569_v26 = vld [vmem:[%s8349_s24 + $0x68] sm:$0xff]  }
 0x287   :  { %1651 = vmatprep.subr.bf16.mxu1 %v7539_v28 }
 0x288   :  { %1652 = vmatpush1.bf16.msra.mxu1 %v7537_v24 }
 0x289   :  { %1755 = vmatprep.subr.bf16.mxu1 %v7521_v32 }
 0x28b   :  { %5130 = vmatmul.mubr.msk.bf16.vlgmr.msra.gmra.mrb[48].mxu1 %vm558_vm0, %v6539_v29  ;;  %v6570_v29 = vld [vmem:[%s8349_s24 + $0x28] sm:$0xff]  }
 0x28c   :  { %1756 = vmatpush1.bf16.msra.mxu1 %v7519_v56  ;;  %1687 = vmatprep.mubr.bf16.mxu1 %v6681_v1 }
 0x28d   :  { %1757 = vmatprep.subr.bf16.mxu1 %v7527_v4 }
 0x290   :  { %1758 = vmatpush1.bf16.msra.mxu1 %v7525_v62 }
 0x291   :  { %1759 = vmatprep.subr.bf16.mxu1 %v7533_v47 }
 0x293   :  { %5131 = vmatmul.mubr.msk.bf16.gmra.mrb[52].mxu1 %vm558_vm0, %v6540_v31  ;;  %v6571_v31 = vld [vmem:[%s8349_s24 + $0x70] sm:$0xff]  }
 0x294   :  { %1760 = vmatpush1.bf16.msra.mxu1 %v7531_v23  ;;  %1787 = vmatprep.mubr.bf16.mxu1 %v6681_v1 }
 0x295   :  { %1761 = vmatprep.subr.bf16.mxu1 %v7539_v28 }
 0x298   :  { %1762 = vmatpush1.bf16.msra.mxu1 %v7537_v24 }
 0x299   :  { %5505 = vmatprep.subr.bf16.mxu1 %v6543_v34  ;;  %v6572_v34 = vld [vmem:[%s8349_s24 + $0x30] sm:$0xff]  }
 0x29b   :  { %5138 = vmatmul.mubr.msk.bf16.vlgmr.msra.gmra.mrb[56].mxu1 %vm558_vm0, %v6541_v40  ;;  %v6573_v40 = vld [vmem:[%s8349_s24 + $0x78] sm:$0xff]  }
 0x29c   :  { %1797 = vmatprep.mubr.bf16.mxu1 %v6681_v1  ;;  %5506 = vmatpush3.bf16.msra.mxu1 %v6544_v42  ;;  %v6574_v42 = vld [vmem:[%s8349_s24 + $0x38] sm:$0xff]  }
 0x29d   :  { %5507 = vmatprep.subr.bf16.mxu1 %v6545_v59  ;;  %v6575_v59 = vld [vmem:[%s8348_s23 + $0x20] sm:$0xff]  }
 0x2a0   :  { %5508 = vmatpush3.bf16.msra.mxu1 %v6546_v63  ;;  %v6576_v63 = vld [vmem:[%s8348_s23 + $0x28] sm:$0xff]  }
 0x2a1   :  { %5509 = vmatprep.subr.bf16.mxu1 %v6547_v3  ;;  %v6586_v3 = vld [vmem:[%s8349_s24 + $0x118] sm:$0xff]  }
 0x2a3   :  { %5139 = vmatmul.mubr.msk.bf16.gmra.mrb[60].mxu1 %vm558_vm0, %v6542_v20  ;;  %v6587_v20 = vld [vmem:[%s8349_s24 + $0x160] sm:$0xff]  }
 0x2a4   :  { %5510 = vmatpush3.bf16.msra.mxu1 %v6548_v45  ;;  %v6588_v45 = vld [vmem:[%s8349_s24 + $0x1c0] sm:$0xff]  }
 0x2a5   :  { %5511 = vmatprep.subr.bf16.mxu1 %v6549_v49  ;;  %v6589_v49 = vld [vmem:[%s8349_s24 + $0x120] sm:$0xff]  }
 0x2a8   :  { %5512 = vmatpush3.bf16.msra.mxu1 %v6550_v11  ;;  %v6590_v11 = vld [vmem:[%s8349_s24 + $0x180] sm:$0xff]  }
 0x2a9   :  { %5513 = vmatprep.subr.bf16.mxu1 %v6551_v16  ;;  %v6591_v16 = vld [vmem:[%s8349_s24 + $0x168] sm:$0xff]  }
 0x2ac   :  { %5514 = vmatpush3.bf16.msra.mxu1 %v6552_v19  ;;  %v6592_v19 = vld [vmem:[%s8349_s24 + $0x1c8] sm:$0xff]  }
 0x2ad   :  { %5515 = vmatprep.subr.bf16.mxu1 %v6553_v36  ;;  %v6593_v36 = vld [vmem:[%s8349_s24 + $0x128] sm:$0xff]  }
 0x2b0   :  { %5516 = vmatpush3.bf16.msra.mxu1 %v6554_v50  ;;  %v6594_v50 = vld [vmem:[%s8349_s24 + $0x188] sm:$0xff]  }
 0x2b1   :  { %5517 = vmatprep.subr.bf16.mxu1 %v6555_v53  ;;  %v6595_v53 = vld [vmem:[%s8349_s24 + $0x170] sm:$0xff]  }
 0x2b4   :  { %5518 = vmatpush3.bf16.msra.mxu1 %v6556_v54  ;;  %v6596_v54 = vld [vmem:[%s8349_s24 + $0x1d0] sm:$0xff]  }
 0x2b5   :  { %5519 = vmatprep.subr.bf16.mxu1 %v6557_v27  ;;  %v6597_v27 = vld [vmem:[%s8349_s24 + $0x130] sm:$0xff]  }
 0x2b8   :  { %5520 = vmatpush3.bf16.msra.mxu1 %v6558_v35  ;;  %v6598_v35 = vld [vmem:[%s8349_s24 + $0x190] sm:$0xff]  }
 0x2b9   :  { %5533 = vmatprep.subr.bf16.mxu1 %v6559_v46  ;;  %v6599_v46 = vld [vmem:[%s8349_s24 + $0x178] sm:$0xff]  }
 0x35e   :  { %v1679_v52 = vpop.f32.mrb[48].mxu1 }
 0x35f   :  { %v1681_v55 = vpop.f32.mrb[49].mxu1 }
 0x360   :  { %v1683_v57 = vpop.f32.mrb[50].mxu1 }
 0x361   :  { %v1698_v60 = vpack.c.bf16 %v1683_v57, %v1679_v52  ;;  %v1685_v61 = vpop.f32.mrb[51].mxu1  ;;  %v6600_v52 = vld [vmem:[%s8349_s24 + $0x1d8] sm:$0xff]  }
 0x362   :  { %v1699_v6 = vpack.c.bf16 %v1685_v61, %v1681_v55  ;;  %v6601_v55 = vld [vmem:[%s8349_s24 + $0x138] sm:$0xff]   ;;  %v6604_v61 = vld [vmem:[%s8349_s24 + $0x1a0] sm:$0xff]  }
 0x363   :  { %v6602_v57 = vld [vmem:[%s8349_s24 + $0x198] sm:$0xff]  }
 0x366   :  { %v1689_v43 = vpop.f32.mrb[52].mxu1 }
 0x367   :  { %v1691_v48 = vpop.f32.mrb[53].mxu1 }
 0x368   :  { %v1693_v51 = vpop.f32.mrb[54].mxu1 }
 0x369   :  { %v1700_v5 = vpack.c.bf16 %v1693_v51, %v1689_v43  ;;  %v1695_v7 = vpop.f32.mrb[55].mxu1  ;;  %v6606_v43 = vld [vmem:[%s8349_s24 + $0x1a8] sm:$0xff]   ;;  %v6608_v51 = vld [vmem:[%s8349_s24 + $0x1b0] sm:$0xff]  }
 0x36a   :  { %v1701_v9 = vpack.c.bf16 %v1695_v7, %v1691_v48  ;;  %v6607_v48 = vld [vmem:[%s8349_s24 + $0x1f0] sm:$0xff]   ;;  %v6610_v7 = vld [vmem:[%s8349_s24 + $0x1b8] sm:$0xff]  }
 0x36e   :  { %v1789_v17 = vpop.f32.mrb[56].mxu1 }
 0x36f   :  { %v1791_v21 = vpop.f32.mrb[57].mxu1 }
 0x370   :  { %v1793_v22 = vpop.f32.mrb[58].mxu1 }
 0x371   :  { %v1808_v25 = vpack.c.bf16 %v1793_v22, %v1789_v17  ;;  %v1795_v33 = vpop.f32.mrb[59].mxu1  ;;  %v2656_v17 = vld [vmem:[%s8319_s5 + $0x8] sm:$0xff] }
 0x372   :  { %v1809_v37 = vpack.c.bf16 %v1795_v33, %v1791_v21 }
 0x374   :  { %1973 = vmatprep.mubr.bf16.mxu1 %v1809_v37 }
 0x375   :  { %1974 = vmatmul.mubr.bf16.vlgmr.msra.gmra.mrb[64].mxu1 %v1808_v25 }
 0x376   :  { %5534 = vmatpush3.bf16.msra.mxu1 %v6560_v38  ;;  %v1799_v14 = vpop.f32.mrb[60].mxu1 }
 0x377   :  { %v1801_v30 = vpop.f32.mrb[61].mxu1  ;;  %5535 = vmatprep.subr.bf16.mxu1 %v6561_v41 }
 0x378   :  { %v1803_v58 = vpop.f32.mrb[62].mxu1 }
 0x379   :  { %v1810_v0 = vpack.c.bf16 %v1803_v58, %v1799_v14  ;;  %v1805_v2 = vpop.f32.mrb[63].mxu1 }
 0x37a   :  { %v1811_v10 = vpack.c.bf16 %v1805_v2, %v1801_v30  ;;  %5536 = vmatpush3.bf16.msra.mxu1 %v6562_v44 }
 0x37b   :  { %5537 = vmatprep.subr.bf16.mxu1 %v6563_v39 }
 0x37c   :  { %1981 = vmatprep.mubr.bf16.mxu1 %v1811_v10 }
 0x37d   :  { %1982 = vmatmul.mubr.bf16.gmra.mrb[68].mxu1 %v1810_v0 }
 0x37e   :  { %5538 = vmatpush3.bf16.msra.mxu1 %v6564_v8  ;;  %2118 = vmatprep.mubr.bf16.mxu1 %v1699_v6  ;;  %v6605_v6 = vld [vmem:[%s8349_s24 + $0x1e8] sm:$0xff]  }
 0x37f   :  { %5539 = vmatprep.subr.bf16.mxu1 %v6565_v12 }
 0x382   :  { %5540 = vmatpush3.bf16.msra.mxu1 %v6566_v13 }
 0x383   :  { %5541 = vmatprep.subr.bf16.mxu1 %v6567_v15 }
 0x386   :  { %5542 = vmatpush3.bf16.msra.mxu1 %v6568_v18 }
 0x387   :  { %5543 = vmatprep.subr.bf16.mxu1 %v6569_v26 }
 0x38a   :  { %5544 = vmatpush3.bf16.msra.mxu1 %v6570_v29 }
 0x38b   :  { %5545 = vmatprep.subr.bf16.mxu1 %v6571_v31 }
 0x38e   :  { %5546 = vmatpush3.bf16.msra.mxu1 %v6572_v34 }
 0x38f   :  { %5547 = vmatprep.subr.bf16.mxu1 %v6573_v40 }
 0x392   :  { %5548 = vmatpush3.bf16.msra.mxu1 %v6574_v42 }
 0x393   :  { %2156 = vmatprep.subr.bf16.mxu1 %v7521_v32 }
 0x395   :  { %2119 = vmatmul.mubr.bf16.vlgmr.msra.gmra.mrb[72].mxu1 %v1698_v60  ;;  %v6603_v60 = vld [vmem:[%s8349_s24 + $0x1e0] sm:$0xff]  }
 0x396   :  { %2126 = vmatprep.mubr.bf16.mxu1 %v1701_v9  ;;  %2157 = vmatpush1.bf16.msra.mxu1 %v7519_v56  ;;  %v2655_v9 = vld [vmem:[%s8319_s5] sm:$0xff] }
 0x397   :  { %2158 = vmatprep.subr.bf16.mxu1 %v7527_v4  ;;  %v6159_v21 = vpack.c.bf16 %v2656_v17, %v2655_v9  ;;  %v2663_v9 = vld [vmem:[%s8319_s5 + $0x40] sm:$0xff]  ;;  %v2664_v17 = vld [vmem:[%s8319_s5 + $0x48] sm:$0xff] }
 0x39a   :  { %2159 = vmatpush1.bf16.msra.mxu1 %v7525_v62 }
 0x39b   :  { %2160 = vmatprep.subr.bf16.mxu1 %v7533_v47 }
 0x39d   :  { %2127 = vmatmul.mubr.bf16.gmra.mrb[76].mxu1 %v1700_v5  ;;  %v6609_v5 = vld [vmem:[%s8349_s24 + $0x1f8] sm:$0xff]  }
 0x39e   :  { %2161 = vmatpush1.bf16.msra.mxu1 %v7531_v23  ;;  %2188 = vmatprep.mubr.bf16.mxu1 %v6681_v1 }
 0x39f   :  { %2162 = vmatprep.subr.bf16.mxu1 %v7539_v28 }
 0x3a2   :  { %2163 = vmatpush1.bf16.msra.mxu1 %v7537_v24 }
 0x3a3   :  { %2416 = vmatprep.subr.bf16.mxu1 %v7521_v32  ;;  %v6578_v32 = vld [vmem:[%s8348_s23 + $0x38] sm:$0xff]  }
 0x3a5   :  { %5210 = vmatmul.mubr.msk.bf16.vlgmr.msra.gmra.mrb[80].mxu1 %vm558_vm0, %v6575_v59 }
 0x3a6   :  { %2417 = vmatpush1.bf16.msra.mxu1 %v7519_v56  ;;  %2198 = vmatprep.mubr.bf16.mxu1 %v6681_v1  ;;  %v6577_v56 = vld [vmem:[%s8348_s23 + $0x30] sm:$0xff]  }
 0x3a7   :  { %2418 = vmatprep.subr.bf16.mxu1 %v7527_v4  ;;  %v6580_v4 = vld [vmem:[%s8349_s24 + $0x100] sm:$0xff]  }
 0x3aa   :  { %2419 = vmatpush1.bf16.msra.mxu1 %v7525_v62  ;;  %v6579_v62 = vld [vmem:[%s8349_s24 + $0x140] sm:$0xff]  }
 0x3ab   :  { %2420 = vmatprep.subr.bf16.mxu1 %v7533_v47  ;;  %5561 = vmatprep.subr.bf16.mxu0 %v6579_v62  ;;  %v6583_v47 = vld [vmem:[%s8349_s24 + $0x150] sm:$0xff]  }
 0x3ac   :  { %5562 = vmatpush3.bf16.msra.mxu0 %v6580_v4 }
 0x3ad   :  { %5211 = vmatmul.mubr.msk.bf16.gmra.mrb[84].mxu1 %vm558_vm0, %v6576_v63 }
 0x3ae   :  { %2421 = vmatpush1.bf16.msra.mxu1 %v7531_v23  ;;  %2448 = vmatprep.mubr.bf16.mxu1 %v6681_v1  ;;  %v6581_v23 = vld [vmem:[%s8349_s24 + $0x148] sm:$0xff]  }
 0x3af   :  { %2422 = vmatprep.subr.bf16.mxu1 %v7539_v28  ;;  %5563 = vmatprep.subr.bf16.mxu0 %v6581_v23  ;;  %v6585_v28 = vld [vmem:[%s8349_s24 + $0x158] sm:$0xff]   ;;  %v2657_v23 = vld [vmem:[%s8319_s5 + $0x10] sm:$0xff] }
 0x3b2   :  { %2423 = vmatpush1.bf16.msra.mxu1 %v7537_v24  ;;  %v6584_v24 = vld [vmem:[%s8349_s24 + $0x110] sm:$0xff]  }
 0x3b3   :  { %5589 = vmatprep.subr.bf16.mxu1 %v6588_v45 }
 0x3b5   :  { %5266 = vmatmul.mubr.msk.bf16.vlgmr.msra.gmra.mrb[88].mxu1 %vm558_vm0, %v6577_v56 }
 0x3b6   :  { %2458 = vmatprep.mubr.bf16.mxu1 %v6681_v1  ;;  %v6582_v1 = vld [vmem:[%s8349_s24 + $0x108] sm:$0xff]   ;;  %5590 = vmatpush3.bf16.msra.mxu1 %v6590_v11 }
 0x3b7   :  { %5564 = vmatpush3.bf16.msra.mxu0 %v6582_v1  ;;  %5591 = vmatprep.subr.bf16.mxu1 %v6592_v19  ;;  %v2658_v1 = vld [vmem:[%s8319_s5 + $0x18] sm:$0xff] }
 0x3b8   :  { %5565 = vmatprep.subr.bf16.mxu0 %v6583_v47 }
 0x3ba   :  { %5592 = vmatpush3.bf16.msra.mxu1 %v6594_v50 }
 0x3bb   :  { %5566 = vmatpush3.bf16.msra.mxu0 %v6584_v24  ;;  %5593 = vmatprep.subr.bf16.mxu1 %v6596_v54 }
 0x3bc   :  { %5567 = vmatprep.subr.bf16.mxu0 %v6585_v28 }
 0x3bd   :  { %5267 = vmatmul.mubr.msk.bf16.gmra.mrb[92].mxu1 %vm558_vm0, %v6578_v32 }
 0x3be   :  { %5594 = vmatpush3.bf16.msra.mxu1 %v6598_v35 }
 0x3bf   :  { %5568 = vmatpush3.bf16.msra.mxu0 %v6586_v3  ;;  %5595 = vmatprep.subr.bf16.mxu1 %v6600_v52  ;;  %v6163_v3 = vpack.c.bf16 %v2658_v1, %v2657_v23 }
 0x3c0   :  { %5569 = vmatprep.subr.bf16.mxu0 %v6587_v20 }
 0x3c2   :  { %5596 = vmatpush3.bf16.msra.mxu1 %v6602_v57 }
 0x3c3   :  { %5570 = vmatpush3.bf16.msra.mxu0 %v6589_v49  ;;  %5597 = vmatprep.subr.bf16.mxu1 %v6603_v60 }
 0x3c4   :  { %5571 = vmatprep.subr.bf16.mxu0 %v6591_v16 }
 0x3c6   :  { %5598 = vmatpush3.bf16.msra.mxu1 %v6604_v61 }
 0x3c7   :  { %5572 = vmatpush3.bf16.msra.mxu0 %v6593_v36  ;;  %5599 = vmatprep.subr.bf16.mxu1 %v6605_v6  ;;  %v2659_v6 = vld [vmem:[%s8319_s5 + $0x20] sm:$0xff] }
 0x3c8   :  { %5573 = vmatprep.subr.bf16.mxu0 %v6595_v53 }
 0x3ca   :  { %5600 = vmatpush3.bf16.msra.mxu1 %v6606_v43  ;;  %v2660_v43 = vld [vmem:[%s8319_s5 + $0x28] sm:$0xff] }
 0x3cb   :  { %5574 = vmatpush3.bf16.msra.mxu0 %v6597_v27  ;;  %5601 = vmatprep.subr.bf16.mxu1 %v6607_v48  ;;  %v6167_v48 = vpack.c.bf16 %v2660_v43, %v2659_v6 }
 0x3cc   :  { %5575 = vmatprep.subr.bf16.mxu0 %v6599_v46 }
 0x3ce   :  { %5602 = vmatpush3.bf16.msra.mxu1 %v6608_v51  ;;  %v2661_v51 = vld [vmem:[%s8319_s5 + $0x30] sm:$0xff] }
 0x3cf   :  { %5576 = vmatpush3.bf16.msra.mxu0 %v6601_v55  ;;  %5603 = vmatprep.subr.bf16.mxu1 %v6609_v5  ;;  %v2662_v5 = vld [vmem:[%s8319_s5 + $0x38] sm:$0xff] }
 0x3d0   :  { %6160 = vmatprep.subr.bf16.mxu0 %v6159_v21 }
 0x3d2   :  { %5604 = vmatpush3.bf16.msra.mxu1 %v6610_v7  ;;  %v6171_v7 = vpack.c.bf16 %v2662_v5, %v2661_v51 }
 0x3d3   :  { %6192 = vmatprep.subr.bf16.mxu1 %v6159_v21 }
 0x448   :  { %v5521_v22 = vpop.f32.mrb[64].mxu1 }
 0x449   :  { %v5522_v25 = vpop.f32.mrb[65].mxu1 }
 0x44a   :  { %v5523_v33 = vadd.f32 %v5522_v25, %v5521_v22  ;;  %v5524_v37 = vpop.f32.mrb[66].mxu1  ;;  %v2665_v22 = vld [vmem:[%s8319_s5 + $0x50] sm:$0xff]  ;;  %v2666_v25 = vld [vmem:[%s8319_s5 + $0x58] sm:$0xff] }
 0x44b   :  { %v5525_v38 = vpop.f32.mrb[67].mxu1 }
 0x44c   :  { %v5526_v41 = vadd.f32 %v5525_v38, %v5524_v37  ;;  %v2667_v37 = vld [vmem:[%s8319_s5 + $0x60] sm:$0xff]  ;;  %v2668_v38 = vld [vmem:[%s8319_s5 + $0x68] sm:$0xff] }
 0x450   :  { %v5527_v14 = vpop.f32.mrb[68].mxu1 }
 0x451   :  { %v5528_v44 = vpop.f32.mrb[69].mxu1 }
 0x452   :  { %v5529_v30 = vadd.f32 %v5528_v44, %v5527_v14  ;;  %v5530_v39 = vpop.f32.mrb[70].mxu1  ;;  %v2669_v14 = vld [vmem:[%s8319_s5 + $0x70] sm:$0xff]  ;;  %v2670_v44 = vld [vmem:[%s8319_s5 + $0x78] sm:$0xff] }
 0x453   :  { %v5531_v58 = vpop.f32.mrb[71].mxu1 }
 0x454   :  { %v5532_v0 = vadd.f32 %v5531_v58, %v5530_v39 }
 0x468   :  { %v5549_v2 = vpop.f32.mrb[72].mxu1 }
 0x469   :  { %v5550_v10 = vpop.f32.mrb[73].mxu1 }
 0x46a   :  { %v5551_v8 = vadd.f32 %v5550_v10, %v5549_v2  ;;  %v5552_v12 = vpop.f32.mrb[74].mxu1 }
 0x46b   :  { %v5553_v13 = vpop.f32.mrb[75].mxu1 }
 0x46c   :  { %v7804_v15 = vadd.f32 %v5551_v8, %v5523_v33  ;;  %v5554_v18 = vadd.f32 %v5553_v13, %v5552_v12  ;;  %v6179_v33 = vpack.c.bf16 %v2666_v25, %v2665_v22 }
 0x46e   :  { %v7806_v26 = vadd.f32 %v5554_v18, %v5526_v41  ;;  %v6183_v41 = vpack.c.bf16 %v2668_v38, %v2667_v37 }
 0x470   :  { %v5555_v29 = vpop.f32.mrb[76].mxu1 }
 0x471   :  { %v5556_v31 = vpop.f32.mrb[77].mxu1 }
 0x472   :  { %v5557_v34 = vadd.f32 %v5556_v31, %v5555_v29  ;;  %v5558_v40 = vpop.f32.mrb[78].mxu1 }
 0x473   :  { %v5559_v42 = vpop.f32.mrb[79].mxu1 }
 0x474   :  { %v7808_v59 = vadd.f32 %v5557_v34, %v5529_v30  ;;  %v5560_v63 = vadd.f32 %v5559_v42, %v5558_v40  ;;  %v6187_v30 = vpack.c.bf16 %v2670_v44, %v2669_v14 }
 0x476   :  { %v7810_v56 = vadd.f32 %v5560_v63, %v5532_v0 }
 0x478   :  { %v2190_v32 = vpop.f32.mrb[80].mxu1 }
 0x479   :  { %v2192_v62 = vpop.f32.mrb[81].mxu1 }
 0x47a   :  { %v2194_v4 = vpop.f32.mrb[82].mxu1 }
 0x47b   :  { %v2209_v47 = vpack.c.bf16 %v2194_v4, %v2190_v32  ;;  %v2196_v24 = vpop.f32.mrb[83].mxu1 }
 0x47c   :  { %v2210_v28 = vpack.c.bf16 %v2196_v24, %v2192_v62 }
 0x47e   :  { %2374 = vmatprep.mubr.bf16.mxu0 %v2210_v28 }
 0x47f   :  { %2375 = vmatmul.mubr.bf16.vlgmr.msra.gmra.mrb[32].mxu0 %v2209_v47 }
 0x480   :  { %v2200_v20 = vpop.f32.mrb[84].mxu1  ;;  %6162 = vmatpush3.bf16.msra.mxu0 %v6159_v21 }
 0x481   :  { %v2202_v45 = vpop.f32.mrb[85].mxu1  ;;  %6164 = vmatprep.subr.bf16.mxu0 %v6163_v3 }
 0x482   :  { %v2204_v49 = vpop.f32.mrb[86].mxu1 }
 0x483   :  { %v2211_v11 = vpack.c.bf16 %v2204_v49, %v2200_v20  ;;  %v2206_v16 = vpop.f32.mrb[87].mxu1 }
 0x484   :  { %v2212_v19 = vpack.c.bf16 %v2206_v16, %v2202_v45  ;;  %6166 = vmatpush3.bf16.msra.mxu0 %v6163_v3 }
 0x485   :  { %6168 = vmatprep.subr.bf16.mxu0 %v6167_v48 }
 0x486   :  { %2382 = vmatprep.mubr.bf16.mxu0 %v2212_v19 }
 0x487   :  { %2383 = vmatmul.mubr.bf16.gmra.mrb[36].mxu0 %v2211_v11 }
 0x488   :  { %v2450_v36 = vpop.f32.mrb[88].mxu1  ;;  %6170 = vmatpush3.bf16.msra.mxu0 %v6167_v48 }
 0x489   :  { %v2452_v50 = vpop.f32.mrb[89].mxu1  ;;  %6172 = vmatprep.subr.bf16.mxu0 %v6171_v7 }
 0x48a   :  { %v2454_v53 = vpop.f32.mrb[90].mxu1 }
 0x48b   :  { %v2469_v54 = vpack.c.bf16 %v2454_v53, %v2450_v36  ;;  %v2456_v27 = vpop.f32.mrb[91].mxu1 }
 0x48c   :  { %v2470_v35 = vpack.c.bf16 %v2456_v27, %v2452_v50  ;;  %6174 = vmatpush3.bf16.msra.mxu0 %v6171_v7 }
 0x48e   :  { %2634 = vmatprep.mubr.bf16.mxu1 %v2470_v35 }
 0x48f   :  { %2635 = vmatmul.mubr.bf16.vlgmr.msra.gmra.mrb[96].mxu1 %v2469_v54 }
 0x490   :  { %v2460_v46 = vpop.f32.mrb[92].mxu1  ;;  %6194 = vmatpush3.bf16.msra.mxu1 %v6159_v21  ;;  %v6175_v21 = vpack.c.bf16 %v2664_v17, %v2663_v9  ;;  %v6682_v17 = vmov 0.0  }
 0x491   :  { %v2462_v52 = vpop.f32.mrb[93].mxu1  ;;  %6196 = vmatprep.subr.bf16.mxu1 %v6163_v3 }
 0x492   :  { %v2464_v55 = vpop.f32.mrb[94].mxu1  ;;  %6176 = vmatprep.subr.bf16.mxu0 %v6175_v21 }
 0x493   :  { %v2471_v57 = vpack.c.bf16 %v2464_v55, %v2460_v46  ;;  %v2466_v60 = vpop.f32.mrb[95].mxu1  ;;  %6178 = vmatpush3.bf16.msra.mxu0 %v6175_v21 }
 0x494   :  { %v2472_v61 = vpack.c.bf16 %v2466_v60, %v2462_v52  ;;  %6198 = vmatpush3.bf16.msra.mxu1 %v6163_v3  ;;  %6180 = vmatprep.subr.bf16.mxu0 %v6179_v33 }
 0x495   :  { %6200 = vmatprep.subr.bf16.mxu1 %v6167_v48 }
 0x496   :  { %2642 = vmatprep.mubr.bf16.mxu1 %v2472_v61 }
 0x497   :  { %2643 = vmatmul.mubr.bf16.gmra.mrb[100].mxu1 %v2471_v57  ;;  %6182 = vmatpush3.bf16.msra.mxu0 %v6179_v33 }
 0x498   :  { %6202 = vmatpush3.bf16.msra.mxu1 %v6167_v48  ;;  %6184 = vmatprep.subr.bf16.mxu0 %v6183_v41 }
 0x499   :  { %6204 = vmatprep.subr.bf16.mxu1 %v6171_v7 }
 0x49b   :  { %6186 = vmatpush3.bf16.msra.mxu0 %v6183_v41 }
 0x49c   :  { %6206 = vmatpush3.bf16.msra.mxu1 %v6171_v7  ;;  %6188 = vmatprep.subr.bf16.mxu0 %v6187_v30 }
 0x49d   :  { %6208 = vmatprep.subr.bf16.mxu1 %v6175_v21 }
 0x49f   :  { %6190 = vmatpush3.bf16.msra.mxu0 %v6187_v30 }
 0x4a0   :  { %6210 = vmatpush3.bf16.msra.mxu1 %v6175_v21  ;;  %5867 = vmatprep.subr.bf16.mxu0 %v6682_v17 }
 0x4a1   :  { %6212 = vmatprep.subr.bf16.mxu1 %v6179_v33 }
 0x4a4   :  { %6214 = vmatpush3.bf16.msra.mxu1 %v6179_v33 }
 0x4a5   :  { %6216 = vmatprep.subr.bf16.mxu1 %v6183_v41 }
 0x4a8   :  { %6218 = vmatpush3.bf16.msra.mxu1 %v6183_v41 }
 0x4a9   :  { %6220 = vmatprep.subr.bf16.mxu1 %v6187_v30 }
 0x4ac   :  { %6222 = vmatpush3.bf16.msra.mxu1 %v6187_v30 }
 0x4ad   :  { %5859 = vmatprep.subr.bf16.mxu1 %v6682_v17 }
 0x552   :  { %v5577_v39 = vpop.f32.mrb[32].mxu0 }
 0x553   :  { %v5578_v58 = vpop.f32.mrb[33].mxu0 }
 0x554   :  { %v5579_v0 = vadd.f32 %v5578_v58, %v5577_v39  ;;  %v5580_v2 = vpop.f32.mrb[34].mxu0 }
 0x555   :  { %v5581_v10 = vpop.f32.mrb[35].mxu0 }
 0x556   :  { %v2391_v8 = vadd.f32 %v5579_v0, %v7804_v15  ;;  %v5582_v12 = vadd.f32 %v5581_v10, %v5580_v2 }
 0x558   :  { %v2392_v13 = vadd.f32 %v5582_v12, %v7806_v26 }
 0x55a   :  { %v5583_v18 = vpop.f32.mrb[36].mxu0 }
 0x55b   :  { %v5584_v29 = vpop.f32.mrb[37].mxu0 }
 0x55c   :  { %v5585_v31 = vadd.f32 %v5584_v29, %v5583_v18  ;;  %v5586_v34 = vpop.f32.mrb[38].mxu0 }
 0x55d   :  { %v5587_v40 = vpop.f32.mrb[39].mxu0 }
 0x55e   :  { %v2393_v42 = vadd.f32 %v5585_v31, %v7808_v59  ;;  %v5588_v63 = vadd.f32 %v5587_v40, %v5586_v34  ;;  %v5317_v31 = vld [vmem:[%s8323_s7] ss:$0 sm:$0xff] }
 0x560   :  { %v2394_v32 = vadd.f32 %v5588_v63, %v7810_v56 }
 0x562   :  { %v5605_v62 = vpop.f32.mrb[96].mxu1 }
 0x563   :  { %v5606_v4 = vpop.f32.mrb[97].mxu1 }
 0x564   :  { %v5607_v23 = vadd.f32 %v5606_v4, %v5605_v62  ;;  %v5608_v1 = vpop.f32.mrb[98].mxu1 }
 0x565   :  { %v5609_v47 = vpop.f32.mrb[99].mxu1 }
 0x566   :  { %v2651_v24 = vadd.f32 %v5607_v23, %v2391_v8  ;;  %v5610_v15 = vadd.f32 %v5609_v47, %v5608_v1  ;;  %v5316_v8 = vld [vmem:[%s8322_s6] ss:$0 sm:$0xff] }
 0x568   :  { %v2652_v28 = vadd.f32 %v5610_v15, %v2392_v13  ;;  %5815 = vmatprep.mubr.f32.mxu0 %v2651_v24 }
 0x56a   :  { %v5611_v26 = vpop.f32.mrb[100].mxu1  ;;  %5816 = vmatmul.mubr.f32.vlgmr.msra.gmra.mrb[40].mxu0 %v2652_v28 }
 0x56b   :  { %v5612_v3 = vpop.f32.mrb[101].mxu1 }
 0x56c   :  { %v5613_v20 = vadd.f32 %v5612_v3, %v5611_v26  ;;  %v5614_v45 = vpop.f32.mrb[102].mxu1 }
 0x56d   :  { %v5615_v49 = vpop.f32.mrb[103].mxu1 }
 0x56e   :  { %v2653_v11 = vadd.f32 %v5613_v20, %v2393_v42  ;;  %v5616_v59 = vadd.f32 %v5615_v49, %v5614_v45 }
 0x570   :  { %v2654_v16 = vadd.f32 %v5616_v59, %v2394_v32  ;;  %5818 = vmatprep.mubr.f32.mxu0 %v2653_v11  ;;  %v6612_v59 = vld [vmem:[%s8320_s8] sm:$0xff]  }
 0x572   :  { %5819 = vmatmul.mubr.f32.gmra.mrb[42].mxu0 %v2654_v16 }
 0x573   :  { %5871 = vmatprep.mubr.msk.bf16.mxu0 %vm6683_vm2, %v6682_v17 }
 0x63d   :  { %v5817_v56 = vpop.f32.mrb[40].mxu0 }
 0x63e   :  { %v2737_v19 = vpop.f32.mrb[41].mxu0 }
 0x63f   :  { %v2756_v36 = vadd.f32 %v5817_v56, %v2737_v19  ;;  %v6616_v56 = vld [vmem:[%s8321_s9 + $0x48] sm:$0xff]   ;;  %v6613_v19 = vld [vmem:[%s8320_s8 + $0x10] sm:$0xff]  }
 0x645   :  { %v5820_v50 = vpop.f32.mrb[42].mxu0 }
 0x646   :  { %v2747_v53 = vpop.f32.mrb[43].mxu0 }
 0x647   :  { %v2757_v54 = vadd.f32 %v2756_v36, %v2747_v53  ;;  %v6617_v36 = vld [vmem:[%s8321_s9 + $0x50] sm:$0xff]   ;;  %v6614_v53 = vld [vmem:[%s8320_s8 + $0x18] sm:$0xff]  }
 0x649   :  { %v2758_v27 = vadd.f32 %v5820_v50, %v2757_v54  ;;  %v6618_v50 = vld [vmem:[%s8321_s9 + $0x58] sm:$0xff]   ;;  %v6619_v54 = vld [vmem:[%s8321_s9 + $0x60] sm:$0xff]  }
 0x64b   :  { %v2759_v35 = vrot.slane %v2758_v27, 4 }
 0x64d   :  { %v2760_v46 = vadd.f32 %v2759_v35, %v2758_v27  ;;  %v6620_v27 = vld [vmem:[%s8321_s9 + $0x68] sm:$0xff]   ;;  %v6621_v35 = vld [vmem:[%s8321_s9 + $0x70] sm:$0xff]  }
 0x64f   :  { %v2761_v52 = vrot.slane %v2760_v46, 2 }
 0x651   :  { %v2762_v55 = vadd.f32 %v2761_v52, %v2760_v46  ;;  %v6622_v46 = vld [vmem:[%s8321_s9 + $0x78] sm:$0xff]   ;;  %v3548_v52 = vld [vmem:[%s8324_s10] sm:$0xff] }
 0x653   :  { %v2763_v57 = vrot.slane %v2762_v55, 1 }
 0x655   :  { %v2764_v60 = vadd.f32 %v2763_v57, %v2762_v55  ;;  %v3549_v55 = vld [vmem:[%s8324_s10 + $0x8] sm:$0xff]  ;;  %v3550_v57 = vld [vmem:[%s8324_s10 + $0x10] sm:$0xff] }
 0x657   :  { %v2765_v61 = vsub.f32 %v2651_v24, %v2764_v60  ;;  %v2766_v6 = vsub.f32 %v2652_v28, %v2764_v60  ;;  %v2767_v43 = vsub.f32 %v2653_v11, %v2764_v60  ;;  %v2768_v5 = vsub.f32 %v2654_v16, %v2764_v60  ;;  %v6611_v11 = vld [vmem:[%s8320_s8 + $0x8] sm:$0xff]   ;;  %v6615_v16 = vld [vmem:[%s8321_s9 + $0x40] sm:$0xff]  }
 0x658   :  { %v7940_v60 = vpack.c.bf16 %v3549_v55, %v3548_v52 }
 0x659   :  { %v2769_v48 = vmul.f32 %v2765_v61, %v2765_v61  ;;  %v2770_v51 = vmul.f32 %v2766_v6, %v2766_v6  ;;  %v2771_v7 = vmul.f32 %v2767_v43, %v2767_v43  ;;  %v2772_v9 = vmul.f32 %v2768_v5, %v2768_v5 }
 0x65b   :  { %5853 = vmatprep.mubr.f32.mxu1 %v2769_v48  ;;  %v3553_v48 = vld [vmem:[%s8324_s10 + $0x28] sm:$0xff] }
 0x65c   :  { %5854 = vmatmul.mubr.f32.vlgmr.msra.gmra.mrb[104].mxu1 %v2770_v51 }
 0x65d   :  { %5856 = vmatprep.mubr.f32.mxu1 %v2771_v7  ;;  %v3555_v7 = vld [vmem:[%s8324_s10 + $0x38] sm:$0xff] }
 0x660   :  { %5857 = vmatmul.mubr.f32.gmra.mrb[106].mxu1 %v2772_v9 }
 0x661   :  { %5863 = vmatprep.mubr.msk.bf16.mxu1 %vm6683_vm2, %v6682_v17 }
 0x72f   :  { %v5855_v21 = vpop.f32.mrb[104].mxu1 }
 0x730   :  { %v2839_v22 = vpop.f32.mrb[105].mxu1 }
 0x731   :  { %v2858_v25 = vadd.f32 %v5855_v21, %v2839_v22 }
 0x733   :  { %v5858_v33 = vpop.f32.mrb[106].mxu1 }
 0x734   :  { %v2849_v37 = vpop.f32.mrb[107].mxu1 }
 0x735   :  { %v2859_v38 = vadd.f32 %v2858_v25, %v2849_v37 }
 0x737   :  { %v2860_v41 = vadd.f32 %v5858_v33, %v2859_v38  ;;  %v6623_v38 = vld [vmem:[%s8321_s9] sm:$0xff]  }
 0x739   :  { %v2861_v14 = vrot.slane %v2860_v41, 4 }
 0x73b   :  { %v2862_v44 = vadd.f32 %v2861_v14, %v2860_v41 }
 0x73d   :  { %v2863_v30 = vrot.slane %v2862_v44, 2 }
 0x73f   :  { %v2864_v39 = vadd.f32 %v2863_v30, %v2862_v44 }
 0x741   :  { %v2865_v58 = vrot.slane %v2864_v39, 1 }
 0x743   :  { %v2866_v0 = vadd.f32 %v2865_v58, %v2864_v39  ;;  %v6624_v58 = vld [vmem:[%s8321_s9 + $0x8] sm:$0xff]  }
 0x745   :  { %v2867_v2 = vadd.f32 1e-05, %v2866_v0 }
 0x747   :  { %6671 = vrsqrt.f32 %v2867_v2 }
 0x751   :  { %v6672_v10 = vpop.eup %6671 }
 0x752   :  { %v2869_v12 = vmul.f32 %v6672_v10, %v2765_v61  ;;  %v2870_v13 = vmul.f32 %v6672_v10, %v2766_v6  ;;  %v2871_v18 = vmul.f32 %v6672_v10, %v2767_v43  ;;  %v2872_v29 = vmul.f32 %v6672_v10, %v2768_v5  ;;  %v3551_v61 = vld [vmem:[%s8324_s10 + $0x18] sm:$0xff]  ;;  %v3552_v43 = vld [vmem:[%s8324_s10 + $0x20] sm:$0xff]  ;;  %v3554_v5 = vld [vmem:[%s8324_s10 + $0x30] sm:$0xff] }
 0x753   :  { %v7945_v6 = vpack.c.bf16 %v3551_v61, %v3550_v57  ;;  %v7956_v51 = vpack.c.bf16 %v3553_v48, %v3552_v43  ;;  %v7966_v9 = vpack.c.bf16 %v3555_v7, %v3554_v5  ;;  %v6625_v10 = vld [vmem:[%s8321_s9 + $0x10] sm:$0xff]  }
 0x754   :  { %v2880_v34 = vmul.f32 %v5316_v8, %v2869_v12  ;;  %v2881_v40 = vmul.f32 %v5316_v8, %v2870_v13  ;;  %v2882_v42 = vmul.f32 %v5316_v8, %v2871_v18  ;;  %v2883_v63 = vmul.f32 %v5316_v8, %v2872_v29  ;;  %v6626_v18 = vld [vmem:[%s8321_s9 + $0x18] sm:$0xff]  }
 0x756   :  { %v2891_v32 = vadd.f32 %v5317_v31, %v2880_v34  ;;  %v2892_v62 = vadd.f32 %v5317_v31, %v2881_v40  ;;  %v2893_v4 = vadd.f32 %v5317_v31, %v2882_v42  ;;  %v2894_v23 = vadd.f32 %v5317_v31, %v2883_v63  ;;  %v6627_v34 = vld [vmem:[%s8321_s9 + $0x20] sm:$0xff]  }
 0x758   :  { %vm2895_vm3 = vcmp.ge.f32.partialorder %v2891_v32, 0.0  ;;  %vm2896_vm4 = vcmp.ge.f32.partialorder %v2892_v62, 0.0  ;;  %v2899_v1 = vmul.f32 0.2, %v2891_v32  ;;  %v2900_v47 = vmul.f32 0.2, %v2892_v62 }
 0x759   :  { %vm2897_vm5 = vcmp.ge.f32.partialorder %v2893_v4, 0.0  ;;  %vm2898_vm6 = vcmp.ge.f32.partialorder %v2894_v23, 0.0  ;;  %v2901_v24 = vmul.f32 0.2, %v2893_v4  ;;  %v2902_v15 = vmul.f32 0.2, %v2894_v23 }
 0x75a   :  { %v2903_v28 = vsel %vm2895_vm3, %v2891_v32, %v2899_v1  ;;  %v2904_v26 = vsel %vm2896_vm4, %v2892_v62, %v2900_v47  ;;  %v6628_v32 = vld [vmem:[%s8321_s9 + $0x28] sm:$0xff]   ;;  %v6629_v62 = vld [vmem:[%s8321_s9 + $0x30] sm:$0xff]  }
 0x75b   :  { %v2907_v3 = vpack.c.bf16 %v2904_v26, %v2903_v28  ;;  %v2905_v20 = vsel %vm2897_vm5, %v2893_v4, %v2901_v24  ;;  %v2906_v45 = vsel %vm2898_vm6, %v2894_v23, %v2902_v15  ;;  %v6630_v4 = vld [vmem:[%s8321_s9 + $0x38] sm:$0xff]   ;;  %v6631_v23 = vld [vmem:[%s8321_s9 + $0x80] sm:$0xff]   ;;  %v6632_v1 = vld [vmem:[%s8321_s9 + $0x88] sm:$0xff]  }
 0x75c   :  { %v2908_v49 = vpack.c.bf16 %v2906_v45, %v2905_v20  ;;  %v6633_v47 = vld [vmem:[%s8321_s9 + $0x90] sm:$0xff]   ;;  %v6634_v24 = vld [vmem:[%s8321_s9 + $0x98] sm:$0xff]   ;;  %v6635_v15 = vld [vmem:[%s8321_s9 + $0xa0] sm:$0xff]  }
 0x75d   :  { %5860 = vmatpush3.bf16.msra.mxu1 %v2907_v3  ;;  %5868 = vmatpush3.bf16.msra.mxu0 %v2907_v3  ;;  %v6636_v28 = vld [vmem:[%s8321_s9 + $0xa8] sm:$0xff]   ;;  %v6637_v26 = vld [vmem:[%s8321_s9 + $0xb0] sm:$0xff]   ;;  %v6639_v20 = vld [vmem:[%s8321_s9 + $0xc0] sm:$0xff]  }
 0x75e   :  { %5861 = vmatprep.subr.bf16.mxu1 %v6682_v17  ;;  %5869 = vmatprep.subr.bf16.mxu0 %v6682_v17  ;;  %v6640_v45 = vld [vmem:[%s8321_s9 + $0xc8] sm:$0xff]  }
 0x761   :  { %5862 = vmatpush3.bf16.msra.mxu1 %v2908_v49  ;;  %5870 = vmatpush3.bf16.msra.mxu0 %v2908_v49 }
 0x762   :  { %5915 = vmatprep.subr.bf16.mxu1 %v6682_v17  ;;  %5875 = vmatprep.subr.bf16.mxu0 %v6682_v17 }
 0x764   :  { %5872 = vmatmul.mubr.msk.bf16.vlgmr.msra.gmra.mrb[44].mxu0 %vm2916_vm7, %v6611_v11  ;;  %5864 = vmatmul.mubr.msk.bf16.vlgmr.msra.gmra.mrb[108].mxu1 %vm2916_vm7, %v6612_v59  ;;  %v6642_v11 = vld [vmem:[%s8321_s9 + $0xd8] sm:$0xff]   ;;  %v6643_v59 = vld [vmem:[%s8321_s9 + $0xe0] sm:$0xff]  }
 0x765   :  { %5916 = vmatpush3.bf16.msra.mxu1 %v2907_v3  ;;  %5919 = vmatprep.mubr.msk.bf16.mxu1 %vm6683_vm2, %v6682_v17 }
 0x766   :  { %5917 = vmatprep.subr.bf16.mxu1 %v6682_v17  ;;  %5876 = vmatpush3.bf16.msra.mxu0 %v6615_v16  ;;  %v6644_v16 = vld [vmem:[%s8321_s9 + $0xe8] sm:$0xff]  }
 0x767   :  { %5877 = vmatprep.subr.bf16.mxu0 %v6682_v17  ;;  %5891 = vmatprep.mubr.msk.bf16.mxu0 %vm6683_vm2, %v6682_v17 }
 0x769   :  { %5918 = vmatpush3.bf16.msra.mxu1 %v2908_v49 }
 0x76a   :  { %5943 = vmatprep.subr.bf16.mxu1 %v6682_v17  ;;  %5878 = vmatpush3.bf16.msra.mxu0 %v6616_v56  ;;  %v6645_v56 = vld [vmem:[%s8321_s9 + $0xf0] sm:$0xff]  }
 0x76b   :  { %5879 = vmatprep.subr.bf16.mxu0 %v6682_v17 }
 0x76c   :  { %5920 = vmatmul.mubr.msk.bf16.vlgmr.msra.gmra.mrb[112].mxu1 %vm2916_vm7, %v6613_v19  ;;  %v6646_v19 = vld [vmem:[%s8321_s9 + $0xf8] sm:$0xff]  }
 0x76d   :  { %5944 = vmatpush3.bf16.msra.mxu1 %v2907_v3  ;;  %5947 = vmatprep.mubr.msk.bf16.mxu1 %vm6683_vm2, %v6682_v17  ;;  %v6638_v3 = vld [vmem:[%s8321_s9 + $0xb8] sm:$0xff]  }
 0x76e   :  { %5945 = vmatprep.subr.bf16.mxu1 %v6682_v17  ;;  %5880 = vmatpush3.bf16.msra.mxu0 %v6617_v36 }
 0x76f   :  { %5881 = vmatprep.subr.bf16.mxu0 %v6682_v17 }
 0x771   :  { %5946 = vmatpush3.bf16.msra.mxu1 %v2908_v49  ;;  %v6641_v49 = vld [vmem:[%s8321_s9 + $0xd0] sm:$0xff]  }
 0x772   :  { %5882 = vmatpush3.bf16.msra.mxu0 %v6618_v50  ;;  %6224 = vmatprep.subr.bf16.mxu1 %v7940_v60 }
 0x773   :  { %5883 = vmatprep.subr.bf16.mxu0 %v6682_v17 }
 0x774   :  { %5948 = vmatmul.mubr.msk.bf16.vlgmr.msra.gmra.mrb[116].mxu1 %vm2916_vm7, %v6614_v53 }
 0x775   :  { %6226 = vmatpush3.bf16.msra.mxu1 %v7940_v60 }
 0x776   :  { %5884 = vmatpush3.bf16.msra.mxu0 %v6619_v54  ;;  %6228 = vmatprep.subr.bf16.mxu1 %v7945_v6 }
 0x777   :  { %5885 = vmatprep.subr.bf16.mxu0 %v6682_v17 }
 0x779   :  { %6230 = vmatpush3.bf16.msra.mxu1 %v7945_v6 }
 0x77a   :  { %5886 = vmatpush3.bf16.msra.mxu0 %v6620_v27  ;;  %6232 = vmatprep.subr.bf16.mxu1 %v7956_v51 }
 0x77b   :  { %5887 = vmatprep.subr.bf16.mxu0 %v6682_v17 }
 0x77d   :  { %6234 = vmatpush3.bf16.msra.mxu1 %v7956_v51 }
 0x77e   :  { %5888 = vmatpush3.bf16.msra.mxu0 %v6621_v35  ;;  %6236 = vmatprep.subr.bf16.mxu1 %v7966_v9 }
 0x77f   :  { %5889 = vmatprep.subr.bf16.mxu0 %v6682_v17 }
 0x781   :  { %6238 = vmatpush3.bf16.msra.mxu1 %v7966_v9 }
 0x782   :  { %5890 = vmatpush3.bf16.msra.mxu0 %v6622_v46  ;;  %6240 = vmatprep.subr.bf16.mxu1 %v7940_v60 }
 0x783   :  { %5895 = vmatprep.subr.bf16.mxu0 %v6682_v17 }
 0x837   :  { %v3023_v21 = vpop.f32.mrb[44].mxu0  ;;  %v2954_v22 = vpop.f32.mrb[108].mxu1 }
 0x838   :  { %v5873_v25 = vpop.f32.mrb[45].mxu0  ;;  %v5865_v33 = vpop.f32.mrb[109].mxu1 }
 0x839   :  { %v3026_v37 = vpop.f32.mrb[46].mxu0  ;;  %v2957_v41 = vpop.f32.mrb[110].mxu1 }
 0x83a   :  { %v3030_v14 = vpack.c.bf16 %v3026_v37, %v3023_v21  ;;  %v5874_v44 = vpop.f32.mrb[47].mxu0  ;;  %v2961_v30 = vpack.c.bf16 %v2957_v41, %v2954_v22  ;;  %v5866_v39 = vpop.f32.mrb[111].mxu1 }
 0x83c   :  { %5892 = vmatmul.mubr.bf16.vlgmr.msra.gmra.mrb[48].mxu0 %v3030_v14 }
 0x83d   :  { %5896 = vmatpush3.bf16.msra.mxu0 %v6623_v38  ;;  %5911 = vmatprep.mubr.msk.bf16.mxu0 %vm6683_vm2, %v6682_v17 }
 0x83e   :  { %5897 = vmatprep.subr.bf16.mxu0 %v6682_v17 }
 0x83f   :  { %v3271_v0 = vpop.f32.mrb[112].mxu1 }
 0x840   :  { %v5921_v2 = vpop.f32.mrb[113].mxu1 }
 0x841   :  { %5898 = vmatpush3.bf16.msra.mxu0 %v6624_v58  ;;  %v3274_v8 = vpop.f32.mrb[114].mxu1  ;;  %v5416_v2 = vld [vmem:[%s8326_s11] ss:$0 sm:$0xff] }
 0x842   :  { %5899 = vmatprep.subr.bf16.mxu0 %v6682_v17  ;;  %v3278_v12 = vpack.c.bf16 %v3274_v8, %v3271_v0  ;;  %v5922_v13 = vpop.f32.mrb[115].mxu1 }
 0x845   :  { %5900 = vmatpush3.bf16.msra.mxu0 %v6625_v10 }
 0x846   :  { %5901 = vmatprep.subr.bf16.mxu0 %v6682_v17 }
 0x847   :  { %v7989_v29 = vpop.f32.mrb[116].mxu1 }
 0x848   :  { %v5949_v31 = vpop.f32.mrb[117].mxu1 }
 0x849   :  { %5902 = vmatpush3.bf16.msra.mxu0 %v6626_v18  ;;  %v7994_v40 = vpop.f32.mrb[118].mxu1 }
 0x84a   :  { %5903 = vmatprep.subr.bf16.mxu0 %v6682_v17  ;;  %v3439_v42 = vpack.c.bf16 %v7994_v40, %v7989_v29  ;;  %v5950_v63 = vpop.f32.mrb[119].mxu1 }
 0x84d   :  { %5904 = vmatpush3.bf16.msra.mxu0 %v6627_v34 }
 0x84e   :  { %5905 = vmatprep.subr.bf16.mxu0 %v6682_v17 }
 0x851   :  { %5906 = vmatpush3.bf16.msra.mxu0 %v6628_v32 }
 0x852   :  { %5907 = vmatprep.subr.bf16.mxu0 %v6682_v17 }
 0x855   :  { %5908 = vmatpush3.bf16.msra.mxu0 %v6629_v62  ;;  %v3769_v62 = vld [vmem:[%s8328_s13] sm:$0xf] }
 0x856   :  { %5909 = vmatprep.subr.bf16.mxu0 %v6682_v17 }
 0x859   :  { %5910 = vmatpush3.bf16.msra.mxu0 %v6630_v4  ;;  %v5419_v4 = vld [vmem:[%s8328_s13 + $0x4] sm:$0xf] }
 0x85a   :  { %5923 = vmatprep.subr.bf16.mxu0 %v6682_v17 }
 0x85c   :  { %5912 = vmatmul.mubr.bf16.vlgmr.msra.gmra.mrb[48].mxu0 %v2961_v30 }
 0x85d   :  { %5924 = vmatpush3.bf16.msra.mxu0 %v6631_v23  ;;  %5939 = vmatprep.mubr.msk.bf16.mxu0 %vm6683_vm2, %v6682_v17  ;;  %v6647_v23 = vld [vmem:[%s8325_s14 + $0x20] sm:$0xff]  }
 0x85e   :  { %5925 = vmatprep.subr.bf16.mxu0 %v6682_v17 }
 0x861   :  { %5926 = vmatpush3.bf16.msra.mxu0 %v6632_v1  ;;  %v6648_v1 = vld [vmem:[%s8325_s14 + $0x28] sm:$0xff]  }
 0x862   :  { %5927 = vmatprep.subr.bf16.mxu0 %v6682_v17 }
 0x865   :  { %5928 = vmatpush3.bf16.msra.mxu0 %v6633_v47  ;;  %v6649_v47 = vld [vmem:[%s8325_s14 + $0x30] sm:$0xff]  }
 0x866   :  { %5929 = vmatprep.subr.bf16.mxu0 %v6682_v17 }
 0x869   :  { %5930 = vmatpush3.bf16.msra.mxu0 %v6634_v24  ;;  %v6650_v24 = vld [vmem:[%s8325_s14 + $0x38] sm:$0xff]  }
 0x86a   :  { %5931 = vmatprep.subr.bf16.mxu0 %v6682_v17 }
 0x86d   :  { %5932 = vmatpush3.bf16.msra.mxu0 %v6635_v15 }
 0x86e   :  { %5933 = vmatprep.subr.bf16.mxu0 %v6682_v17 }
 0x871   :  { %5934 = vmatpush3.bf16.msra.mxu0 %v6636_v28 }
 0x872   :  { %5935 = vmatprep.subr.bf16.mxu0 %v6682_v17 }
 0x875   :  { %5936 = vmatpush3.bf16.msra.mxu0 %v6637_v26 }
 0x876   :  { %5937 = vmatprep.subr.bf16.mxu0 %v6682_v17 }
 0x879   :  { %5938 = vmatpush3.bf16.msra.mxu0 %v6638_v3 }
 0x87a   :  { %5951 = vmatprep.subr.bf16.mxu0 %v6682_v17 }
 0x87c   :  { %5940 = vmatmul.mubr.bf16.vlgmr.msra.gmra.mrb[48].mxu0 %v3278_v12  ;;  %v5417_v12 = vld [vmem:[%s8327_s12] ss:$0 sm:$0xff] }
 0x87d   :  { %5952 = vmatpush3.bf16.msra.mxu0 %v6639_v20  ;;  %5967 = vmatprep.mubr.msk.bf16.mxu0 %vm6683_vm2, %v6682_v17 }
 0x87e   :  { %5953 = vmatprep.subr.bf16.mxu0 %v6682_v17 }
 0x881   :  { %5954 = vmatpush3.bf16.msra.mxu0 %v6640_v45  ;;  %v6651_v45 = vld [vmem:[%s8325_s14] sm:$0xff]  }
 0x882   :  { %5955 = vmatprep.subr.bf16.mxu0 %v6682_v17 }
 0x885   :  { %5956 = vmatpush3.bf16.msra.mxu0 %v6641_v49 }
 0x886   :  { %5957 = vmatprep.subr.bf16.mxu0 %v6682_v17 }
 0x889   :  { %5958 = vmatpush3.bf16.msra.mxu0 %v6642_v11 }
 0x88a   :  { %5959 = vmatprep.subr.bf16.mxu0 %v6682_v17 }
 0x88d   :  { %5960 = vmatpush3.bf16.msra.mxu0 %v6643_v59 }
 0x88e   :  { %5961 = vmatprep.subr.bf16.mxu0 %v6682_v17 }
 0x891   :  { %5962 = vmatpush3.bf16.msra.mxu0 %v6644_v16 }
 0x892   :  { %5963 = vmatprep.subr.bf16.mxu0 %v6682_v17 }
 0x895   :  { %5964 = vmatpush3.bf16.msra.mxu0 %v6645_v56  ;;  %v6652_v56 = vld [vmem:[%s8325_s14 + $0x8] sm:$0xff]  }
 0x896   :  { %5965 = vmatprep.subr.bf16.mxu0 %v6682_v17 }
 0x899   :  { %5966 = vmatpush3.bf16.msra.mxu0 %v6646_v19  ;;  %v6653_v19 = vld [vmem:[%s8325_s14 + $0x10] sm:$0xff]  }
 0x89c   :  { %5968 = vmatmul.mubr.bf16.vlgmr.msra.gmra.mrb[48].mxu0 %v3439_v42 }
 0x89d   :  { %6089 = vmatprep.mubr.msk.f32.mxu0 %vm6683_vm2, %v6682_v17 }
 0x96f   :  { %v3539_v36 = vpop.f32.mrb[48].mxu0 }
 0x970   :  { %v5969_v50 = vpop.f32.mrb[49].mxu0  ;;  %5987 = vmatprep.mubr.msk.f32.mxu1 %vm558_vm0, %v3539_v36 }
 0x971   :  { %v3542_v53 = vpop.f32.mrb[50].mxu0 }
 0x972   :  { %v5970_v54 = vpop.f32.mrb[51].mxu0  ;;  %5988 = vmatmul.mubr.msk.f32.vlgmr.msra.gmra.mrb[120].mxu1 %vm558_vm0, %v3542_v53 }
 0x973   :  { %6242 = vmatpush3.bf16.msra.mxu1 %v7940_v60  ;;  %v6655_v54 = vld [vmem:[%s8325_s14 + $0x40] sm:$0xff]  }
 0x974   :  { %6244 = vmatprep.subr.bf16.mxu1 %v7945_v6 }
 0x977   :  { %6246 = vmatpush3.bf16.msra.mxu1 %v7945_v6 }
 0x978   :  { %6248 = vmatprep.subr.bf16.mxu1 %v7956_v51 }
 0x97b   :  { %6250 = vmatpush3.bf16.msra.mxu1 %v7956_v51 }
 0x97c   :  { %6252 = vmatprep.subr.bf16.mxu1 %v7966_v9 }
 0x97f   :  { %6254 = vmatpush3.bf16.msra.mxu1 %v7966_v9 }
 0x980   :  { %6009 = vmatprep.subr.bf16.mxu1 %v6682_v17 }
 0xa45   :  { %v5989_v27 = vpop.f32.mrb[120].mxu1 }
 0xa46   :  { %v3638_v35 = vsel %vm558_vm0, %v5989_v27, 0.0  ;;  %v3628_v46 = vpop.f32.mrb[121].mxu1  ;;  %v6656_v27 = vld [vmem:[%s8325_s14 + $0x48] sm:$0xff]  }
 0xa47   :  { %v3637_v52 = vsel %vm558_vm0, %v3628_v46, 0.0  ;;  %v6658_v46 = vld [vmem:[%s8325_s14 + $0x58] sm:$0xff]  }
 0xa48   :  { %v3639_v55 = vadd.f32 %v3638_v35, %v3637_v52  ;;  %v6657_v35 = vld [vmem:[%s8325_s14 + $0x50] sm:$0xff]  }
 0xa4a   :  { %v3640_v57 = vrot.slane %v3639_v55, 4 }
 0xa4c   :  { %v3641_v60 = vadd.f32 %v3640_v57, %v3639_v55 }
 0xa4e   :  { %v3642_v61 = vrot.slane %v3641_v60, 2 }
 0xa50   :  { %v3643_v6 = vadd.f32 %v3642_v61, %v3641_v60 }
 0xa52   :  { %v3644_v43 = vrot.slane %v3643_v6, 1 }
 0xa54   :  { %v3645_v48 = vadd.f32 %v3644_v43, %v3643_v6  ;;  %v5454_v6 = vld [vmem:[%s8328_s13 + $0xc] sm:$0xf]  ;;  %v6659_v43 = vld [vmem:[%s8325_s14 + $0x60] sm:$0xff]  }
 0xa56   :  { %v3647_v51 = vsub.f32 %v3542_v53, %v3645_v48  ;;  %v3646_v5 = vsub.f32 %v3539_v36, %v3645_v48  ;;  %v6654_v36 = vld [vmem:[%s8325_s14 + $0x18] sm:$0xff]   ;;  %v5439_v53 = vld [vmem:[%s8328_s13 + $0x8] sm:$0xf] }
 0xa57   :  { %v6660_v48 = vld [vmem:[%s8325_s14 + $0x68] sm:$0xff]  }
 0xa58   :  { %v3649_v7 = vmul.f32 %v3647_v51, %v3647_v51  ;;  %v3648_v21 = vmul.f32 %v3646_v5, %v3646_v5 }
 0xa5a   :  { %6006 = vmatprep.mubr.msk.f32.mxu1 %vm558_vm0, %v3648_v21  ;;  %v4258_v21 = vld [vmem:[%s8329_s15] sm:$0xff] }
 0xa5b   :  { %6007 = vmatmul.mubr.msk.f32.vlgmr.msra.gmra.mrb[122].mxu1 %vm558_vm0, %v3649_v7  ;;  %v6684_v7 = vmov 0.0|0.0  }
 0xa5c   :  { %6011 = vmatprep.mubr.msk.bf16.mxu1 %vm6683_vm2, %v6682_v17  ;;  %6255 = vmatprep.subr.bf16.mxu0 %v6684_v7 }
 0xb2e   :  { %v6008_v9 = vpop.f32.mrb[122].mxu1 }
 0xb2f   :  { %v3732_v22 = vsel %vm558_vm0, %v6008_v9, 0.0  ;;  %v3722_v25 = vpop.f32.mrb[123].mxu1  ;;  %v4259_v9 = vld [vmem:[%s8329_s15 + $0x8] sm:$0xff] }
 0xb30   :  { %v3731_v33 = vsel %vm558_vm0, %v3722_v25, 0.0  ;;  %v6256_v25 = vpack.c.bf16 %v4259_v9, %v4258_v21 }
 0xb31   :  { %v3733_v37 = vadd.f32 %v3732_v22, %v3731_v33  ;;  %v4260_v22 = vld [vmem:[%s8329_s15 + $0x10] sm:$0xff]  ;;  %v4261_v33 = vld [vmem:[%s8329_s15 + $0x18] sm:$0xff] }
 0xb32   :  { %6257 = vmatpush3.bf16.msra.mxu0 %v6256_v25 }
 0xb33   :  { %v3734_v38 = vrot.slane %v3733_v37, 4  ;;  %6258 = vmatprep.subr.bf16.mxu0 %v6684_v7 }
 0xb35   :  { %v3735_v41 = vadd.f32 %v3734_v38, %v3733_v37  ;;  %v6259_v37 = vpack.c.bf16 %v4261_v33, %v4260_v22 }
 0xb37   :  { %v3736_v14 = vrot.slane %v3735_v41, 2  ;;  %6260 = vmatpush3.bf16.msra.mxu0 %v6259_v37 }
 0xb38   :  { %6261 = vmatprep.subr.bf16.mxu0 %v6684_v7 }
 0xb39   :  { %v3737_v44 = vadd.f32 %v3736_v14, %v3735_v41 }
 0xb3b   :  { %v3738_v30 = vrot.slane %v3737_v44, 1 }
 0xb3d   :  { %v3739_v39 = vadd.f32 %v3738_v30, %v3737_v44 }
 0xb3f   :  { %v3740_v58 = vadd.f32 1e-05, %v3739_v39 }
 0xb41   :  { %6673 = vrsqrt.f32 %v3740_v58 }
 0xb4b   :  { %v6674_v0 = vpop.eup %6673 }
 0xb4c   :  { %v3742_v10 = vmul.f32 %v6674_v0, %v3646_v5  ;;  %v3743_v8 = vmul.f32 %v6674_v0, %v3647_v51  ;;  %v6661_v51 = vld [vmem:[%s8325_s14 + $0x70] sm:$0xff]   ;;  %v6662_v5 = vld [vmem:[%s8325_s14 + $0x78] sm:$0xff]  }
 0xb4e   :  { %v3751_v13 = vmul.f32 %v5416_v2, %v3742_v10  ;;  %v3752_v18 = vmul.f32 %v5416_v2, %v3743_v8 }
 0xb50   :  { %v3760_v29 = vadd.f32 %v5417_v12, %v3751_v13  ;;  %v3761_v31 = vadd.f32 %v5417_v12, %v3752_v18 }
 0xb52   :  { %vm3762_vm8 = vcmp.ge.f32.partialorder %v3760_v29, 0.0  ;;  %vm3763_vm9 = vcmp.ge.f32.partialorder %v3761_v31, 0.0  ;;  %v3764_v34 = vmul.f32 0.2, %v3760_v29  ;;  %v3765_v40 = vmul.f32 0.2, %v3761_v31 }
 0xb54   :  { %v3766_v42 = vsel %vm3762_vm8, %v3760_v29, %v3764_v34  ;;  %v3767_v63 = vsel %vm3763_vm9, %v3761_v31, %v3765_v40 }
 0xb55   :  { %v8108_v32 = vpack.c.bf16 %v3767_v63, %v3766_v42 }
 0xb57   :  { %6010 = vmatpush3.bf16.msra.mxu1 %v8108_v32 }
 0xb58   :  { %6015 = vmatprep.subr.bf16.mxu1 %v6682_v17 }
 0xb5a   :  { %6012 = vmatmul.mubr.msk.bf16.vlgmr.msra.gmra.mrb[124].mxu1 %vm3770_vm10, %v3769_v62 }
 0xb5b   :  { %6016 = vmatpush3.bf16.msra.mxu1 %v8108_v32  ;;  %6017 = vmatprep.mubr.msk.bf16.mxu1 %vm6683_vm2, %v6682_v17 }
 0xb5c   :  { %6021 = vmatprep.subr.bf16.mxu1 %v6682_v17 }
 0xb62   :  { %6018 = vmatmul.mubr.msk.bf16.vlgmr.msra.gmra.mrb[128].mxu1 %vm3770_vm10, %v5419_v4 }
 0xb63   :  { %6022 = vmatpush3.bf16.msra.mxu1 %v6647_v23  ;;  %6029 = vmatprep.mubr.msk.bf16.mxu1 %vm6683_vm2, %v6682_v17 }
 0xb64   :  { %6023 = vmatprep.subr.bf16.mxu1 %v6682_v17 }
 0xb67   :  { %6024 = vmatpush3.bf16.msra.mxu1 %v6648_v1 }
 0xb68   :  { %6025 = vmatprep.subr.bf16.mxu1 %v6682_v17 }
 0xb6b   :  { %6026 = vmatpush3.bf16.msra.mxu1 %v6649_v47 }
 0xb6c   :  { %6027 = vmatprep.subr.bf16.mxu1 %v6682_v17 }
 0xb6f   :  { %6028 = vmatpush3.bf16.msra.mxu1 %v6650_v24 }
 0xb70   :  { %6033 = vmatprep.subr.bf16.mxu1 %v6682_v17 }
 0xc2d   :  { %v3808_v15 = vpop.f32.mrb[124].mxu1 }
 0xc2e   :  { %v6013_v28 = vpop.f32.mrb[125].mxu1  ;;  %v3814_v50 = vpack.c.bf16 %v3808_v15, %v3808_v15 }
 0xc2f   :  { %v3811_v26 = vpop.f32.mrb[126].mxu1 }
 0xc30   :  { %v6014_v3 = vpop.f32.mrb[127].mxu1 }
 0xc35   :  { %v3862_v20 = vpop.f32.mrb[128].mxu1 }
 0xc36   :  { %v3868_v49 = vpack.c.bf16 %v3862_v20, %v3862_v20  ;;  %v6019_v11 = vpop.f32.mrb[129].mxu1  ;;  %v5471_v20 = vld [vmem:[%s8331_s16] ss:$0 sm:$0xff] }
 0xc37   :  { %v3865_v59 = vpop.f32.mrb[130].mxu1 }
 0xc38   :  { %v6020_v16 = vpop.f32.mrb[131].mxu1  ;;  %6030 = vmatmul.mubr.msk.bf16.vlgmr.msra.gmra.mrb[132].mxu1 %vm558_vm0, %v3868_v49  ;;  %v5472_v49 = vld [vmem:[%s8332_s17] ss:$0 sm:$0xff] }
 0xc39   :  { %6034 = vmatpush3.bf16.msra.mxu1 %v6651_v45  ;;  %6041 = vmatprep.mubr.msk.bf16.mxu1 %vm6683_vm2, %v6682_v17 }
 0xc3a   :  { %6035 = vmatprep.subr.bf16.mxu1 %v6682_v17 }
 0xc3d   :  { %6036 = vmatpush3.bf16.msra.mxu1 %v6652_v56 }
 0xc3e   :  { %6037 = vmatprep.subr.bf16.mxu1 %v6682_v17 }
 0xc41   :  { %6038 = vmatpush3.bf16.msra.mxu1 %v6653_v19 }
 0xc42   :  { %6039 = vmatprep.subr.bf16.mxu1 %v6682_v17 }
 0xc45   :  { %6040 = vmatpush3.bf16.msra.mxu1 %v6654_v36 }
 0xc46   :  { %6045 = vmatprep.subr.bf16.mxu1 %v6682_v17 }
 0xc48   :  { %6042 = vmatmul.mubr.msk.bf16.vlgmr.msra.gmra.mrb[132].mxu1 %vm558_vm0, %v3814_v50  ;;  %v5474_v50 = vld [vmem:[%s8333_s18 + $0x1] sm:$0x1] }
 0xc49   :  { %6046 = vmatpush3.bf16.msra.mxu1 %v8108_v32  ;;  %6047 = vmatprep.mubr.msk.bf16.mxu1 %vm6683_vm2, %v6682_v17 }
 0xc4a   :  { %6051 = vmatprep.subr.bf16.mxu1 %v6682_v17 }
 0xc50   :  { %6048 = vmatmul.mubr.msk.bf16.vlgmr.msra.gmra.mrb[136].mxu1 %vm3770_vm10, %v5439_v53  ;;  %v4447_v53 = vld [vmem:[%s8333_s18] sm:$0x1] }
 0xc51   :  { %6052 = vmatpush3.bf16.msra.mxu1 %v6655_v54  ;;  %6059 = vmatprep.mubr.msk.bf16.mxu1 %vm6683_vm2, %v6682_v17  ;;  %v6663_v54 = vld [vmem:[%s8330_s19 + $0x10] sm:$0xff]  }
 0xc52   :  { %6053 = vmatprep.subr.bf16.mxu1 %v6682_v17 }
 0xc55   :  { %6054 = vmatpush3.bf16.msra.mxu1 %v6656_v27  ;;  %v5486_v27 = vld [vmem:[%s8333_s18 + $0x2] sm:$0x1] }
 0xc56   :  { %6055 = vmatprep.subr.bf16.mxu1 %v6682_v17 }
 0xc59   :  { %6056 = vmatpush3.bf16.msra.mxu1 %v6657_v35  ;;  %v5495_v35 = vld [vmem:[%s8333_s18 + $0x3] sm:$0x1] }
 0xc5a   :  { %6057 = vmatprep.subr.bf16.mxu1 %v6682_v17 }
 0xc5d   :  { %6058 = vmatpush3.bf16.msra.mxu1 %v6658_v46  ;;  %v6664_v46 = vld [vmem:[%s8330_s19 + $0x18] sm:$0xff]  }
 0xc5e   :  { %6063 = vmatprep.subr.bf16.mxu1 %v6682_v17 }
 0xd23   :  { %v4051_v52 = vpop.f32.mrb[136].mxu1 }
 0xd24   :  { %v4057_v55 = vpack.c.bf16 %v4051_v52, %v4051_v52  ;;  %v6049_v57 = vpop.f32.mrb[137].mxu1 }
 0xd25   :  { %v4054_v60 = vpop.f32.mrb[138].mxu1 }
 0xd26   :  { %v6050_v61 = vpop.f32.mrb[139].mxu1  ;;  %6060 = vmatmul.mubr.msk.bf16.vlgmr.msra.gmra.mrb[132].mxu1 %vm558_vm0, %v4057_v55  ;;  %v6665_v55 = vld [vmem:[%s8330_s19] sm:$0xff]  }
 0xd27   :  { %6064 = vmatpush3.bf16.msra.mxu1 %v8108_v32  ;;  %6065 = vmatprep.mubr.msk.bf16.mxu1 %vm6683_vm2, %v6682_v17 }
 0xd28   :  { %6069 = vmatprep.subr.bf16.mxu1 %v6682_v17 }
 0xd2e   :  { %6066 = vmatmul.mubr.msk.bf16.vlgmr.msra.gmra.mrb[140].mxu1 %vm3770_vm10, %v5454_v6 }
 0xd2f   :  { %6070 = vmatpush3.bf16.msra.mxu1 %v6659_v43  ;;  %6077 = vmatprep.mubr.msk.bf16.mxu1 %vm6683_vm2, %v6682_v17 }
 0xd30   :  { %6071 = vmatprep.subr.bf16.mxu1 %v6682_v17 }
 0xd33   :  { %6072 = vmatpush3.bf16.msra.mxu1 %v6660_v48 }
 0xd34   :  { %6073 = vmatprep.subr.bf16.mxu1 %v6682_v17 }
 0xd37   :  { %6074 = vmatpush3.bf16.msra.mxu1 %v6661_v51 }
 0xd38   :  { %6075 = vmatprep.subr.bf16.mxu1 %v6682_v17 }
 0xd3b   :  { %6076 = vmatpush3.bf16.msra.mxu1 %v6662_v5 }
 0xd3c   :  { %6109 = vmatprep.subr.bf16.mxu1 %v6682_v17 }
 0xe01   :  { %v4174_v38 = vpop.f32.mrb[140].mxu1 }
 0xe02   :  { %v4180_v41 = vpack.c.bf16 %v4174_v38, %v4174_v38  ;;  %v6067_v14 = vpop.f32.mrb[141].mxu1  ;;  %v6668_v38 = vld [vmem:[%s8330_s19 + $0x28] sm:$0xff]  }
 0xe03   :  { %v4177_v44 = vpop.f32.mrb[142].mxu1 }
 0xe04   :  { %v6068_v30 = vpop.f32.mrb[143].mxu1  ;;  %6078 = vmatmul.mubr.msk.bf16.vlgmr.msra.gmra.mrb[132].mxu1 %vm558_vm0, %v4180_v41 }
 0xe05   :  { %6111 = vmatprep.mubr.msk.bf16.mxu1 %vm6683_vm2, %v6682_v17 }
 0xed7   :  { %v4251_v39 = vpop.f32.mrb[132].mxu1 }
 0xed8   :  { %v6079_v58 = vpop.f32.mrb[133].mxu1  ;;  %6090 = vmatmul.mubr.msk.f32.vlgmr.msra.gmra.mrb[52].mxu0 %vm2916_vm7, %v4251_v39 }
 0xed9   :  { %v4254_v0 = vpop.f32.mrb[134].mxu1  ;;  %6263 = vmatpush3.bf16.msra.mxu0 %v6256_v25  ;;  %6100 = vmatprep.mubr.msk.f32.mxu0 %vm6683_vm2, %v6682_v17  ;;  %v6669_v58 = vld [vmem:[%s8330_s19 + $0x30] sm:$0xff]  }
 0xeda   :  { %v6080_v2 = vpop.f32.mrb[135].mxu1  ;;  %6264 = vmatprep.subr.bf16.mxu0 %v6684_v7  ;;  %v6666_v7 = vld [vmem:[%s8330_s19 + $0x8] sm:$0xff]   ;;  %v6670_v0 = vld [vmem:[%s8330_s19 + $0x38] sm:$0xff]  }
 0xedd   :  { %6266 = vmatpush3.bf16.msra.mxu0 %v6259_v37  ;;  %v6667_v37 = vld [vmem:[%s8330_s19 + $0x20] sm:$0xff]  }
 0xede   :  { %6103 = vmatprep.subr.bf16.mxu0 %v6682_v17 }
 0xfab   :  { %v4331_v10 = vpop.f32.mrb[52].mxu0 }
 0xfac   :  { %v4335_v8 = vsel %vm2916_vm7, %v4331_v10, 0.0  ;;  %v6091_v12 = vpop.f32.mrb[53].mxu0 }
 0xfad   :  { %v4336_v13 = vrot.slane %v4335_v8, 4 }
 0xfaf   :  { %v4337_v18 = vadd.f32 %v4336_v13, %v4335_v8 }
 0xfb1   :  { %v4338_v29 = vrot.slane %v4337_v18, 2 }
 0xfb3   :  { %v4339_v31 = vadd.f32 %v4338_v29, %v4337_v18 }
 0xfb5   :  { %v4340_v34 = vrot.slane %v4339_v31, 1 }
 0xfb7   :  { %v4341_v40 = vadd.f32 %v4340_v34, %v4339_v31 }
 0xfb9   :  { %v4342_v42 = vsub.f32 %v4251_v39, %v4341_v40 }
 0xfbb   :  { %v4343_v63 = vmul.f32 %v4342_v42, %v4342_v42 }
 0xfbd   :  { %6101 = vmatmul.mubr.msk.f32.vlgmr.msra.gmra.mrb[54].mxu0 %vm2916_vm7, %v4343_v63 }
 0xfbe   :  { %6105 = vmatprep.mubr.msk.bf16.mxu0 %vm6683_vm2, %v6682_v17 }
0x1090   :  { %v4413_v32 = vpop.f32.mrb[54].mxu0 }
0x1091   :  { %v4417_v62 = vsel %vm2916_vm7, %v4413_v32, 0.0  ;;  %v6102_v4 = vpop.f32.mrb[55].mxu0 }
0x1092   :  { %v4418_v23 = vrot.slane %v4417_v62, 4 }
0x1094   :  { %v4419_v1 = vadd.f32 %v4418_v23, %v4417_v62 }
0x1096   :  { %v4420_v47 = vrot.slane %v4419_v1, 2 }
0x1098   :  { %v4421_v24 = vadd.f32 %v4420_v47, %v4419_v1 }
0x109a   :  { %v4422_v15 = vrot.slane %v4421_v24, 1 }
0x109c   :  { %v4423_v28 = vadd.f32 %v4422_v15, %v4421_v24 }
0x109e   :  { %v4424_v26 = vadd.f32 1e-05, %v4423_v28 }
0x10a0   :  { %6675 = vrsqrt.f32 %v4424_v26 }
0x10aa   :  { %v6676_v3 = vpop.eup %6675 }
0x10ab   :  { %v4426_v45 = vmul.f32 %v6676_v3, %v4342_v42 }
0x10ad   :  { %v4434_v11 = vmul.f32 %v5471_v20, %v4426_v45 }
0x10af   :  { %v4442_v59 = vadd.f32 %v5472_v49, %v4434_v11 }
0x10b1   :  { %vm4443_vm0 = vcmp.ge.f32.partialorder %v4442_v59, 0.0  ;;  %v4444_v16 = vmul.f32 0.2, %v4442_v59 }
0x10b3   :  { %v4445_v56 = vsel %vm4443_vm0, %v4442_v59, %v4444_v16 }
0x10b4   :  { %v4446_v19 = vpack.c.bf16 %v4445_v56, %v4445_v56 }
0x10b6   :  { %v4454_v36 = vsel %vm4452_vm11, %v4446_v19, 0 }
0x10b7   :  { %6104 = vmatpush3.bf16.msra.mxu0 %v4454_v36  ;;  %6110 = vmatpush3.bf16.msra.mxu1 %v4454_v36 }
0x10b8   :  { %6131 = vmatprep.subr.bf16.mxu1 %v6682_v17  ;;  %6115 = vmatprep.subr.bf16.mxu0 %v6682_v17 }
0x10ba   :  { %6112 = vmatmul.mubr.msk.bf16.vlgmr.msra.gmra.mrb[144].mxu1 %vm4448_vm12, %v5474_v50  ;;  %6106 = vmatmul.mubr.msk.bf16.vlgmr.msra.gmra.mrb[56].mxu0 %vm4448_vm12, %v4447_v53 }
0x10bb   :  { %6132 = vmatpush3.bf16.msra.mxu1 %v4454_v36  ;;  %6133 = vmatprep.mubr.msk.bf16.mxu1 %vm6683_vm2, %v6682_v17 }
0x10bc   :  { %6145 = vmatprep.subr.bf16.mxu1 %v6682_v17  ;;  %6116 = vmatpush3.bf16.msra.mxu0 %v6663_v54 }
0x10bd   :  { %6117 = vmatprep.subr.bf16.mxu0 %v6682_v17  ;;  %6119 = vmatprep.mubr.msk.bf16.mxu0 %vm6683_vm2, %v6682_v17 }
0x10c0   :  { %6118 = vmatpush3.bf16.msra.mxu0 %v6664_v46 }
0x10c1   :  { %6123 = vmatprep.subr.bf16.mxu0 %v6682_v17 }
0x10c2   :  { %6134 = vmatmul.mubr.msk.bf16.vlgmr.msra.gmra.mrb[148].mxu1 %vm4448_vm12, %v5486_v27 }
0x10c3   :  { %6146 = vmatpush3.bf16.msra.mxu1 %v4454_v36  ;;  %6147 = vmatprep.mubr.msk.bf16.mxu1 %vm6683_vm2, %v6682_v17 }
0x10ca   :  { %6148 = vmatmul.mubr.msk.bf16.vlgmr.msra.gmra.mrb[152].mxu1 %vm4448_vm12, %v5495_v35 }
0x118d   :  { %v4540_v52 = vpop.f32.mrb[144].mxu1  ;;  %v4490_v57 = vpop.f32.mrb[56].mxu0 }
0x118e   :  { %v4546_v60 = vpack.c.bf16 %v4540_v52, %v4540_v52  ;;  %v6113_v61 = vpop.f32.mrb[145].mxu1  ;;  %v6107_v6 = vpop.f32.mrb[57].mxu0  ;;  %v4496_v25 = vpack.c.bf16 %v4490_v57, %v4490_v57 }
0x118f   :  { %v4543_v43 = vpop.f32.mrb[146].mxu1  ;;  %v4493_v48 = vpop.f32.mrb[58].mxu0 }
0x1190   :  { %6120 = vmatmul.mubr.msk.bf16.vlgmr.msra.gmra.mrb[60].mxu0 %vm2916_vm7, %v4546_v60  ;;  %v6114_v51 = vpop.f32.mrb[147].mxu1  ;;  %v6108_v5 = vpop.f32.mrb[59].mxu0 }
0x1191   :  { %6124 = vmatpush3.bf16.msra.mxu0 %v6665_v55  ;;  %6127 = vmatprep.mubr.msk.bf16.mxu0 %vm6683_vm2, %v6682_v17 }
0x1192   :  { %6125 = vmatprep.subr.bf16.mxu0 %v6682_v17 }
0x1195   :  { %6126 = vmatpush3.bf16.msra.mxu0 %v6666_v7  ;;  %v4701_v21 = vpop.f32.mrb[148].mxu1 }
0x1196   :  { %6137 = vmatprep.subr.bf16.mxu0 %v6682_v17  ;;  %v6135_v9 = vpop.f32.mrb[149].mxu1  ;;  %v4707_v39 = vpack.c.bf16 %v4701_v21, %v4701_v21 }
0x1197   :  { %v4704_v22 = vpop.f32.mrb[150].mxu1 }
0x1198   :  { %v6136_v33 = vpop.f32.mrb[151].mxu1 }
0x119c   :  { %6128 = vmatmul.mubr.msk.bf16.vlgmr.msra.gmra.mrb[60].mxu0 %vm2916_vm7, %v4496_v25 }
0x119d   :  { %6138 = vmatpush3.bf16.msra.mxu0 %v6667_v37  ;;  %6141 = vmatprep.mubr.msk.bf16.mxu0 %vm6683_vm2, %v6682_v17  ;;  %v4808_v41 = vpop.f32.mrb[152].mxu1 }
0x119e   :  { %6139 = vmatprep.subr.bf16.mxu0 %v6682_v17  ;;  %v6149_v14 = vpop.f32.mrb[153].mxu1  ;;  %v4814_v2 = vpack.c.bf16 %v4808_v41, %v4808_v41 }
0x119f   :  { %v4811_v44 = vpop.f32.mrb[154].mxu1 }
0x11a0   :  { %v6150_v30 = vpop.f32.mrb[155].mxu1 }
0x11a1   :  { %6140 = vmatpush3.bf16.msra.mxu0 %v6668_v38 }
0x11a2   :  { %6151 = vmatprep.subr.bf16.mxu0 %v6682_v17 }
0x11a8   :  { %6142 = vmatmul.mubr.msk.bf16.vlgmr.msra.gmra.mrb[60].mxu0 %vm2916_vm7, %v4707_v39 }
0x11a9   :  { %6152 = vmatpush3.bf16.msra.mxu0 %v6669_v58  ;;  %6155 = vmatprep.mubr.msk.bf16.mxu0 %vm6683_vm2, %v6682_v17 }
0x11aa   :  { %6153 = vmatprep.subr.bf16.mxu0 %v6682_v17 }
0x11ad   :  { %6154 = vmatpush3.bf16.msra.mxu0 %v6670_v0 }
0x11b4   :  { %6156 = vmatmul.mubr.msk.bf16.vlgmr.msra.gmra.mrb[60].mxu0 %vm2916_vm7, %v4814_v2 }
0x1287   :  { %v4869_v10 = vpop.f32.mrb[60].mxu0 }
0x1288   :  { %v5504_v8 = vmul.f32 -1.442695, %v4869_v10  ;;  %v6157_v12 = vpop.f32.mrb[61].mxu0 }
0x1289   :  { %v4872_v13 = vpop.f32.mrb[62].mxu0 }
0x128a   :  { %6677 = vpow2.f32 %v5504_v8  ;;  %v6158_v18 = vpop.f32.mrb[63].mxu0 }
0x1294   :  { %v6678_v29 = vpop.eup %6677 }
0x1295   :  { %v4879_v31 = vadd.f32 1.0, %v6678_v29 }
0x1297   :  { %6679 = vrcp.f32 %v4879_v31 }
0x12a1   :  { %v6680_v34 = vpop.eup %6679 }
0x12a2   :  { %4883 = vst.msk [vmem:[%s8334_s20] sm:$0x3] %vm4882_vm13, %v6680_v34 }

</bundles_post_ra>
